<compile_context>
chip_gen: v7x
topology: tpu7x:2x2x1
jax: 0.10.0
libtpu: 0.0.40
codegen_flags: <defaults>
</compile_context>

<pallas_src>
import jax
import jax.numpy as jnp
from jax.experimental import pallas as pl
from jax.experimental.pallas import tpu as pltpu


def _round_up(x, m):
    return (x + m - 1) // m * m


def _cdiv(x, m):
    return (x + m - 1) // m


# Channel paddings carried between stages (narrow, per review).
C1_PAD = 32     # conv1 cout 20 -> 32 lanes (stage-2 cin)
K1_PAD = 32     # stage-1 im2col K 25 -> 32 (padded inside the concat)
C2_PAD = 64     # conv2 cout 50 -> 64 lanes (head cin)
N3_PAD = 512    # conv3 cout 500 -> 512
N4_PAD = 128    # conv4 cout 10 -> 128 (final, sliced to 10)


# ---------------------------- Pallas kernels ----------------------------

def _conv_relu_pool_kernel(c_ref, w_ref, b_ref, o_ref):
    """Fused conv(+bias)+ReLU+2x2 maxpool.

    c_ref: (4, TM, K) bf16 — one im2col row-block per pooling corner.
    w_ref: (K, N) bf16.  b_ref: (1, N) f32.  o_ref: (TM, N) bf16.
    pool(relu(conv)) == relu(max_corners(cols @ W) + b)  (ReLU monotone, bias const).
    """
    w = w_ref[...]
    acc = jnp.dot(c_ref[0], w, preferred_element_type=jnp.float32)
    acc = jnp.maximum(acc, jnp.dot(c_ref[1], w, preferred_element_type=jnp.float32))
    acc = jnp.maximum(acc, jnp.dot(c_ref[2], w, preferred_element_type=jnp.float32))
    acc = jnp.maximum(acc, jnp.dot(c_ref[3], w, preferred_element_type=jnp.float32))
    o_ref[...] = jnp.maximum(acc + b_ref[...], 0.0).astype(o_ref.dtype)


def _head_kernel(x_ref, w3_ref, b3_ref, w4_ref, b4_ref, o_ref):
    """Fused conv3(+bias)+ReLU followed by conv4(+bias) on the resident tile."""
    h = jnp.dot(x_ref[...], w3_ref[...], preferred_element_type=jnp.float32)
    h = jnp.maximum(h + b3_ref[...], 0.0)                     # f32 epilogue
    y = jnp.dot(h.astype(jnp.bfloat16), w4_ref[...],
                preferred_element_type=jnp.float32)
    o_ref[...] = (y + b4_ref[...]).astype(o_ref.dtype)


# ------------------------------ wrappers --------------------------------

def _pick_tile(m, tmax, min_steps=2):
    """Row tile: multiple of 16 (bf16 sublane packing), <= tmax, and sized so
    the grid has >= min_steps steps when the problem is big enough (v7x TCs)."""
    tm = _round_up(max(1, _cdiv(m, min_steps)), 16)
    tm = max(16, min(tm, tmax, _round_up(m, 16)))
    mp = _round_up(m, tm)
    return tm, mp


_MOSAIC_PARAMS = pltpu.CompilerParams(
    dimension_semantics=("parallel",),
    vmem_limit_bytes=32 * 1024 * 1024,
)


def conv_relu_pool(corners, w, b, *, tm_max=512):
    """corners: (4, M, K) bf16; w: (K, N) bf16; b: (1, N) f32 -> (M, N) bf16."""
    ncorners, M, K = corners.shape
    Kw, N = w.shape
    assert ncorners == 4 and Kw == K, (corners.shape, w.shape)

    tm, Mp = _pick_tile(M, tm_max)
    if Mp != M:
        corners = jnp.pad(corners, ((0, 0), (0, Mp - M), (0, 0)))

    flops = 4 * 2 * Mp * K * N
    bytes_accessed = 4 * Mp * K * 2 + K * N * 2 + N * 4 + Mp * N * 2

    out = pl.pallas_call(
        _conv_relu_pool_kernel,
        out_shape=jax.ShapeDtypeStruct((Mp, N), jnp.bfloat16),
        grid=(Mp // tm,),
        in_specs=[pl.BlockSpec((4, tm, K), lambda i: (0, i, 0)),
                  pl.BlockSpec((K, N), lambda i: (0, 0)),
                  pl.BlockSpec((1, N), lambda i: (0, 0))],
        out_specs=pl.BlockSpec((tm, N), lambda i: (i, 0)),
        compiler_params=_MOSAIC_PARAMS,
        cost_estimate=pl.CostEstimate(flops=flops, transcendentals=0,
                                      bytes_accessed=bytes_accessed),
    )(corners, w, b)
    return out[:M] if Mp != M else out


def head(x, w3, b3, w4, b4, *, tb_max=256):
    """x: (B, K) bf16; conv3+relu+conv4 -> (B, N4) f32 (first 10 lanes valid)."""
    B, K = x.shape
    N3 = w3.shape[1]
    N4 = w4.shape[1]
    tb, Bp = _pick_tile(B, tb_max)
    if Bp != B:
        x = jnp.pad(x, ((0, Bp - B), (0, 0)))

    flops = 2 * Bp * K * N3 + 2 * Bp * N3 * N4
    bytes_accessed = (Bp * K * 2 + K * N3 * 2 + N3 * 4
                      + N3 * N4 * 2 + N4 * 4 + Bp * N4 * 4)

    out = pl.pallas_call(
        _head_kernel,
        out_shape=jax.ShapeDtypeStruct((Bp, N4), jnp.float32),
        grid=(Bp // tb,),
        in_specs=[pl.BlockSpec((tb, K), lambda i: (i, 0)),
                  pl.BlockSpec((K, N3), lambda i: (0, 0)),
                  pl.BlockSpec((1, N3), lambda i: (0, 0)),
                  pl.BlockSpec((N3, N4), lambda i: (0, 0)),
                  pl.BlockSpec((1, N4), lambda i: (0, 0))],
        out_specs=pl.BlockSpec((tb, N4), lambda i: (i, 0)),
        compiler_params=_MOSAIC_PARAMS,
        cost_estimate=pl.CostEstimate(flops=flops, transcendentals=0,
                                      bytes_accessed=bytes_accessed),
    )(x, w3, b3, w4, b4)
    return out[:B] if Bp != B else out


def _corner_im2col(x, k, pool, k_pad_to=None):
    """x: (B,H,W,C) NHWC; valid conv stride 1 followed by pool x pool maxpool.

    Returns a stacked (pool*pool, B*Hp*Wp, Kp) array (one slab per pooling
    corner (dy,dx)), row order (b, i, j), feature order (kh, kw, c), with the
    feature dim zero-padded to k_pad_to inside the concat (no extra HBM pass).
    """
    B, H, W, C = x.shape
    Ho, Wo = H - k + 1, W - k + 1
    assert Ho % pool == 0 and Wo % pool == 0, (
        "maxpool corner trick requires conv output dims divisible by pool")
    Hp, Wp = Ho // pool, Wo // pool
    K = k * k * C
    Kp = K if k_pad_to is None else max(K, k_pad_to)
    outs = []
    for dy in range(pool):
        for dx in range(pool):
            cols = []
            for kh in range(k):
                for kw in range(k):
                    h0, w0 = dy + kh, dx + kw
                    cols.append(x[:, h0: h0 + pool * (Hp - 1) + 1: pool,
                                     w0: w0 + pool * (Wp - 1) + 1: pool, :])
            if Kp > K:
                cols.append(jnp.zeros((B, Hp, Wp, Kp - K), x.dtype))
            patch = jnp.concatenate(cols, axis=-1)          # (B, Hp, Wp, Kp)
            outs.append(patch.reshape(B * Hp * Wp, Kp))
    return jnp.stack(outs, axis=0).astype(jnp.bfloat16)     # (pool*pool, M, Kp)


# ------------------------------ params ----------------------------------

def init_params(key):
    """Deterministic init with PyTorch Conv2d weight shapes (Cout,Cin,k,k)."""
    def conv_init(k_, cout, cin, ksz):
        wk, bk = jax.random.split(k_)
        bound = 1.0 / float(cin * ksz * ksz) ** 0.5
        w = jax.random.uniform(wk, (cout, cin, ksz, ksz), jnp.float32, -bound, bound)
        b = jax.random.uniform(bk, (cout,), jnp.float32, -bound, bound)
        return w, b

    k1, k2, k3, k4 = jax.random.split(key, 4)
    w1, b1 = conv_init(k1, 20, 1, 5)     # conv1: Conv2d(1, 20, 5, 1)
    w2, b2 = conv_init(k2, 50, 20, 5)    # conv2: Conv2d(20, 50, 5, 1)
    w3, b3 = conv_init(k3, 500, 50, 4)   # conv3: Conv2d(50, 500, 4, 1)
    w4, b4 = conv_init(k4, 10, 500, 1)   # conv4: Conv2d(500, 10, 1, 1)
    return dict(w1=w1, b1=b1, w2=w2, b2=b2, w3=w3, b3=b3, w4=w4, b4=b4)


def prepare_params(params):
    """One-time: transpose to (kh,kw,cin,cout), zero-pad cin to the *narrow*
    padded width used by the preceding activation, optionally pad K, pad cout,
    cast weights to bf16 (biases stay f32)."""
    def prep(w, b, cin_pad, n_pad, k_pad_to=None):
        cout, cin, k, _ = w.shape
        wt = jnp.transpose(w, (2, 3, 1, 0))                           # (kh,kw,cin,cout)
        wp = jnp.zeros((k, k, cin_pad, cout), jnp.float32).at[:, :, :cin, :].set(wt)
        wp = wp.reshape(k * k * cin_pad, cout)
        K = wp.shape[0]
        Kp = K if k_pad_to is None else max(K, k_pad_to)
        wfull = jnp.zeros((Kp, n_pad), jnp.float32).at[:K, :cout].set(wp)
        bp = jnp.zeros((1, n_pad), jnp.float32).at[0, :cout].set(b)
        return wfull.astype(jnp.bfloat16), bp

    w1, b1 = prep(params['w1'], params['b1'], cin_pad=1,      n_pad=C1_PAD,
                  k_pad_to=K1_PAD)                                  # K = 32
    w2, b2 = prep(params['w2'], params['b2'], cin_pad=C1_PAD, n_pad=C2_PAD)   # K = 800
    w3, b3 = prep(params['w3'], params['b3'], cin_pad=C2_PAD, n_pad=N3_PAD)   # K = 1024
    w4, b4 = prep(params['w4'], params['b4'], cin_pad=N3_PAD, n_pad=N4_PAD)   # K = 512
    return dict(w1=w1, b1=b1, w2=w2, b2=b2, w3=w3, b3=b3, w4=w4, b4=b4)


# ------------------------------ model -----------------------------------

def lenet_fcn_forward(x_nchw, p):
    """Input NCHW (B,1,28,28) as in PyTorch; output (B, 10) f32."""
    B = x_nchw.shape[0]
    # Cast once up front: matmul operands are bf16 anyway, and this keeps the
    # im2col corner slabs bf16 (half the HBM traffic of f32 corners).
    x = jnp.transpose(x_nchw, (0, 2, 3, 1)).astype(jnp.bfloat16)    # (B,28,28,1)

    # stage 1: conv1(5x5,1->20) + ReLU + 2x2 maxpool (single fused kernel)
    c1 = _corner_im2col(x, k=5, pool=2, k_pad_to=K1_PAD)            # (4, B*144, 32)
    a1 = conv_relu_pool(c1, p['w1'], p['b1'], tm_max=512)           # (B*144, 32) bf16
    a1 = a1.reshape(B, 12, 12, C1_PAD)                              # free (contiguous)

    # stage 2: conv2(5x5,20->50) + ReLU + 2x2 maxpool; channels carried at 32
    # lanes, so K = 25*32 = 800 (was 3200 with 128-lane padding).
    c2 = _corner_im2col(a1, k=5, pool=2)                            # (4, B*16, 800)
    a2 = conv_relu_pool(c2, p['w2'], p['b2'], tm_max=512)           # (B*16, 64) bf16

    # stage 3: conv3(4x4,50->500) + ReLU + conv4(1x1,500->10) (single fused kernel)
    a2 = a2.reshape(B, 16 * C2_PAD)                                 # (B, 1024), free
    y = head(a2, p['w3'], p['b3'], p['w4'], p['b4'])                # (B, 128) f32

    return y[:, :10]                                                # x.view(-1, 10)


if __name__ == "__main__":
    key = jax.random.PRNGKey(0)
    pkey, xkey = jax.random.split(key)
    params = prepare_params(init_params(pkey))      # one-time weight prep (not jitted)
    # 28x28 so conv3 (k=4) sees exactly 4x4 and view(-1, 10) is per-example.
    x = jax.random.normal(xkey, (2, 1, 28, 28), jnp.float32)
    out = jax.jit(lenet_fcn_forward)(x, params)
    jax.block_until_ready(out)
    assert out.shape == (2, 10) and out.dtype == jnp.float32
    print("KERNEL_OK")
</pallas_src>

<mosaic_0001>
module attributes {stable_mosaic.version = 11 : i64} {
  func.func @_conv_relu_pool_kernel(%arg0: i32, %arg1: memref<4x144x32xbf16, #tpu.memory_space<vmem>>, %arg2: memref<32x32xbf16, #tpu.memory_space<vmem>>, %arg3: memref<1x32xf32, #tpu.memory_space<vmem>>, %arg4: memref<144x32xbf16, #tpu.memory_space<vmem>>) attributes {dimension_semantics = [#tpu.dimension_semantics<parallel>], iteration_bounds = array<i64: 2>, scalar_prefetch = 0 : i64, scratch_operands = 0 : i64, tpu.core_type = #tpu.core_type<tc>, window_params = [{transform_indices = @transform_0, window_bounds = array<i64: 4, 144, 32>}, {pipeline_mode = #tpu.pipeline_mode<synchronous>, transform_indices = @transform_1, window_bounds = array<i64: 32, 32>}, {pipeline_mode = #tpu.pipeline_mode<synchronous>, transform_indices = @transform_2, window_bounds = array<i64: 1, 32>}, {transform_indices = @transform_3, window_bounds = array<i64: 144, 32>}]} {
    %c0 = arith.constant 0 : index
    %c0_0 = arith.constant 0 : index
    %0 = vector.load %arg2[%c0, %c0_0] : memref<32x32xbf16, #tpu.memory_space<vmem>>, vector<32x32xbf16>
    %c0_1 = arith.constant 0 : index
    %c0_2 = arith.constant 0 : index
    %c0_3 = arith.constant 0 : index
    %1 = vector.load %arg1[%c0_1, %c0_2, %c0_3] : memref<4x144x32xbf16, #tpu.memory_space<vmem>>, vector<1x144x32xbf16>
    %2 = vector.shape_cast %1 : vector<1x144x32xbf16> to vector<144x32xbf16>
    %cst = arith.constant dense<0.000000e+00> : vector<144x32xf32>
    %3 = tpu.matmul %2, %0, %cst {dimension_numbers = #tpu.dot_dimension_numbers<[1], [0], [0], [1], [0, 0, 1, 1], [], []>} : vector<144x32xbf16>, vector<32x32xbf16>, vector<144x32xf32> -> vector<144x32xf32>
    %c1 = arith.constant 1 : index
    %c0_4 = arith.constant 0 : index
    %c0_5 = arith.constant 0 : index
    %4 = vector.load %arg1[%c1, %c0_4, %c0_5] : memref<4x144x32xbf16, #tpu.memory_space<vmem>>, vector<1x144x32xbf16>
    %5 = vector.shape_cast %4 : vector<1x144x32xbf16> to vector<144x32xbf16>
    %cst_6 = arith.constant dense<0.000000e+00> : vector<144x32xf32>
    %6 = tpu.matmul %5, %0, %cst_6 {dimension_numbers = #tpu.dot_dimension_numbers<[1], [0], [0], [1], [0, 0, 1, 1], [], []>} : vector<144x32xbf16>, vector<32x32xbf16>, vector<144x32xf32> -> vector<144x32xf32>
    %7 = arith.maximumf %3, %6 : vector<144x32xf32>
    %c2 = arith.constant 2 : index
    %c0_7 = arith.constant 0 : index
    %c0_8 = arith.constant 0 : index
    %8 = vector.load %arg1[%c2, %c0_7, %c0_8] : memref<4x144x32xbf16, #tpu.memory_space<vmem>>, vector<1x144x32xbf16>
    %9 = vector.shape_cast %8 : vector<1x144x32xbf16> to vector<144x32xbf16>
    %cst_9 = arith.constant dense<0.000000e+00> : vector<144x32xf32>
    %10 = tpu.matmul %9, %0, %cst_9 {dimension_numbers = #tpu.dot_dimension_numbers<[1], [0], [0], [1], [0, 0, 1, 1], [], []>} : vector<144x32xbf16>, vector<32x32xbf16>, vector<144x32xf32> -> vector<144x32xf32>
    %11 = arith.maximumf %7, %10 : vector<144x32xf32>
    %c3 = arith.constant 3 : index
    %c0_10 = arith.constant 0 : index
    %c0_11 = arith.constant 0 : index
    %12 = vector.load %arg1[%c3, %c0_10, %c0_11] : memref<4x144x32xbf16, #tpu.memory_space<vmem>>, vector<1x144x32xbf16>
    %13 = vector.shape_cast %12 : vector<1x144x32xbf16> to vector<144x32xbf16>
    %cst_12 = arith.constant dense<0.000000e+00> : vector<144x32xf32>
    %14 = tpu.matmul %13, %0, %cst_12 {dimension_numbers = #tpu.dot_dimension_numbers<[1], [0], [0], [1], [0, 0, 1, 1], [], []>} : vector<144x32xbf16>, vector<32x32xbf16>, vector<144x32xf32> -> vector<144x32xf32>
    %15 = arith.maximumf %11, %14 : vector<144x32xf32>
    %c0_13 = arith.constant 0 : index
    %c0_14 = arith.constant 0 : index
    %16 = vector.load %arg3[%c0_13, %c0_14] : memref<1x32xf32, #tpu.memory_space<vmem>>, vector<1x32xf32>
    %17 = vector.broadcast %16 : vector<1x32xf32> to vector<144x32xf32>
    %18 = arith.addf %15, %17 : vector<144x32xf32>
    %cst_15 = arith.constant 0.000000e+00 : f32
    %19 = vector.broadcast %cst_15 : f32 to vector<144x32xf32>
    %20 = arith.maximumf %18, %19 : vector<144x32xf32>
    %21 = arith.truncf %20 : vector<144x32xf32> to vector<144x32xbf16>
    %c0_16 = arith.constant 0 : index
    %c0_17 = arith.constant 0 : index
    %22 = vector.load %arg4[%c0_16, %c0_17] : memref<144x32xbf16, #tpu.memory_space<vmem>>, vector<144x32xbf16>
    tpu.vector_store %arg4[%c0_16, %c0_17], %21 {strides = array<i32>} : memref<144x32xbf16, #tpu.memory_space<vmem>>, vector<144x32xbf16>,
    return
  }
  func.func @transform_0(%arg0: i32) -> (i32, i32, i32) {
    %c0_i32 = arith.constant 0 : i32
    %c0_i32_0 = arith.constant 0 : i32
    %c0_i32_1 = arith.constant 0 : i32
    return %c0_i32, %arg0, %c0_i32_0 : i32, i32, i32
  }
  func.func @transform_1(%arg0: i32) -> (i32, i32) {
    %c0_i32 = arith.constant 0 : i32
    %c0_i32_0 = arith.constant 0 : i32
    %c0_i32_1 = arith.constant 0 : i32
    return %c0_i32, %c0_i32_0 : i32, i32
  }
  func.func @transform_2(%arg0: i32) -> (i32, i32) {
    %c0_i32 = arith.constant 0 : i32
    %c0_i32_0 = arith.constant 0 : i32
    %c0_i32_1 = arith.constant 0 : i32
    return %c0_i32, %c0_i32_0 : i32, i32
  }
  func.func @transform_3(%arg0: i32) -> (i32, i32) {
    %c0_i32 = arith.constant 0 : i32
    %c0_i32_0 = arith.constant 0 : i32
    return %arg0, %c0_i32 : i32, i32
  }
}

module attributes {stable_mosaic.version = 11 : i64} {
  func.func @_conv_relu_pool_kernel(%arg0: i32, %arg1: memref<4x16x800xbf16, #tpu.memory_space<vmem>>, %arg2: memref<800x64xbf16, #tpu.memory_space<vmem>>, %arg3: memref<1x64xf32, #tpu.memory_space<vmem>>, %arg4: memref<16x64xbf16, #tpu.memory_space<vmem>>) attributes {dimension_semantics = [#tpu.dimension_semantics<parallel>], iteration_bounds = array<i64: 2>, scalar_prefetch = 0 : i64, scratch_operands = 0 : i64, tpu.core_type = #tpu.core_type<tc>, window_params = [{transform_indices = @transform_0, window_bounds = array<i64: 4, 16, 800>}, {pipeline_mode = #tpu.pipeline_mode<synchronous>, transform_indices = @transform_1, window_bounds = array<i64: 800, 64>}, {pipeline_mode = #tpu.pipeline_mode<synchronous>, transform_indices = @transform_2, window_bounds = array<i64: 1, 64>}, {transform_indices = @transform_3, window_bounds = array<i64: 16, 64>}]} {
    %c0 = arith.constant 0 : index
    %c0_0 = arith.constant 0 : index
    %0 = vector.load %arg2[%c0, %c0_0] : memref<800x64xbf16, #tpu.memory_space<vmem>>, vector<800x64xbf16>
    %c0_1 = arith.constant 0 : index
    %c0_2 = arith.constant 0 : index
    %c0_3 = arith.constant 0 : index
    %1 = vector.load %arg1[%c0_1, %c0_2, %c0_3] : memref<4x16x800xbf16, #tpu.memory_space<vmem>>, vector<1x16x800xbf16>
    %2 = vector.shape_cast %1 : vector<1x16x800xbf16> to vector<16x800xbf16>
    %cst = arith.constant dense<0.000000e+00> : vector<16x64xf32>
    %3 = tpu.matmul %2, %0, %cst {dimension_numbers = #tpu.dot_dimension_numbers<[1], [0], [0], [1], [0, 0, 1, 1], [], []>} : vector<16x800xbf16>, vector<800x64xbf16>, vector<16x64xf32> -> vector<16x64xf32>
    %c1 = arith.constant 1 : index
    %c0_4 = arith.constant 0 : index
    %c0_5 = arith.constant 0 : index
    %4 = vector.load %arg1[%c1, %c0_4, %c0_5] : memref<4x16x800xbf16, #tpu.memory_space<vmem>>, vector<1x16x800xbf16>
    %5 = vector.shape_cast %4 : vector<1x16x800xbf16> to vector<16x800xbf16>
    %cst_6 = arith.constant dense<0.000000e+00> : vector<16x64xf32>
    %6 = tpu.matmul %5, %0, %cst_6 {dimension_numbers = #tpu.dot_dimension_numbers<[1], [0], [0], [1], [0, 0, 1, 1], [], []>} : vector<16x800xbf16>, vector<800x64xbf16>, vector<16x64xf32> -> vector<16x64xf32>
    %7 = arith.maximumf %3, %6 : vector<16x64xf32>
    %c2 = arith.constant 2 : index
    %c0_7 = arith.constant 0 : index
    %c0_8 = arith.constant 0 : index
    %8 = vector.load %arg1[%c2, %c0_7, %c0_8] : memref<4x16x800xbf16, #tpu.memory_space<vmem>>, vector<1x16x800xbf16>
    %9 = vector.shape_cast %8 : vector<1x16x800xbf16> to vector<16x800xbf16>
    %cst_9 = arith.constant dense<0.000000e+00> : vector<16x64xf32>
    %10 = tpu.matmul %9, %0, %cst_9 {dimension_numbers = #tpu.dot_dimension_numbers<[1], [0], [0], [1], [0, 0, 1, 1], [], []>} : vector<16x800xbf16>, vector<800x64xbf16>, vector<16x64xf32> -> vector<16x64xf32>
    %11 = arith.maximumf %7, %10 : vector<16x64xf32>
    %c3 = arith.constant 3 : index
    %c0_10 = arith.constant 0 : index
    %c0_11 = arith.constant 0 : index
    %12 = vector.load %arg1[%c3, %c0_10, %c0_11] : memref<4x16x800xbf16, #tpu.memory_space<vmem>>, vector<1x16x800xbf16>
    %13 = vector.shape_cast %12 : vector<1x16x800xbf16> to vector<16x800xbf16>
    %cst_12 = arith.constant dense<0.000000e+00> : vector<16x64xf32>
    %14 = tpu.matmul %13, %0, %cst_12 {dimension_numbers = #tpu.dot_dimension_numbers<[1], [0], [0], [1], [0, 0, 1, 1], [], []>} : vector<16x800xbf16>, vector<800x64xbf16>, vector<16x64xf32> -> vector<16x64xf32>
    %15 = arith.maximumf %11, %14 : vector<16x64xf32>
    %c0_13 = arith.constant 0 : index
    %c0_14 = arith.constant 0 : index
    %16 = vector.load %arg3[%c0_13, %c0_14] : memref<1x64xf32, #tpu.memory_space<vmem>>, vector<1x64xf32>
    %17 = vector.broadcast %16 : vector<1x64xf32> to vector<16x64xf32>
    %18 = arith.addf %15, %17 : vector<16x64xf32>
    %cst_15 = arith.constant 0.000000e+00 : f32
    %19 = vector.broadcast %cst_15 : f32 to vector<16x64xf32>
    %20 = arith.maximumf %18, %19 : vector<16x64xf32>
    %21 = arith.truncf %20 : vector<16x64xf32> to vector<16x64xbf16>
    %c0_16 = arith.constant 0 : index
    %c0_17 = arith.constant 0 : index
    %22 = vector.load %arg4[%c0_16, %c0_17] : memref<16x64xbf16, #tpu.memory_space<vmem>>, vector<16x64xbf16>
    tpu.vector_store %arg4[%c0_16, %c0_17], %21 {strides = array<i32>} : memref<16x64xbf16, #tpu.memory_space<vmem>>, vector<16x64xbf16>,
    return
  }
  func.func @transform_0(%arg0: i32) -> (i32, i32, i32) {
    %c0_i32 = arith.constant 0 : i32
    %c0_i32_0 = arith.constant 0 : i32
    %c0_i32_1 = arith.constant 0 : i32
    return %c0_i32, %arg0, %c0_i32_0 : i32, i32, i32
  }
  func.func @transform_1(%arg0: i32) -> (i32, i32) {
    %c0_i32 = arith.constant 0 : i32
    %c0_i32_0 = arith.constant 0 : i32
    %c0_i32_1 = arith.constant 0 : i32
    return %c0_i32, %c0_i32_0 : i32, i32
  }
  func.func @transform_2(%arg0: i32) -> (i32, i32) {
    %c0_i32 = arith.constant 0 : i32
    %c0_i32_0 = arith.constant 0 : i32
    %c0_i32_1 = arith.constant 0 : i32
    return %c0_i32, %c0_i32_0 : i32, i32
  }
  func.func @transform_3(%arg0: i32) -> (i32, i32) {
    %c0_i32 = arith.constant 0 : i32
    %c0_i32_0 = arith.constant 0 : i32
    return %arg0, %c0_i32 : i32, i32
  }
}

module attributes {stable_mosaic.version = 11 : i64} {
  func.func @_head_kernel(%arg0: i32, %arg1: memref<16x1024xbf16, #tpu.memory_space<vmem>>, %arg2: memref<1024x512xbf16, #tpu.memory_space<vmem>>, %arg3: memref<1x512xf32, #tpu.memory_space<vmem>>, %arg4: memref<512x128xbf16, #tpu.memory_space<vmem>>, %arg5: memref<1x128xf32, #tpu.memory_space<vmem>>, %arg6: memref<16x128xf32, #tpu.memory_space<vmem>>) attributes {dimension_semantics = [#tpu.dimension_semantics<parallel>], iteration_bounds = array<i64: 1>, scalar_prefetch = 0 : i64, scratch_operands = 0 : i64, tpu.core_type = #tpu.core_type<tc>, window_params = [{transform_indices = @transform_0, window_bounds = array<i64: 16, 1024>}, {pipeline_mode = #tpu.pipeline_mode<synchronous>, transform_indices = @transform_1, window_bounds = array<i64: 1024, 512>}, {pipeline_mode = #tpu.pipeline_mode<synchronous>, transform_indices = @transform_2, window_bounds = array<i64: 1, 512>}, {pipeline_mode = #tpu.pipeline_mode<synchronous>, transform_indices = @transform_3, window_bounds = array<i64: 512, 128>}, {pipeline_mode = #tpu.pipeline_mode<synchronous>, transform_indices = @transform_4, window_bounds = array<i64: 1, 128>}, {transform_indices = @transform_5, window_bounds = array<i64: 16, 128>}]} {
    %c0 = arith.constant 0 : index
    %c0_0 = arith.constant 0 : index
    %0 = vector.load %arg1[%c0, %c0_0] : memref<16x1024xbf16, #tpu.memory_space<vmem>>, vector<16x1024xbf16>
    %c0_1 = arith.constant 0 : index
    %c0_2 = arith.constant 0 : index
    %1 = vector.load %arg2[%c0_1, %c0_2] : memref<1024x512xbf16, #tpu.memory_space<vmem>>, vector<1024x512xbf16>
    %cst = arith.constant dense<0.000000e+00> : vector<16x512xf32>
    %2 = tpu.matmul %0, %1, %cst {dimension_numbers = #tpu.dot_dimension_numbers<[1], [0], [0], [1], [0, 0, 1, 1], [], []>} : vector<16x1024xbf16>, vector<1024x512xbf16>, vector<16x512xf32> -> vector<16x512xf32>
    %c0_3 = arith.constant 0 : index
    %c0_4 = arith.constant 0 : index
    %3 = vector.load %arg3[%c0_3, %c0_4] : memref<1x512xf32, #tpu.memory_space<vmem>>, vector<1x512xf32>
    %4 = vector.broadcast %3 : vector<1x512xf32> to vector<16x512xf32>
    %5 = arith.addf %2, %4 : vector<16x512xf32>
    %cst_5 = arith.constant 0.000000e+00 : f32
    %6 = vector.broadcast %cst_5 : f32 to vector<16x512xf32>
    %7 = arith.maximumf %5, %6 : vector<16x512xf32>
    %8 = arith.truncf %7 : vector<16x512xf32> to vector<16x512xbf16>
    %c0_6 = arith.constant 0 : index
    %c0_7 = arith.constant 0 : index
    %9 = vector.load %arg4[%c0_6, %c0_7] : memref<512x128xbf16, #tpu.memory_space<vmem>>, vector<512x128xbf16>
    %cst_8 = arith.constant dense<0.000000e+00> : vector<16x128xf32>
    %10 = tpu.matmul %8, %9, %cst_8 {dimension_numbers = #tpu.dot_dimension_numbers<[1], [0], [0], [1], [0, 0, 1, 1], [], []>} : vector<16x512xbf16>, vector<512x128xbf16>, vector<16x128xf32> -> vector<16x128xf32>
    %c0_9 = arith.constant 0 : index
    %c0_10 = arith.constant 0 : index
    %11 = vector.load %arg5[%c0_9, %c0_10] : memref<1x128xf32, #tpu.memory_space<vmem>>, vector<1x128xf32>
    %12 = vector.broadcast %11 : vector<1x128xf32> to vector<16x128xf32>
    %13 = arith.addf %10, %12 : vector<16x128xf32>
    %c0_11 = arith.constant 0 : index
    %c0_12 = arith.constant 0 : index
    %14 = vector.load %arg6[%c0_11, %c0_12] : memref<16x128xf32, #tpu.memory_space<vmem>>, vector<16x128xf32>
    tpu.vector_store %arg6[%c0_11, %c0_12], %13 {strides = array<i32>} : memref<16x128xf32, #tpu.memory_space<vmem>>, vector<16x128xf32>,
    return
  }
  func.func @transform_0(%arg0: i32) -> (i32, i32) {
    %c0_i32 = arith.constant 0 : i32
    %c0_i32_0 = arith.constant 0 : i32
    return %arg0, %c0_i32 : i32, i32
  }
  func.func @transform_1(%arg0: i32) -> (i32, i32) {
    %c0_i32 = arith.constant 0 : i32
    %c0_i32_0 = arith.constant 0 : i32
    %c0_i32_1 = arith.constant 0 : i32
    return %c0_i32, %c0_i32_0 : i32, i32
  }
  func.func @transform_2(%arg0: i32) -> (i32, i32) {
    %c0_i32 = arith.constant 0 : i32
    %c0_i32_0 = arith.constant 0 : i32
    %c0_i32_1 = arith.constant 0 : i32
    return %c0_i32, %c0_i32_0 : i32, i32
  }
  func.func @transform_3(%arg0: i32) -> (i32, i32) {
    %c0_i32 = arith.constant 0 : i32
    %c0_i32_0 = arith.constant 0 : i32
    %c0_i32_1 = arith.constant 0 : i32
    return %c0_i32, %c0_i32_0 : i32, i32
  }
  func.func @transform_4(%arg0: i32) -> (i32, i32) {
    %c0_i32 = arith.constant 0 : i32
    %c0_i32_0 = arith.constant 0 : i32
    %c0_i32_1 = arith.constant 0 : i32
    return %c0_i32, %c0_i32_0 : i32, i32
  }
  func.func @transform_5(%arg0: i32) -> (i32, i32) {
    %c0_i32 = arith.constant 0 : i32
    %c0_i32_0 = arith.constant 0 : i32
    return %arg0, %c0_i32 : i32, i32
  }
}

</mosaic_0001>

<bundles_post_ra>
// kernel: lenet_fcn_forward.3
= control target key start
LH: loop header
LB: loop body
LE: loop exit
PB: predicated region body
PF: predicated region fallthrough
CT: control target
= control target key end

     0   :  { %s2041_s12 = smov 0   ;;  %s2043_s13 = smov 0   ;;  %s2552_s0 = inlined_call_operand.vmem [shape: bf16[4,288,32], index: 0, kind: input, shape index: {}]   ;;  %s2553_s1 = inlined_call_operand.vmem [shape: bf16[32,32], index: 1, kind: input, shape index: {}]   ;;  %s2554_s2 = inlined_call_operand.vmem [shape: f32[1,32], index: 2, kind: input, shape index: {}]   ;;  %s2555_s3 = inlined_call_operand.vmem [shape: bf16[288,32], index: 3, kind: output, shape index: {}]  }
   0x1   :  { %s2045_s14 = smov 0  }
   0x2 LB: > { %s1550_s15 = sadd.s32 4294967295, %s2017_s14   ;;  %s2058_s16 = sadd.s32 1, %s2017_s14   ;;  %s2017_s14 = sphi %s2045_s14, %s2560_s14   ;;  %s2013_s13 = sphi %s2043_s13, %s2559_s13   ;;  %s2009_s12 = sphi %s2041_s12, %s2558_s12  }
   0x3   : > { %s17_s17 = ssub.s32 %s2017_s14, %s2058_s16  ;;  %s20_s18 = sadd.s32 1, %s2013_s13 }
   0x4   : > { %p18_p0 = scmp.eq.s32.totalorder %s17_s17, 0  ;;  %p27_p1 = scmp.ne.s32.totalorder %s2013_s13, %s2009_s12 }
   0x5   : > { %p28_p2 = scmp.eq.s32.totalorder %s2017_s14, 0  ;;  %p1553_p4 = scmp.ge.s32.totalorder %s2017_s14, 2 }
   0x6   : > { %s2067_s19 = scalar_select %p18_p0, %s2013_s13, %s20_s18  }
   0x7   : > { %p29_p3 = por %p28_p2, %p27_p1  ;;  %127 = sbr.rel (%p1553_p4) target bundleno = 37 (0x25), region = 24 }
   0xe   : > { %130 = sbr.rel (!%p29_p3) target bundleno = 37 (0x25), region = 28  ;;  %s132_s20 = sand.u32 (%p29_p3), 1, %s2013_s13  }
   0xf   : > { %s1706_s21 = smul.u32 (%p29_p3), 72, %s2017_s14 }
  0x10   : > { %s1929_s22 = smul.u32 (%p29_p3), 288, %s132_s20 }
  0x11   : > { %s2075_s25 = scalar_lea.vmem (%p29_p3), %s2552_s0, %s1706_s21 }
  0x12   : > { %v153_v0 = vld [vmem:[%s2075_s25] sm:$0xff] (%p29_p3)   ;;  %v157_v1 = vld [vmem:[%s2075_s25 + $0x8] sm:$0xff] (%p29_p3)   ;;  %v161_v2 = vld [vmem:[%s2075_s25 + $0x10] sm:$0xff] (%p29_p3)   ;;  %s2080_s26 = scalar_lea.vmem (%p29_p3), [#allocation2], %s1929_s22 }
  0x13   : > { %154 = vst [vmem:[%s2080_s26] sm:$0xff] (%p29_p3), %v153_v0   ;;  %158 = vst [vmem:[%s2080_s26 + $0x8] sm:$0xff] (%p29_p3), %v157_v1   ;;  %v165_v3 = vld [vmem:[%s2075_s25 + $0x18] sm:$0xff] (%p29_p3)   ;;  %v169_v4 = vld [vmem:[%s2075_s25 + $0x20] sm:$0xff] (%p29_p3)  }
  0x14   : > { %162 = vst [vmem:[%s2080_s26 + $0x10] sm:$0xff] (%p29_p3), %v161_v2   ;;  %v173_v5 = vld [vmem:[%s2075_s25 + $0x28] sm:$0xff] (%p29_p3)   ;;  %166 = vst [vmem:[%s2080_s26 + $0x18] sm:$0xff] (%p29_p3), %v165_v3   ;;  %v177_v6 = vld [vmem:[%s2075_s25 + $0x30] sm:$0xff] (%p29_p3)  }
  0x15   : > { %170 = vst [vmem:[%s2080_s26 + $0x20] sm:$0xff] %v169_v4   ;;  %174 = vst [vmem:[%s2080_s26 + $0x28] sm:$0xff] %v173_v5   ;;  %v181_v7 = vld [vmem:[%s2075_s25 + $0x38] sm:$0xff]   ;;  %v185_v8 = vld [vmem:[%s2075_s25 + $0x40] sm:$0xff]  }
  0x16   : > { %178 = vst [vmem:[%s2080_s26 + $0x30] sm:$0xff] %v177_v6   ;;  %182 = vst [vmem:[%s2080_s26 + $0x38] sm:$0xff] %v181_v7   ;;  %v189_v9 = vld [vmem:[%s2075_s25 + $0x90] sm:$0xff]   ;;  %v193_v10 = vld [vmem:[%s2075_s25 + $0x98] sm:$0xff]  }
  0x17   : > { %186 = vst [vmem:[%s2080_s26 + $0x40] sm:$0xff] %v185_v8   ;;  %v197_v11 = vld [vmem:[%s2075_s25 + $0xa0] sm:$0xff]   ;;  %190 = vst [vmem:[%s2080_s26 + $0x48] sm:$0xff] %v189_v9   ;;  %v201_v12 = vld [vmem:[%s2075_s25 + $0xa8] sm:$0xff]  }
  0x18   : > { %194 = vst [vmem:[%s2080_s26 + $0x50] sm:$0xff] %v193_v10   ;;  %198 = vst [vmem:[%s2080_s26 + $0x58] sm:$0xff] %v197_v11   ;;  %v205_v13 = vld [vmem:[%s2075_s25 + $0xb0] sm:$0xff]   ;;  %v209_v14 = vld [vmem:[%s2075_s25 + $0xb8] sm:$0xff]  }
  0x19   : > { %202 = vst [vmem:[%s2080_s26 + $0x60] sm:$0xff] %v201_v12   ;;  %206 = vst [vmem:[%s2080_s26 + $0x68] sm:$0xff] %v205_v13   ;;  %v213_v15 = vld [vmem:[%s2075_s25 + $0xc0] sm:$0xff]   ;;  %v217_v16 = vld [vmem:[%s2075_s25 + $0xc8] sm:$0xff]  }
  0x1a   : > { %210 = vst [vmem:[%s2080_s26 + $0x70] sm:$0xff] %v209_v14   ;;  %v221_v17 = vld [vmem:[%s2075_s25 + $0xd0] sm:$0xff]   ;;  %214 = vst [vmem:[%s2080_s26 + $0x78] sm:$0xff] %v213_v15   ;;  %v225_v18 = vld [vmem:[%s2075_s25 + $0x120] sm:$0xff]  }
  0x1b   : > { %218 = vst [vmem:[%s2080_s26 + $0x80] sm:$0xff] %v217_v16   ;;  %222 = vst [vmem:[%s2080_s26 + $0x88] sm:$0xff] %v221_v17   ;;  %v229_v19 = vld [vmem:[%s2075_s25 + $0x128] sm:$0xff]   ;;  %v233_v20 = vld [vmem:[%s2075_s25 + $0x130] sm:$0xff]  }
  0x1c   : > { %226 = vst [vmem:[%s2080_s26 + $0x90] sm:$0xff] %v225_v18   ;;  %230 = vst [vmem:[%s2080_s26 + $0x98] sm:$0xff] %v229_v19   ;;  %v237_v21 = vld [vmem:[%s2075_s25 + $0x138] sm:$0xff]   ;;  %v241_v22 = vld [vmem:[%s2075_s25 + $0x140] sm:$0xff]  }
  0x1d   : > { %234 = vst [vmem:[%s2080_s26 + $0xa0] sm:$0xff] %v233_v20   ;;  %v245_v23 = vld [vmem:[%s2075_s25 + $0x148] sm:$0xff]   ;;  %238 = vst [vmem:[%s2080_s26 + $0xa8] sm:$0xff] %v237_v21   ;;  %v249_v24 = vld [vmem:[%s2075_s25 + $0x150] sm:$0xff]  }
  0x1e   : > { %242 = vst [vmem:[%s2080_s26 + $0xb0] sm:$0xff] %v241_v22   ;;  %246 = vst [vmem:[%s2080_s26 + $0xb8] sm:$0xff] %v245_v23   ;;  %v253_v25 = vld [vmem:[%s2075_s25 + $0x158] sm:$0xff]   ;;  %v257_v26 = vld [vmem:[%s2075_s25 + $0x160] sm:$0xff]  }
  0x1f   : > { %250 = vst [vmem:[%s2080_s26 + $0xc0] sm:$0xff] %v249_v24   ;;  %254 = vst [vmem:[%s2080_s26 + $0xc8] sm:$0xff] %v253_v25   ;;  %v261_v27 = vld [vmem:[%s2075_s25 + $0x1b0] sm:$0xff]   ;;  %v265_v28 = vld [vmem:[%s2075_s25 + $0x1b8] sm:$0xff]  }
  0x20   : > { %258 = vst [vmem:[%s2080_s26 + $0xd0] sm:$0xff] %v257_v26   ;;  %v269_v29 = vld [vmem:[%s2075_s25 + $0x1c0] sm:$0xff]   ;;  %262 = vst [vmem:[%s2080_s26 + $0xd8] sm:$0xff] %v261_v27   ;;  %v273_v30 = vld [vmem:[%s2075_s25 + $0x1c8] sm:$0xff]  }
  0x21   : > { %266 = vst [vmem:[%s2080_s26 + $0xe0] sm:$0xff] %v265_v28   ;;  %270 = vst [vmem:[%s2080_s26 + $0xe8] sm:$0xff] %v269_v29   ;;  %v277_v31 = vld [vmem:[%s2075_s25 + $0x1d0] sm:$0xff]   ;;  %v281_v32 = vld [vmem:[%s2075_s25 + $0x1d8] sm:$0xff]  }
  0x22   : > { %274 = vst [vmem:[%s2080_s26 + $0xf0] sm:$0xff] %v273_v30   ;;  %278 = vst [vmem:[%s2080_s26 + $0xf8] sm:$0xff] %v277_v31   ;;  %v285_v33 = vld [vmem:[%s2075_s25 + $0x1e0] sm:$0xff]   ;;  %v289_v34 = vld [vmem:[%s2075_s25 + $0x1e8] sm:$0xff]  }
  0x23   : > { %282 = vst [vmem:[%s2080_s26 + $0x100] sm:$0xff] %v281_v32   ;;  %v293_v35 = vld [vmem:[%s2075_s25 + $0x1f0] sm:$0xff]   ;;  %286 = vst [vmem:[%s2080_s26 + $0x108] sm:$0xff] %v285_v33  }
  0x24   : > { %290 = vst [vmem:[%s2080_s26 + $0x110] sm:$0xff] %v289_v34   ;;  %294 = vst [vmem:[%s2080_s26 + $0x118] sm:$0xff] %v293_v35  }
  0x25 PF: > { %p1555_p5 = scmp.ge.s32.totalorder %s2017_s14, 1  ;;  %p462_p6 = scmp.lt.s32.totalorder %s2017_s14, 3 }
  0x27   : > { %p463_p7 = pnand %p1555_p5, %p462_p6 }
  0x28   : > { %v1957_v36 = vld [vmem:[%s2553_s1] sm:$0xff] (!%p463_p7)   ;;  %v2019_v37 = vmov (!%p463_p7), 0.0   ;;  %v1958_v38 = vld [vmem:[%s2553_s1 + $0x8] sm:$0xff] (!%p463_p7)   ;;  %s469_s4 = sand.u32 (!%p463_p7), 1, %s2009_s12   ;;  %vm2020_vm0 = vmmov (!%p463_p7), 0   ;;  %vm579_vm1 = vcmask (!%p463_p7), 261120  }
  0x29   : > { %466 = sbr.rel (%p463_p7) target bundleno = 410 (0x19a), region = 69  ;;  %1769 = vmatprep.subr.bf16.mxu0 (!%p463_p7), %v2019_v37  ;;  %1809 = vmatprep.subr.bf16.mxu1 (!%p463_p7), %v2019_v37  ;;  %vm1469_vm2 = vcmask (!%p463_p7), 257024  }
  0x2a   : > { %1770 = vmatpush3.bf16.msra.mxu0 (!%p463_p7), %v1957_v36  ;;  %1810 = vmatpush3.bf16.msra.mxu1 (!%p463_p7), %v1957_v36  ;;  %s1930_s5 = smul.u32 (!%p463_p7), 288, %s469_s4 }
  0x2b   : > { %1771 = vmatprep.subr.bf16.mxu0 (!%p463_p7), %v2019_v37  ;;  %1811 = vmatprep.subr.bf16.mxu1 (!%p463_p7), %v2019_v37  ;;  %s493_s7 = smul.u32 (!%p463_p7), 18, %s1550_s15 }
  0x2c   : > { %1773 = vmatprep.mubr.msk.bf16.mxu0 (!%p463_p7), %vm2020_vm0, %v2019_v37  ;;  %1813 = vmatprep.mubr.msk.bf16.mxu1 (!%p463_p7), %vm2020_vm0, %v2019_v37  ;;  %s2168_s6 = scalar_lea.vmem (!%p463_p7), [#allocation2], %s1930_s5 }
  0x2d   : > { %v1959_v39 = vld [vmem:[%s2168_s6] sm:$0xff] (!%p463_p7)   ;;  %v1960_v40 = vld [vmem:[%s2168_s6 + $0x48] sm:$0xff] (!%p463_p7)   ;;  %v1962_v42 = vld [vmem:[%s2168_s6 + $0x50] sm:$0xff] (!%p463_p7)   ;;  %p494_p8 = scmp.lt.s32.totalorder (!%p463_p7), %s493_s7, 35 }
  0x2e   : > { %1772 = vmatpush3.bf16.msra.mxu0 (!%p463_p7), %v1958_v38  ;;  %1812 = vmatpush3.bf16.msra.mxu1 (!%p463_p7), %v1958_v38  ;;  %v1961_v41 = vld [vmem:[%s2168_s6 + $0x8] sm:$0xff] (!%p463_p7)   ;;  %v1963_v43 = vld [vmem:[%s2168_s6 + $0x10] sm:$0xff] (!%p463_p7)   ;;  %v1964_v44 = vld [vmem:[%s2168_s6 + $0x58] sm:$0xff] (!%p463_p7)  }
  0x2f   : > { %1849 = vmatprep.subr.bf16.mxu0 (!%p463_p7), %v2019_v37  ;;  %1889 = vmatprep.subr.bf16.mxu1 (!%p463_p7), %v2019_v37  ;;  %v1965_v45 = vld [vmem:[%s2168_s6 + $0x18] sm:$0xff] (!%p463_p7)   ;;  %v1966_v46 = vld [vmem:[%s2168_s6 + $0x60] sm:$0xff] (!%p463_p7)   ;;  %v1968_v48 = vld [vmem:[%s2168_s6 + $0x68] sm:$0xff] (!%p463_p7)  }
  0x30   : > { %v1967_v47 = vld [vmem:[%s2168_s6 + $0x20] sm:$0xff]   ;;  %v1969_v49 = vld [vmem:[%s2168_s6 + $0x28] sm:$0xff]   ;;  %v1970_v50 = vld [vmem:[%s2168_s6 + $0x70] sm:$0xff]   ;;  %s2562_s7 = smov (!%p494_p8, %s493_s7), 35 }
  0x31   : > { %1774 = vmatmul.mubr.msk.bf16.vlgmr.msra.gmra.mrb[0].mxu0 %vm579_vm1, %v1959_v39  ;;  %1814 = vmatmul.mubr.msk.bf16.vlgmr.msra.gmra.mrb[0].mxu1 %vm579_vm1, %v1960_v40  ;;  %v1971_v51 = vld [vmem:[%s2168_s6 + $0x30] sm:$0xff]   ;;  %v1972_v52 = vld [vmem:[%s2168_s6 + $0x78] sm:$0xff]   ;;  %v1974_v54 = vld [vmem:[%s2168_s6 + $0x80] sm:$0xff]   ;;  %s1556_s10 = sshll.u32 %s2562_s7, 2 }
  0x32   : > { %1850 = vmatpush3.bf16.msra.mxu0 %v1957_v36  ;;  %1890 = vmatpush3.bf16.msra.mxu1 %v1957_v36  ;;  %v1973_v53 = vld [vmem:[%s2168_s6 + $0x38] sm:$0xff]   ;;  %v1975_v55 = vld [vmem:[%s2168_s6 + $0x40] sm:$0xff]   ;;  %v1976_v56 = vld [vmem:[%s2168_s6 + $0x88] sm:$0xff]   ;;  %s2440_s14 = scalar_lea.vmem %s2555_s3, %s1556_s10 }
  0x33   : > { %1777 = vmatprep.mubr.msk.bf16.mxu0 %vm2020_vm0, %v2019_v37  ;;  %1817 = vmatprep.mubr.msk.bf16.mxu1 %vm2020_vm0, %v2019_v37  ;;  %v1977_v57 = vld [vmem:[%s2168_s6 + $0x90] sm:$0xff]   ;;  %v1978_v58 = vld [vmem:[%s2168_s6 + $0xd8] sm:$0xff]   ;;  %v1980_v60 = vld [vmem:[%s2168_s6 + $0xe0] sm:$0xff]  }
  0x34   : > { %1851 = vmatprep.subr.bf16.mxu0 %v2019_v37  ;;  %1891 = vmatprep.subr.bf16.mxu1 %v2019_v37  ;;  %v1979_v59 = vld [vmem:[%s2168_s6 + $0x98] sm:$0xff]   ;;  %v1981_v61 = vld [vmem:[%s2168_s6 + $0xa0] sm:$0xff]   ;;  %v1982_v62 = vld [vmem:[%s2168_s6 + $0xe8] sm:$0xff]  }
  0x35   : > { %v1983_v63 = vld [vmem:[%s2168_s6 + $0xa8] sm:$0xff]   ;;  %v1984_v0 = vld [vmem:[%s2168_s6 + $0xf0] sm:$0xff]   ;;  %v1986_v2 = vld [vmem:[%s2168_s6 + $0xf8] sm:$0xff]  }
  0x36   : > { %1852 = vmatpush3.bf16.msra.mxu0 %v1958_v38  ;;  %1892 = vmatpush3.bf16.msra.mxu1 %v1958_v38  ;;  %v1985_v1 = vld [vmem:[%s2168_s6 + $0xb0] sm:$0xff]   ;;  %v1987_v3 = vld [vmem:[%s2168_s6 + $0xb8] sm:$0xff]   ;;  %v1988_v4 = vld [vmem:[%s2168_s6 + $0x100] sm:$0xff]  }
  0x37   : > { %v1989_v5 = vld [vmem:[%s2168_s6 + $0xc0] sm:$0xff]   ;;  %v1990_v6 = vld [vmem:[%s2168_s6 + $0x108] sm:$0xff]   ;;  %v1992_v8 = vld [vmem:[%s2168_s6 + $0x110] sm:$0xff]  }
  0x38   : > { %v1991_v7 = vld [vmem:[%s2168_s6 + $0xc8] sm:$0xff]   ;;  %v1993_v9 = vld [vmem:[%s2168_s6 + $0xd0] sm:$0xff]   ;;  %v1994_v10 = vld [vmem:[%s2168_s6 + $0x118] sm:$0xff]  }
  0x39   : > { %1778 = vmatmul.mubr.msk.bf16.gmra.mrb[4].mxu0 %vm579_vm1, %v1961_v41  ;;  %1818 = vmatmul.mubr.msk.bf16.gmra.mrb[4].mxu1 %vm579_vm1, %v1962_v42 }
  0x3a   : > { %1781 = vmatprep.mubr.msk.bf16.mxu0 %vm2020_vm0, %v2019_v37  ;;  %1821 = vmatprep.mubr.msk.bf16.mxu1 %vm2020_vm0, %v2019_v37 }
  0x41   : > { %1782 = vmatmul.mubr.msk.bf16.gmra.mrb[8].mxu0 %vm579_vm1, %v1963_v43  ;;  %1822 = vmatmul.mubr.msk.bf16.gmra.mrb[8].mxu1 %vm579_vm1, %v1964_v44 }
  0x42   : > { %1785 = vmatprep.mubr.msk.bf16.mxu0 %vm2020_vm0, %v2019_v37  ;;  %1825 = vmatprep.mubr.msk.bf16.mxu1 %vm2020_vm0, %v2019_v37 }
  0x49   : > { %1786 = vmatmul.mubr.msk.bf16.gmra.mrb[12].mxu0 %vm579_vm1, %v1965_v45  ;;  %1826 = vmatmul.mubr.msk.bf16.gmra.mrb[12].mxu1 %vm579_vm1, %v1966_v46 }
  0x4a   : > { %1789 = vmatprep.mubr.msk.bf16.mxu0 %vm2020_vm0, %v2019_v37  ;;  %1829 = vmatprep.mubr.msk.bf16.mxu1 %vm2020_vm0, %v2019_v37 }
  0x51   : > { %1790 = vmatmul.mubr.msk.bf16.gmra.mrb[16].mxu0 %vm579_vm1, %v1967_v47  ;;  %1830 = vmatmul.mubr.msk.bf16.gmra.mrb[16].mxu1 %vm579_vm1, %v1968_v48 }
  0x52   : > { %1793 = vmatprep.mubr.msk.bf16.mxu0 %vm2020_vm0, %v2019_v37  ;;  %1833 = vmatprep.mubr.msk.bf16.mxu1 %vm2020_vm0, %v2019_v37 }
  0x59   : > { %1794 = vmatmul.mubr.msk.bf16.gmra.mrb[20].mxu0 %vm579_vm1, %v1969_v49  ;;  %1834 = vmatmul.mubr.msk.bf16.gmra.mrb[20].mxu1 %vm579_vm1, %v1970_v50 }
  0x5a   : > { %1797 = vmatprep.mubr.msk.bf16.mxu0 %vm2020_vm0, %v2019_v37  ;;  %1837 = vmatprep.mubr.msk.bf16.mxu1 %vm2020_vm0, %v2019_v37 }
  0x61   : > { %1798 = vmatmul.mubr.msk.bf16.gmra.mrb[24].mxu0 %vm579_vm1, %v1971_v51  ;;  %1838 = vmatmul.mubr.msk.bf16.gmra.mrb[24].mxu1 %vm579_vm1, %v1972_v52 }
  0x62   : > { %1801 = vmatprep.mubr.msk.bf16.mxu0 %vm2020_vm0, %v2019_v37  ;;  %1841 = vmatprep.mubr.msk.bf16.mxu1 %vm2020_vm0, %v2019_v37 }
  0x69   : > { %1802 = vmatmul.mubr.msk.bf16.gmra.mrb[28].mxu0 %vm579_vm1, %v1973_v53  ;;  %1842 = vmatmul.mubr.msk.bf16.gmra.mrb[28].mxu1 %vm579_vm1, %v1974_v54 }
  0x6a   : > { %1805 = vmatprep.mubr.msk.bf16.mxu0 %vm2020_vm0, %v2019_v37  ;;  %1845 = vmatprep.mubr.msk.bf16.mxu1 %vm2020_vm0, %v2019_v37 }
  0x71   : > { %1806 = vmatmul.mubr.msk.bf16.gmra.mrb[32].mxu0 %vm579_vm1, %v1975_v55  ;;  %1846 = vmatmul.mubr.msk.bf16.gmra.mrb[32].mxu1 %vm579_vm1, %v1976_v56 }
  0x72   : > { %1853 = vmatprep.mubr.msk.bf16.mxu0 %vm2020_vm0, %v2019_v37  ;;  %1893 = vmatprep.mubr.msk.bf16.mxu1 %vm2020_vm0, %v2019_v37 }
  0x79   : > { %1854 = vmatmul.mubr.msk.bf16.vlgmr.msra.gmra.mrb[36].mxu0 %vm579_vm1, %v1977_v57  ;;  %1894 = vmatmul.mubr.msk.bf16.vlgmr.msra.gmra.mrb[36].mxu1 %vm579_vm1, %v1978_v58 }
  0x7a   : > { %1857 = vmatprep.mubr.msk.bf16.mxu0 %vm2020_vm0, %v2019_v37  ;;  %1897 = vmatprep.mubr.msk.bf16.mxu1 %vm2020_vm0, %v2019_v37 }
  0x81   : > { %1858 = vmatmul.mubr.msk.bf16.gmra.mrb[40].mxu0 %vm579_vm1, %v1979_v59  ;;  %1898 = vmatmul.mubr.msk.bf16.gmra.mrb[40].mxu1 %vm579_vm1, %v1980_v60 }
  0x82   : > { %1861 = vmatprep.mubr.msk.bf16.mxu0 %vm2020_vm0, %v2019_v37  ;;  %1901 = vmatprep.mubr.msk.bf16.mxu1 %vm2020_vm0, %v2019_v37 }
  0x89   : > { %1862 = vmatmul.mubr.msk.bf16.gmra.mrb[44].mxu0 %vm579_vm1, %v1981_v61  ;;  %1902 = vmatmul.mubr.msk.bf16.gmra.mrb[44].mxu1 %vm579_vm1, %v1982_v62 }
  0x8a   : > { %1865 = vmatprep.mubr.msk.bf16.mxu0 %vm2020_vm0, %v2019_v37  ;;  %1905 = vmatprep.mubr.msk.bf16.mxu1 %vm2020_vm0, %v2019_v37 }
  0x91   : > { %1866 = vmatmul.mubr.msk.bf16.gmra.mrb[48].mxu0 %vm579_vm1, %v1983_v63  ;;  %1906 = vmatmul.mubr.msk.bf16.gmra.mrb[48].mxu1 %vm579_vm1, %v1984_v0 }
  0x92   : > { %1869 = vmatprep.mubr.msk.bf16.mxu0 %vm2020_vm0, %v2019_v37  ;;  %1909 = vmatprep.mubr.msk.bf16.mxu1 %vm2020_vm0, %v2019_v37 }
  0x99   : > { %1870 = vmatmul.mubr.msk.bf16.gmra.mrb[52].mxu0 %vm579_vm1, %v1985_v1  ;;  %1910 = vmatmul.mubr.msk.bf16.gmra.mrb[52].mxu1 %vm579_vm1, %v1986_v2 }
  0x9a   : > { %1873 = vmatprep.mubr.msk.bf16.mxu0 %vm2020_vm0, %v2019_v37  ;;  %1913 = vmatprep.mubr.msk.bf16.mxu1 %vm2020_vm0, %v2019_v37 }
  0xa1   : > { %1874 = vmatmul.mubr.msk.bf16.gmra.mrb[56].mxu0 %vm579_vm1, %v1987_v3  ;;  %1914 = vmatmul.mubr.msk.bf16.gmra.mrb[56].mxu1 %vm579_vm1, %v1988_v4 }
  0xa2   : > { %1877 = vmatprep.mubr.msk.bf16.mxu0 %vm2020_vm0, %v2019_v37  ;;  %1917 = vmatprep.mubr.msk.bf16.mxu1 %vm2020_vm0, %v2019_v37 }
  0xa9   : > { %1878 = vmatmul.mubr.msk.bf16.gmra.mrb[60].mxu0 %vm579_vm1, %v1989_v5  ;;  %1918 = vmatmul.mubr.msk.bf16.gmra.mrb[60].mxu1 %vm579_vm1, %v1990_v6 }
  0xaa   : > { %1881 = vmatprep.mubr.msk.bf16.mxu0 %vm2020_vm0, %v2019_v37  ;;  %1921 = vmatprep.mubr.msk.bf16.mxu1 %vm2020_vm0, %v2019_v37 }
  0xb1   : > { %1882 = vmatmul.mubr.msk.bf16.gmra.mrb[64].mxu0 %vm579_vm1, %v1991_v7  ;;  %1922 = vmatmul.mubr.msk.bf16.gmra.mrb[64].mxu1 %vm579_vm1, %v1992_v8 }
  0xb2   : > { %1885 = vmatprep.mubr.msk.bf16.mxu0 %vm2020_vm0, %v2019_v37  ;;  %1925 = vmatprep.mubr.msk.bf16.mxu1 %vm2020_vm0, %v2019_v37 }
  0xb9   : > { %1886 = vmatmul.mubr.msk.bf16.gmra.mrb[68].mxu0 %vm579_vm1, %v1993_v9  ;;  %1926 = vmatmul.mubr.msk.bf16.gmra.mrb[68].mxu1 %vm579_vm1, %v1994_v10 }
 0x104   : > { %v2314_v11 = vpop.f32.mrb[0].mxu0  ;;  %v2316_v12 = vpop.f32.mrb[0].mxu1 }
 0x105   : > { %v908_v13 = vmax.f32 %v2314_v11, %v2316_v12  ;;  %v1775_v14 = vpop.f32.mrb[1].mxu0  ;;  %v1815_v15 = vpop.f32.mrb[1].mxu1 }
 0x106   : > { %v2320_v16 = vpop.f32.mrb[2].mxu0  ;;  %v2322_v17 = vpop.f32.mrb[2].mxu1 }
 0x107   : > { %v909_v18 = vmax.f32 %v2320_v16, %v2322_v17  ;;  %v1776_v19 = vpop.f32.mrb[3].mxu0  ;;  %v1816_v20 = vpop.f32.mrb[3].mxu1 }
 0x10c   : > { %v2326_v21 = vpop.f32.mrb[4].mxu0  ;;  %v2328_v22 = vpop.f32.mrb[4].mxu1 }
 0x10d   : > { %v910_v23 = vmax.f32 %v2326_v21, %v2328_v22  ;;  %v1779_v24 = vpop.f32.mrb[5].mxu0  ;;  %v1819_v25 = vpop.f32.mrb[5].mxu1 }
 0x10e   : > { %v2332_v26 = vpop.f32.mrb[6].mxu0  ;;  %v2334_v27 = vpop.f32.mrb[6].mxu1 }
 0x10f   : > { %v911_v28 = vmax.f32 %v2332_v26, %v2334_v27  ;;  %v1780_v29 = vpop.f32.mrb[7].mxu0  ;;  %v1820_v30 = vpop.f32.mrb[7].mxu1 }
 0x114   : > { %v2338_v31 = vpop.f32.mrb[8].mxu0  ;;  %v2340_v32 = vpop.f32.mrb[8].mxu1 }
 0x115   : > { %v912_v33 = vmax.f32 %v2338_v31, %v2340_v32  ;;  %v1783_v34 = vpop.f32.mrb[9].mxu0  ;;  %v1823_v35 = vpop.f32.mrb[9].mxu1 }
 0x116   : > { %v2344_v36 = vpop.f32.mrb[10].mxu0  ;;  %v2346_v37 = vpop.f32.mrb[10].mxu1 }
 0x117   : > { %v913_v38 = vmax.f32 %v2344_v36, %v2346_v37  ;;  %v1784_v39 = vpop.f32.mrb[11].mxu0  ;;  %v1824_v40 = vpop.f32.mrb[11].mxu1 }
 0x11c   : > { %v2350_v41 = vpop.f32.mrb[12].mxu0  ;;  %v2352_v42 = vpop.f32.mrb[12].mxu1 }
 0x11d   : > { %v914_v43 = vmax.f32 %v2350_v41, %v2352_v42  ;;  %v1787_v44 = vpop.f32.mrb[13].mxu0  ;;  %v1827_v45 = vpop.f32.mrb[13].mxu1 }
 0x11e   : > { %v2356_v46 = vpop.f32.mrb[14].mxu0  ;;  %v2358_v47 = vpop.f32.mrb[14].mxu1 }
 0x11f   : > { %v915_v48 = vmax.f32 %v2356_v46, %v2358_v47  ;;  %v1788_v49 = vpop.f32.mrb[15].mxu0  ;;  %v1828_v50 = vpop.f32.mrb[15].mxu1 }
 0x124   : > { %v2362_v51 = vpop.f32.mrb[16].mxu0  ;;  %v2364_v52 = vpop.f32.mrb[16].mxu1 }
 0x125   : > { %v916_v53 = vmax.f32 %v2362_v51, %v2364_v52  ;;  %v1791_v54 = vpop.f32.mrb[17].mxu0  ;;  %v1831_v55 = vpop.f32.mrb[17].mxu1 }
 0x126   : > { %v2368_v56 = vpop.f32.mrb[18].mxu0  ;;  %v2370_v57 = vpop.f32.mrb[18].mxu1 }
 0x127   : > { %v917_v58 = vmax.f32 %v2368_v56, %v2370_v57  ;;  %v1792_v59 = vpop.f32.mrb[19].mxu0  ;;  %v1832_v60 = vpop.f32.mrb[19].mxu1 }
 0x12c   : > { %v2374_v61 = vpop.f32.mrb[20].mxu0  ;;  %v2376_v62 = vpop.f32.mrb[20].mxu1 }
 0x12d   : > { %v918_v63 = vmax.f32 %v2374_v61, %v2376_v62  ;;  %v1795_v0 = vpop.f32.mrb[21].mxu0  ;;  %v1835_v1 = vpop.f32.mrb[21].mxu1 }
 0x12e   : > { %v2380_v2 = vpop.f32.mrb[22].mxu0  ;;  %v2382_v3 = vpop.f32.mrb[22].mxu1 }
 0x12f   : > { %v919_v4 = vmax.f32 %v2380_v2, %v2382_v3  ;;  %v1796_v5 = vpop.f32.mrb[23].mxu0  ;;  %v1836_v6 = vpop.f32.mrb[23].mxu1 }
 0x134   : > { %v2386_v7 = vpop.f32.mrb[24].mxu0  ;;  %v2388_v8 = vpop.f32.mrb[24].mxu1 }
 0x135   : > { %v920_v9 = vmax.f32 %v2386_v7, %v2388_v8  ;;  %v1799_v10 = vpop.f32.mrb[25].mxu0  ;;  %v1839_v14 = vpop.f32.mrb[25].mxu1 }
 0x136   : > { %v2392_v15 = vpop.f32.mrb[26].mxu0  ;;  %v2394_v19 = vpop.f32.mrb[26].mxu1 }
 0x137   : > { %v921_v20 = vmax.f32 %v2392_v15, %v2394_v19  ;;  %v1800_v24 = vpop.f32.mrb[27].mxu0  ;;  %v1840_v25 = vpop.f32.mrb[27].mxu1 }
 0x13c   : > { %v2398_v29 = vpop.f32.mrb[28].mxu0  ;;  %v2400_v30 = vpop.f32.mrb[28].mxu1 }
 0x13d   : > { %v922_v34 = vmax.f32 %v2398_v29, %v2400_v30  ;;  %v1803_v35 = vpop.f32.mrb[29].mxu0  ;;  %v1843_v39 = vpop.f32.mrb[29].mxu1 }
 0x13e   : > { %v2404_v40 = vpop.f32.mrb[30].mxu0  ;;  %v2406_v44 = vpop.f32.mrb[30].mxu1 }
 0x13f   : > { %v923_v45 = vmax.f32 %v2404_v40, %v2406_v44  ;;  %v1804_v49 = vpop.f32.mrb[31].mxu0  ;;  %v1844_v50 = vpop.f32.mrb[31].mxu1 }
 0x140   : > { %v2430_v50 = vld [vmem:[%s2554_s2] ss:$0 sm:$0xff] }
 0x144   : > { %v2410_v54 = vpop.f32.mrb[32].mxu0  ;;  %v2412_v55 = vpop.f32.mrb[32].mxu1 }
 0x145   : > { %v1807_v60 = vpop.f32.mrb[33].mxu0  ;;  %v1847_v0 = vpop.f32.mrb[33].mxu1  ;;  %v2556_v40 = vmax.f32 %v2410_v54, %v2412_v55 }
 0x146   : > { %v2418_v1 = vpop.f32.mrb[34].mxu0  ;;  %v2420_v5 = vpop.f32.mrb[34].mxu1 }
 0x147   : > { %v1808_v10 = vpop.f32.mrb[35].mxu0  ;;  %v1848_v14 = vpop.f32.mrb[35].mxu1 }
 0x14c   : > { %v1051_v24 = vpop.f32.mrb[36].mxu0  ;;  %v1265_v25 = vpop.f32.mrb[36].mxu1 }
 0x14d   : > { %v1122_v35 = vmax.f32 %v908_v13, %v1051_v24  ;;  %v1855_v39 = vpop.f32.mrb[37].mxu0  ;;  %v1895_v49 = vpop.f32.mrb[37].mxu1 }
 0x14e   : > { %v1054_v60 = vpop.f32.mrb[38].mxu0  ;;  %v1268_v0 = vpop.f32.mrb[38].mxu1 }
 0x14f   : > { %v1336_v6 = vmax.f32 %v1122_v35, %v1265_v25  ;;  %v1123_v10 = vmax.f32 %v909_v18, %v1054_v60  ;;  %v1856_v14 = vpop.f32.mrb[39].mxu0  ;;  %v1896_v59 = vpop.f32.mrb[39].mxu1 }
 0x151   : > { %v1361_v11 = vadd.f32 %v2430_v50, %v1336_v6  ;;  %v1337_v12 = vmax.f32 %v1123_v10, %v1268_v0 }
 0x153   : > { %v1379_v13 = vmax.f32 %v1361_v11, 0.0  ;;  %v1362_v24 = vadd.f32 %v2430_v50, %v1337_v12 }
 0x154   : > { %v1059_v25 = vpop.f32.mrb[40].mxu0  ;;  %v1273_v16 = vpop.f32.mrb[40].mxu1 }
 0x155   : > { %v1707_v17 = vpack.c.bf16 %v1379_v13, %v1379_v13  ;;  %v1380_v18 = vmax.f32 %v1362_v24, 0.0  ;;  %v1124_v59 = vmax.f32 %v910_v23, %v1059_v25  ;;  %v1859_v6 = vpop.f32.mrb[41].mxu0  ;;  %v1899_v35 = vpop.f32.mrb[41].mxu1 }
 0x156   : > { %v1062_v39 = vpop.f32.mrb[42].mxu0  ;;  %v1276_v49 = vpop.f32.mrb[42].mxu1 }
 0x157   : > { %1470 = vst.msk [vmem:[%s2440_s14] sm:$0xf] %vm1469_vm2, %v1707_v17  ;;  %v1708_v60 = vpack.c.bf16 %v1380_v18, %v1380_v18  ;;  %v1338_v0 = vmax.f32 %v1124_v59, %v1273_v16  ;;  %v1125_v10 = vmax.f32 %v911_v28, %v1062_v39  ;;  %v1860_v14 = vpop.f32.mrb[43].mxu0  ;;  %v1900_v11 = vpop.f32.mrb[43].mxu1 }
 0x159   : > { %1471 = vst.msk [vmem:[%s2440_s14 + $0x4] sm:$0xf] %vm1469_vm2, %v1708_v60  ;;  %v1363_v21 = vadd.f32 %v2430_v50, %v1338_v0  ;;  %v1339_v22 = vmax.f32 %v1125_v10, %v1276_v49 }
 0x15b   : > { %v1381_v23 = vmax.f32 %v1363_v21, 0.0  ;;  %v1364_v12 = vadd.f32 %v2430_v50, %v1339_v22 }
 0x15c   : > { %v1067_v13 = vpop.f32.mrb[44].mxu0  ;;  %v1281_v24 = vpop.f32.mrb[44].mxu1 }
 0x15d   : > { %v1709_v25 = vpack.c.bf16 %v1381_v23, %v1381_v23  ;;  %v1382_v16 = vmax.f32 %v1364_v12, 0.0  ;;  %v1126_v26 = vmax.f32 %v912_v33, %v1067_v13  ;;  %v1863_v27 = vpop.f32.mrb[45].mxu0  ;;  %v1903_v28 = vpop.f32.mrb[45].mxu1 }
 0x15e   : > { %v1070_v17 = vpop.f32.mrb[46].mxu0  ;;  %v1284_v18 = vpop.f32.mrb[46].mxu1 }
 0x15f   : > { %1472 = vst.msk [vmem:[%s2440_s14 + $0x8] sm:$0xf] %vm1469_vm2, %v1709_v25  ;;  %v1710_v59 = vpack.c.bf16 %v1382_v16, %v1382_v16  ;;  %v1340_v6 = vmax.f32 %v1126_v26, %v1281_v24  ;;  %v1127_v35 = vmax.f32 %v913_v38, %v1070_v17  ;;  %v1864_v39 = vpop.f32.mrb[47].mxu0  ;;  %v1904_v49 = vpop.f32.mrb[47].mxu1 }
 0x161   : > { %1473 = vst.msk [vmem:[%s2440_s14 + $0xc] sm:$0xf] %vm1469_vm2, %v1710_v59  ;;  %v1365_v31 = vadd.f32 %v2430_v50, %v1340_v6  ;;  %v1341_v32 = vmax.f32 %v1127_v35, %v1284_v18 }
 0x163   : > { %v1383_v33 = vmax.f32 %v1365_v31, 0.0  ;;  %v1366_v60 = vadd.f32 %v2430_v50, %v1341_v32 }
 0x164   : > { %v1075_v0 = vpop.f32.mrb[48].mxu0  ;;  %v1289_v10 = vpop.f32.mrb[48].mxu1 }
 0x165   : > { %v1711_v14 = vpack.c.bf16 %v1383_v33, %v1383_v33  ;;  %v1384_v11 = vmax.f32 %v1366_v60, 0.0  ;;  %v1128_v36 = vmax.f32 %v914_v43, %v1075_v0  ;;  %v1867_v37 = vpop.f32.mrb[49].mxu0  ;;  %v1907_v38 = vpop.f32.mrb[49].mxu1 }
 0x166   : > { %v1078_v21 = vpop.f32.mrb[50].mxu0  ;;  %v1292_v22 = vpop.f32.mrb[50].mxu1 }
 0x167   : > { %1474 = vst.msk [vmem:[%s2440_s14 + $0x10] sm:$0xf] %vm1469_vm2, %v1711_v14  ;;  %v1712_v23 = vpack.c.bf16 %v1384_v11, %v1384_v11  ;;  %v1342_v12 = vmax.f32 %v1128_v36, %v1289_v10  ;;  %v1129_v13 = vmax.f32 %v915_v48, %v1078_v21  ;;  %v1868_v24 = vpop.f32.mrb[51].mxu0  ;;  %v1908_v25 = vpop.f32.mrb[51].mxu1 }
 0x169   : > { %1475 = vst.msk [vmem:[%s2440_s14 + $0x14] sm:$0xf] %vm1469_vm2, %v1712_v23  ;;  %v1367_v41 = vadd.f32 %v2430_v50, %v1342_v12  ;;  %v1343_v42 = vmax.f32 %v1129_v13, %v1292_v22 }
 0x16b   : > { %v1385_v43 = vmax.f32 %v1367_v41, 0.0  ;;  %v1368_v16 = vadd.f32 %v2430_v50, %v1343_v42 }
 0x16c   : > { %v1083_v26 = vpop.f32.mrb[52].mxu0  ;;  %v1297_v27 = vpop.f32.mrb[52].mxu1 }
 0x16d   : > { %v1713_v28 = vpack.c.bf16 %v1385_v43, %v1385_v43  ;;  %v1386_v17 = vmax.f32 %v1368_v16, 0.0  ;;  %v1130_v46 = vmax.f32 %v916_v53, %v1083_v26  ;;  %v1871_v47 = vpop.f32.mrb[53].mxu0  ;;  %v1911_v48 = vpop.f32.mrb[53].mxu1 }
 0x16e   : > { %v1086_v18 = vpop.f32.mrb[54].mxu0  ;;  %v1300_v59 = vpop.f32.mrb[54].mxu1 }
 0x16f   : > { %1476 = vst.msk [vmem:[%s2440_s14 + $0x18] sm:$0xf] %vm1469_vm2, %v1713_v28  ;;  %v1714_v6 = vpack.c.bf16 %v1386_v17, %v1386_v17  ;;  %v1344_v35 = vmax.f32 %v1130_v46, %v1297_v27  ;;  %v1131_v39 = vmax.f32 %v917_v58, %v1086_v18  ;;  %v1872_v49 = vpop.f32.mrb[55].mxu0  ;;  %v1912_v31 = vpop.f32.mrb[55].mxu1 }
 0x171   : > { %1477 = vst.msk [vmem:[%s2440_s14 + $0x1c] sm:$0xf] %vm1469_vm2, %v1714_v6  ;;  %v1369_v51 = vadd.f32 %v2430_v50, %v1344_v35  ;;  %v1345_v52 = vmax.f32 %v1131_v39, %v1300_v59 }
 0x173   : > { %v1387_v53 = vmax.f32 %v1369_v51, 0.0  ;;  %v1370_v32 = vadd.f32 %v2430_v50, %v1345_v52 }
 0x174   : > { %v1091_v33 = vpop.f32.mrb[56].mxu0  ;;  %v1305_v60 = vpop.f32.mrb[56].mxu1 }
 0x175   : > { %v1715_v0 = vpack.c.bf16 %v1387_v53, %v1387_v53  ;;  %v1388_v10 = vmax.f32 %v1370_v32, 0.0  ;;  %v1132_v56 = vmax.f32 %v918_v63, %v1091_v33  ;;  %v1875_v57 = vpop.f32.mrb[57].mxu0  ;;  %v1915_v58 = vpop.f32.mrb[57].mxu1 }
 0x176   : > { %v1094_v14 = vpop.f32.mrb[58].mxu0  ;;  %v1308_v11 = vpop.f32.mrb[58].mxu1 }
 0x177   : > { %1478 = vst.msk [vmem:[%s2440_s14 + $0x20] sm:$0xf] %vm1469_vm2, %v1715_v0  ;;  %v1716_v36 = vpack.c.bf16 %v1388_v10, %v1388_v10  ;;  %v1346_v37 = vmax.f32 %v1132_v56, %v1305_v60  ;;  %v1133_v38 = vmax.f32 %v919_v4, %v1094_v14  ;;  %v1876_v21 = vpop.f32.mrb[59].mxu0  ;;  %v1916_v22 = vpop.f32.mrb[59].mxu1  ;;  %v2557_v14 = vmax.f32 %v2418_v1, %v2420_v5 }
 0x179   : > { %1479 = vst.msk [vmem:[%s2440_s14 + $0x24] sm:$0xf] %vm1469_vm2, %v1716_v36  ;;  %v1371_v61 = vadd.f32 %v2430_v50, %v1346_v37  ;;  %v1347_v62 = vmax.f32 %v1133_v38, %v1308_v11 }
 0x17b   : > { %v1389_v63 = vmax.f32 %v1371_v61, 0.0  ;;  %v1372_v23 = vadd.f32 %v2430_v50, %v1347_v62 }
 0x17c   : > { %v1099_v12 = vpop.f32.mrb[60].mxu0  ;;  %v1313_v13 = vpop.f32.mrb[60].mxu1 }
 0x17d   : > { %v1717_v24 = vpack.c.bf16 %v1389_v63, %v1389_v63  ;;  %v1390_v25 = vmax.f32 %v1372_v23, 0.0  ;;  %v1134_v2 = vmax.f32 %v920_v9, %v1099_v12  ;;  %v1879_v3 = vpop.f32.mrb[61].mxu0  ;;  %v1919_v4 = vpop.f32.mrb[61].mxu1 }
 0x17e   : > { %v1102_v41 = vpop.f32.mrb[62].mxu0  ;;  %v1316_v42 = vpop.f32.mrb[62].mxu1 }
 0x17f   : > { %1480 = vst.msk [vmem:[%s2440_s14 + $0x28] sm:$0xf] %vm1469_vm2, %v1717_v24  ;;  %v1718_v43 = vpack.c.bf16 %v1390_v25, %v1390_v25  ;;  %v1348_v16 = vmax.f32 %v1134_v2, %v1313_v13  ;;  %v1135_v26 = vmax.f32 %v921_v20, %v1102_v41  ;;  %v1880_v27 = vpop.f32.mrb[63].mxu0  ;;  %v1920_v28 = vpop.f32.mrb[63].mxu1 }
 0x181   : > { %1481 = vst.msk [vmem:[%s2440_s14 + $0x2c] sm:$0xf] %vm1469_vm2, %v1718_v43  ;;  %v1373_v7 = vadd.f32 %v2430_v50, %v1348_v16  ;;  %v1349_v8 = vmax.f32 %v1135_v26, %v1316_v42 }
 0x183   : > { %v1391_v9 = vmax.f32 %v1373_v7, 0.0  ;;  %v1374_v17 = vadd.f32 %v2430_v50, %v1349_v8 }
 0x184   : > { %v1107_v46 = vpop.f32.mrb[64].mxu0  ;;  %v1321_v47 = vpop.f32.mrb[64].mxu1 }
 0x185   : > { %v1719_v48 = vpack.c.bf16 %v1391_v9, %v1391_v9  ;;  %v1392_v18 = vmax.f32 %v1374_v17, 0.0  ;;  %v1136_v15 = vmax.f32 %v922_v34, %v1107_v46  ;;  %v1883_v19 = vpop.f32.mrb[65].mxu0  ;;  %v1923_v20 = vpop.f32.mrb[65].mxu1 }
 0x186   : > { %v1110_v59 = vpop.f32.mrb[66].mxu0  ;;  %v1324_v6 = vpop.f32.mrb[66].mxu1 }
 0x187   : > { %1482 = vst.msk [vmem:[%s2440_s14 + $0x30] sm:$0xf] %vm1469_vm2, %v1719_v48  ;;  %v1720_v35 = vpack.c.bf16 %v1392_v18, %v1392_v18  ;;  %v1350_v39 = vmax.f32 %v1136_v15, %v1321_v47  ;;  %v1137_v49 = vmax.f32 %v923_v45, %v1110_v59  ;;  %v1884_v31 = vpop.f32.mrb[67].mxu0  ;;  %v1924_v51 = vpop.f32.mrb[67].mxu1 }
 0x189   : > { %1483 = vst.msk [vmem:[%s2440_s14 + $0x34] sm:$0xf] %vm1469_vm2, %v1720_v35  ;;  %v1375_v29 = vadd.f32 %v2430_v50, %v1350_v39  ;;  %v1351_v30 = vmax.f32 %v1137_v49, %v1324_v6 }
 0x18b   : > { %v1393_v34 = vmax.f32 %v1375_v29, 0.0  ;;  %v1376_v52 = vadd.f32 %v2430_v50, %v1351_v30 }
 0x18c   : > { %v1115_v53 = vpop.f32.mrb[68].mxu0  ;;  %v1329_v32 = vpop.f32.mrb[68].mxu1 }
 0x18d   : > { %v1721_v33 = vpack.c.bf16 %v1393_v34, %v1393_v34  ;;  %v1394_v60 = vmax.f32 %v1376_v52, 0.0  ;;  %v1138_v44 = vmax.f32 %v2556_v40, %v1115_v53  ;;  %v1887_v45 = vpop.f32.mrb[69].mxu0  ;;  %v1927_v0 = vpop.f32.mrb[69].mxu1 }
 0x18e   : > { %v1118_v10 = vpop.f32.mrb[70].mxu0  ;;  %v1332_v56 = vpop.f32.mrb[70].mxu1 }
 0x18f   : > { %1484 = vst.msk [vmem:[%s2440_s14 + $0x38] sm:$0xf] %vm1469_vm2, %v1721_v33  ;;  %v1722_v57 = vpack.c.bf16 %v1394_v60, %v1394_v60  ;;  %v1352_v58 = vmax.f32 %v1138_v44, %v1329_v32  ;;  %v1139_v11 = vmax.f32 %v2557_v14, %v1118_v10  ;;  %v1888_v36 = vpop.f32.mrb[71].mxu0  ;;  %v1928_v37 = vpop.f32.mrb[71].mxu1 }
 0x191   : > { %1485 = vst.msk [vmem:[%s2440_s14 + $0x3c] sm:$0xf] %vm1469_vm2, %v1722_v57  ;;  %v1377_v54 = vadd.f32 %v2430_v50, %v1352_v58  ;;  %v1353_v55 = vmax.f32 %v1139_v11, %v1332_v56 }
 0x193   : > { %v1395_v38 = vmax.f32 %v1377_v54, 0.0  ;;  %v1378_v21 = vadd.f32 %v2430_v50, %v1353_v55 }
 0x195   : > { %v1723_v22 = vpack.c.bf16 %v1395_v38, %v1395_v38  ;;  %v1396_v61 = vmax.f32 %v1378_v21, 0.0 }
 0x197   : > { %1486 = vst.msk [vmem:[%s2440_s14 + $0x40] sm:$0xf] %vm1469_vm2, %v1723_v22  ;;  %v1724_v62 = vpack.c.bf16 %v1396_v61, %v1396_v61 }
 0x199   : > { %1487 = vst.msk [vmem:[%s2440_s14 + $0x44] sm:$0xf] %vm1469_vm2, %v1724_v62 }
 0x19a PF: > { %p10_p9 = scmp.ge.s32.totalorder %s2058_s16, 4   ;;  %s2558_s12 = smov %s2013_s13 }
 0x19b   : > { %s2559_s13 = smov %s2067_s19  ;;  %s2560_s14 = smov %s2058_s16 }
 0x19c   :  { %12 = sbr.rel (!%p10_p9) target bundleno = 2 (0x2), region = 111 }

// kernel: lenet_fcn_forward.4
= control target key start
LH: loop header
LB: loop body
LE: loop exit
PB: predicated region body
PF: predicated region fallthrough
CT: control target
= control target key end

     0   :  { %s2216_s12 = smov 0   ;;  %s2218_s13 = smov 0   ;;  %s2842_s0 = inlined_call_operand.vmem [shape: bf16[4,32,800], index: 0, kind: input, shape index: {}]   ;;  %s2843_s1 = inlined_call_operand.vmem [shape: bf16[800,64], index: 1, kind: input, shape index: {}]   ;;  %s2844_s2 = inlined_call_operand.vmem [shape: f32[1,64], index: 2, kind: input, shape index: {}]   ;;  %s2845_s3 = inlined_call_operand.vmem [shape: bf16[32,64], index: 3, kind: output, shape index: {}]  }
   0x1   :  { %s2220_s14 = smov 0  }
   0x2 LB: > { %s1604_s15 = sadd.s32 4294967295, %s2192_s14   ;;  %s2233_s16 = sadd.s32 1, %s2192_s14   ;;  %s2192_s14 = sphi %s2220_s14, %s2848_s14   ;;  %s2188_s13 = sphi %s2218_s13, %s2847_s13   ;;  %s2184_s12 = sphi %s2216_s12, %s2846_s12  }
   0x3   : > { %s17_s17 = ssub.s32 %s2192_s14, %s2233_s16  ;;  %s20_s18 = sadd.s32 1, %s2188_s13 }
   0x4   : > { %p18_p0 = scmp.eq.s32.totalorder %s17_s17, 0  ;;  %p27_p1 = scmp.ne.s32.totalorder %s2188_s13, %s2184_s12 }
   0x5   : > { %p28_p2 = scmp.eq.s32.totalorder %s2192_s14, 0  ;;  %p1607_p4 = scmp.ge.s32.totalorder %s2192_s14, 2 }
   0x6   : > { %s2242_s19 = scalar_select %p18_p0, %s2188_s13, %s20_s18  }
   0x7   : > { %p29_p3 = por %p28_p2, %p27_p1  ;;  %127 = sbr.rel (%p1607_p4) target bundleno = 36 (0x24), region = 24 }
   0xe   : > { %130 = sbr.rel (!%p29_p3) target bundleno = 36 (0x24), region = 28  ;;  %s132_s20 = sand.u32 (%p29_p3), 1, %s2188_s13  }
   0xf   : > { %s2052_s21 = smul.u32 (%p29_p3), 56, %s2192_s14 }
  0x10   : > { %s2051_s22 = smul.u32 (%p29_p3), 224, %s132_s20 }
  0x11   : > { %s2250_s25 = scalar_lea.vmem (%p29_p3), %s2842_s0, %s2052_s21 }
  0x12   : > { %v153_v0 = vld [vmem:[%s2250_s25] sm:$0xff] (%p29_p3)  ;;  %v155_v1 = vld [vmem:[%s2250_s25 + $0x8] sm:$0xff] (%p29_p3)  ;;  %v157_v2 = vld [vmem:[%s2250_s25 + $0x10] sm:$0xff] (%p29_p3)  ;;  %s2255_s26 = scalar_lea.vmem (%p29_p3), [#allocation2], %s2051_s22 }
  0x13   : > { %154 = vst [vmem:[%s2255_s26] sm:$0xff] (%p29_p3), %v153_v0  ;;  %156 = vst [vmem:[%s2255_s26 + $0x8] sm:$0xff] (%p29_p3), %v155_v1  ;;  %v159_v3 = vld [vmem:[%s2250_s25 + $0x1c] sm:$0xff] (%p29_p3)  ;;  %v161_v4 = vld [vmem:[%s2250_s25 + $0x24] sm:$0xff] (%p29_p3) }
  0x14   : > { %158 = vst [vmem:[%s2255_s26 + $0x10] sm:$0xff] (%p29_p3), %v157_v2  ;;  %v163_v5 = vld [vmem:[%s2250_s25 + $0x2c] sm:$0xff] (%p29_p3)  ;;  %160 = vst [vmem:[%s2255_s26 + $0x1c] sm:$0xff] (%p29_p3), %v159_v3  ;;  %v167_v7 = vld [vmem:[%s2250_s25 + $0x78] sm:$0xff] (%p29_p3) }
  0x15   : > { %162 = vst [vmem:[%s2255_s26 + $0x24] sm:$0xff] %v161_v4  ;;  %164 = vst [vmem:[%s2255_s26 + $0x2c] sm:$0xff] %v163_v5  ;;  %v165_v6 = vld [vmem:[%s2250_s25 + $0x70] sm:$0xff]  ;;  %v169_v8 = vld [vmem:[%s2250_s25 + $0x80] sm:$0xff] }
  0x16   : > { %166 = vst [vmem:[%s2255_s26 + $0x38] sm:$0xff] %v165_v6  ;;  %168 = vst [vmem:[%s2255_s26 + $0x40] sm:$0xff] %v167_v7  ;;  %v171_v9 = vld [vmem:[%s2250_s25 + $0x8c] sm:$0xff]  ;;  %v173_v10 = vld [vmem:[%s2250_s25 + $0x94] sm:$0xff] }
  0x17   : > { %170 = vst [vmem:[%s2255_s26 + $0x48] sm:$0xff] %v169_v8  ;;  %v175_v11 = vld [vmem:[%s2250_s25 + $0x9c] sm:$0xff]  ;;  %172 = vst [vmem:[%s2255_s26 + $0x54] sm:$0xff] %v171_v9  ;;  %v179_v13 = vld [vmem:[%s2250_s25 + $0xe8] sm:$0xff] }
  0x18   : > { %174 = vst [vmem:[%s2255_s26 + $0x5c] sm:$0xff] %v173_v10  ;;  %176 = vst [vmem:[%s2255_s26 + $0x64] sm:$0xff] %v175_v11  ;;  %v177_v12 = vld [vmem:[%s2250_s25 + $0xe0] sm:$0xff]  ;;  %v181_v14 = vld [vmem:[%s2250_s25 + $0xf0] sm:$0xff] }
  0x19   : > { %178 = vst [vmem:[%s2255_s26 + $0x70] sm:$0xff] %v177_v12  ;;  %180 = vst [vmem:[%s2255_s26 + $0x78] sm:$0xff] %v179_v13  ;;  %v183_v15 = vld [vmem:[%s2250_s25 + $0xfc] sm:$0xff]  ;;  %v185_v16 = vld [vmem:[%s2250_s25 + $0x104] sm:$0xff] }
  0x1a   : > { %182 = vst [vmem:[%s2255_s26 + $0x80] sm:$0xff] %v181_v14  ;;  %v187_v17 = vld [vmem:[%s2250_s25 + $0x10c] sm:$0xff]  ;;  %184 = vst [vmem:[%s2255_s26 + $0x8c] sm:$0xff] %v183_v15  ;;  %v191_v19 = vld [vmem:[%s2250_s25 + $0x158] sm:$0xff] }
  0x1b   : > { %186 = vst [vmem:[%s2255_s26 + $0x94] sm:$0xff] %v185_v16  ;;  %188 = vst [vmem:[%s2255_s26 + $0x9c] sm:$0xff] %v187_v17  ;;  %v189_v18 = vld [vmem:[%s2250_s25 + $0x150] sm:$0xff]  ;;  %v193_v20 = vld [vmem:[%s2250_s25 + $0x160] sm:$0xff] }
  0x1c   : > { %190 = vst [vmem:[%s2255_s26 + $0xa8] sm:$0xff] %v189_v18  ;;  %192 = vst [vmem:[%s2255_s26 + $0xb0] sm:$0xff] %v191_v19  ;;  %v195_v21 = vld [vmem:[%s2250_s25 + $0x16c] sm:$0xff]  ;;  %v197_v22 = vld [vmem:[%s2250_s25 + $0x174] sm:$0xff] }
  0x1d   : > { %194 = vst [vmem:[%s2255_s26 + $0xb8] sm:$0xff] %v193_v20  ;;  %v199_v23 = vld [vmem:[%s2250_s25 + $0x17c] sm:$0xff]  ;;  %196 = vst [vmem:[%s2255_s26 + $0xc4] sm:$0xff] %v195_v21  ;;  %v1611_v24 = vld [vmem:[%s2250_s25 + $0x18] sm:$0xf] }
  0x1e   : > { %198 = vst [vmem:[%s2255_s26 + $0xcc] sm:$0xff] %v197_v22  ;;  %200 = vst [vmem:[%s2255_s26 + $0xd4] sm:$0xff] %v199_v23  ;;  %v1613_v25 = vld [vmem:[%s2250_s25 + $0x34] sm:$0xf]  ;;  %v1615_v26 = vld [vmem:[%s2250_s25 + $0x88] sm:$0xf] }
  0x1f   : > { %1612 = vst [vmem:[%s2255_s26 + $0x18] sm:$0xf] %v1611_v24  ;;  %1614 = vst [vmem:[%s2255_s26 + $0x34] sm:$0xf] %v1613_v25  ;;  %v1617_v27 = vld [vmem:[%s2250_s25 + $0xa4] sm:$0xf] }
  0x20   : > { %1616 = vst [vmem:[%s2255_s26 + $0x50] sm:$0xf] %v1615_v26  ;;  %v1619_v28 = vld [vmem:[%s2250_s25 + $0xf8] sm:$0xf]  ;;  %v1621_v29 = vld [vmem:[%s2250_s25 + $0x114] sm:$0xf] }
  0x21   : > { %1618 = vst [vmem:[%s2255_s26 + $0x6c] sm:$0xf] %v1617_v27  ;;  %1620 = vst [vmem:[%s2255_s26 + $0x88] sm:$0xf] %v1619_v28  ;;  %v1623_v30 = vld [vmem:[%s2250_s25 + $0x168] sm:$0xf] }
  0x22   : > { %1622 = vst [vmem:[%s2255_s26 + $0xa4] sm:$0xf] %v1621_v29  ;;  %v1625_v31 = vld [vmem:[%s2250_s25 + $0x184] sm:$0xf]  ;;  %1624 = vst [vmem:[%s2255_s26 + $0xc0] sm:$0xf] %v1623_v30 }
  0x23   : > { %1626 = vst [vmem:[%s2255_s26 + $0xdc] sm:$0xf] %v1625_v31 }
  0x24 PF: > { %p1627_p5 = scmp.ge.s32.totalorder %s2192_s14, 1  ;;  %p228_p6 = scmp.lt.s32.totalorder %s2192_s14, 3 }
  0x26   : > { %p229_p7 = pnand %p1627_p5, %p228_p6 }
  0x27   : > { %v2323_v32 = vld [vmem:[%s2843_s1 + $0x40] sm:$0xff] (!%p229_p7)   ;;  %v2346_v36 = vld [vmem:[%s2843_s1 + $0x48] sm:$0xff] (!%p229_p7)   ;;  %v2370_v40 = vld [vmem:[%s2843_s1 + $0x50] sm:$0xff] (!%p229_p7)   ;;  %s235_s4 = sand.u32 (!%p229_p7), 1, %s2184_s12   ;;  %v2194_v4 = vmov (!%p229_p7), 0.0   ;;  %vm2195_vm0 = vmmov (!%p229_p7), 0  }
  0x28   : > { %232 = sbr.rel (%p229_p7) target bundleno = 480 (0x1e0), region = 54  ;;  %v2328_v33 = vld [vmem:[%s2843_s1 + $0xc0] sm:$0xff] (!%p229_p7)   ;;  %1743 = vmatprep.subr.bf16.mxu0 (!%p229_p7), %v2323_v32  ;;  %v2352_v37 = vld [vmem:[%s2843_s1 + $0xc8] sm:$0xff] (!%p229_p7)   ;;  %v2376_v41 = vld [vmem:[%s2843_s1 + $0xd0] sm:$0xff] (!%p229_p7)   ;;  %vm709_vm1 = vcmask (!%p229_p7), 261120   ;;  %vm1535_vm2 = vcmask (!%p229_p7), 519168  }
  0x29   : > { %v2334_v34 = vld [vmem:[%s2843_s1] sm:$0xff] (!%p229_p7)   ;;  %1765 = vmatprep.subr.bf16.mxu1 (!%p229_p7), %v2328_v33  ;;  %v2358_v38 = vld [vmem:[%s2843_s1 + $0x8] sm:$0xff] (!%p229_p7)   ;;  %v2382_v42 = vld [vmem:[%s2843_s1 + $0x10] sm:$0xff] (!%p229_p7)   ;;  %s2053_s12 = smul.u32 (!%p229_p7), 224, %s235_s4 }
  0x2a   : > { %v2340_v35 = vld [vmem:[%s2843_s1 + $0x80] sm:$0xff] (!%p229_p7)   ;;  %1744 = vmatpush3.bf16.msra.mxu0 (!%p229_p7), %v2334_v34  ;;  %v2364_v39 = vld [vmem:[%s2843_s1 + $0x88] sm:$0xff] (!%p229_p7)   ;;  %v2388_v43 = vld [vmem:[%s2843_s1 + $0x90] sm:$0xff] (!%p229_p7)  }
  0x2b   : > { %1766 = vmatpush3.bf16.msra.mxu1 (!%p229_p7), %v2340_v35  ;;  %1745 = vmatprep.subr.bf16.mxu0 (!%p229_p7), %v2346_v36  ;;  %v2394_v44 = vld [vmem:[%s2843_s1 + $0x58] sm:$0xff] (!%p229_p7)   ;;  %v2418_v48 = vld [vmem:[%s2843_s1 + $0x60] sm:$0xff] (!%p229_p7)   ;;  %v2442_v52 = vld [vmem:[%s2843_s1 + $0x68] sm:$0xff] (!%p229_p7)   ;;  %s2512_s29 = scalar_lea.vmem (!%p229_p7), [#allocation2], %s2053_s12 }
  0x2c   : > { %1767 = vmatprep.subr.bf16.mxu1 (!%p229_p7), %v2352_v37  ;;  %v2400_v45 = vld [vmem:[%s2843_s1 + $0xd8] sm:$0xff] (!%p229_p7)   ;;  %v2424_v49 = vld [vmem:[%s2843_s1 + $0xe0] sm:$0xff] (!%p229_p7)   ;;  %v2448_v53 = vld [vmem:[%s2843_s1 + $0xe8] sm:$0xff] (!%p229_p7)  }
  0x2d   : > { %v2406_v46 = vld [vmem:[%s2843_s1 + $0x18] sm:$0xff] (!%p229_p7)   ;;  %v2430_v50 = vld [vmem:[%s2843_s1 + $0x20] sm:$0xff] (!%p229_p7)   ;;  %v2454_v54 = vld [vmem:[%s2843_s1 + $0x28] sm:$0xff] (!%p229_p7)  }
  0x2e   : > { %1746 = vmatpush3.bf16.msra.mxu0 (!%p229_p7), %v2358_v38  ;;  %v2412_v47 = vld [vmem:[%s2843_s1 + $0x98] sm:$0xff] (!%p229_p7)   ;;  %v2436_v51 = vld [vmem:[%s2843_s1 + $0xa0] sm:$0xff] (!%p229_p7)   ;;  %v2461_v55 = vld [vmem:[%s2843_s1 + $0xa8] sm:$0xff] (!%p229_p7)  }
  0x2f   : > { %1768 = vmatpush3.bf16.msra.mxu1 %v2364_v39  ;;  %1747 = vmatprep.subr.bf16.mxu0 %v2370_v40  ;;  %v2467_v56 = vld [vmem:[%s2843_s1 + $0x70] sm:$0xff]   ;;  %v2491_v60 = vld [vmem:[%s2843_s1 + $0x78] sm:$0xff]   ;;  %v2114_v1 = vld [vmem:[%s2512_s29 + $0x4] ss:$28 sps:$4 sm:$0xff]  }
  0x30   : > { %1769 = vmatprep.subr.bf16.mxu1 %v2376_v41  ;;  %v2473_v57 = vld [vmem:[%s2843_s1 + $0xf0] sm:$0xff]   ;;  %v2497_v61 = vld [vmem:[%s2843_s1 + $0xf8] sm:$0xff]   ;;  %v2115_v2 = vld [vmem:[%s2512_s29 + $0x8] ss:$28 sps:$4 sm:$0xff]   ;;  %745 = vmatprep.mubr.bf16.mxu0 %v2114_v1 }
  0x31   : > { %v2479_v58 = vld [vmem:[%s2843_s1 + $0x30] sm:$0xff]   ;;  %v2503_v62 = vld [vmem:[%s2843_s1 + $0x38] sm:$0xff]   ;;  %v2117_v3 = vld [vmem:[%s2512_s29 + $0xc] ss:$28 sps:$4 sm:$0xff]  }
  0x32   : > { %1748 = vmatpush3.bf16.msra.mxu0 %v2382_v42  ;;  %v2485_v59 = vld [vmem:[%s2843_s1 + $0xb0] sm:$0xff]   ;;  %v2509_v63 = vld [vmem:[%s2843_s1 + $0xb8] sm:$0xff]   ;;  %v2523_v5 = vld [vmem:[%s2843_s1 + $0x140] sm:$0xff]   ;;  %786 = vmatprep.mubr.bf16.mxu1 %v2117_v3 }
  0x33   : > { %1770 = vmatpush3.bf16.msra.mxu1 %v2388_v43  ;;  %1749 = vmatprep.subr.bf16.mxu0 %v2394_v44  ;;  %v2112_v0 = vld [vmem:[%s2512_s29] ss:$28 sps:$4 sm:$0xff]   ;;  %v2540_v8 = vld [vmem:[%s2843_s1 + $0x148] sm:$0xff]   ;;  %v2560_v11 = vld [vmem:[%s2843_s1 + $0x150] sm:$0xff]  }
  0x34   : > { %1771 = vmatprep.subr.bf16.mxu1 %v2400_v45  ;;  %v2528_v6 = vld [vmem:[%s2843_s1 + $0x100] sm:$0xff]   ;;  %v2548_v9 = vld [vmem:[%s2843_s1 + $0x108] sm:$0xff]   ;;  %v2125_v12 = vld [vmem:[%s2512_s29 + $0x18] ss:$28 sps:$4 sm:$0xff]  }
  0x35   : > { %v2534_v7 = vld [vmem:[%s2843_s1 + $0x180] sm:$0xff]   ;;  %v2555_v10 = vld [vmem:[%s2843_s1 + $0x188] sm:$0xff]   ;;  %v2569_v13 = vld [vmem:[%s2843_s1 + $0x110] sm:$0xff]  }
  0x36   : > { %1750 = vmatpush3.bf16.msra.mxu0 %v2406_v46  ;;  %v2575_v14 = vld [vmem:[%s2843_s1 + $0x158] sm:$0xff]   ;;  %v2589_v16 = vld [vmem:[%s2843_s1 + $0x160] sm:$0xff]   ;;  %v2603_v18 = vld [vmem:[%s2843_s1 + $0x168] sm:$0xff]  }
  0x37   : > { %1772 = vmatpush3.bf16.msra.mxu1 %v2412_v47  ;;  %1751 = vmatprep.subr.bf16.mxu0 %v2418_v48  ;;  %v2582_v15 = vld [vmem:[%s2843_s1 + $0x118] sm:$0xff]   ;;  %v2596_v17 = vld [vmem:[%s2843_s1 + $0x120] sm:$0xff]   ;;  %v2610_v19 = vld [vmem:[%s2843_s1 + $0x128] sm:$0xff]  }
  0x38   : > { %1773 = vmatprep.subr.bf16.mxu1 %v2424_v49  ;;  %v2139_v20 = vld [vmem:[%s2512_s29 + $0x14] ss:$28 sps:$4 sm:$0xff]   ;;  %v2142_v22 = vld [vmem:[%s2512_s29 + $0x3c] ss:$28 sps:$4 sm:$0xff]   ;;  %v2145_v27 = vld [vmem:[%s2512_s29 + $0x44] ss:$28 sps:$4 sm:$0xff]  }
  0x39   : > { %v2618_v21 = vld [vmem:[%s2843_s1 + $0x170] sm:$0xff]   ;;  %v2633_v24 = vld [vmem:[%s2843_s1 + $0x178] sm:$0xff]   ;;  %v2148_v29 = vld [vmem:[%s2512_s29 + $0x4c] ss:$28 sps:$4 sm:$0xff]  }
  0x3a   : > { %1752 = vmatpush3.bf16.msra.mxu0 %v2430_v50  ;;  %v2626_v23 = vld [vmem:[%s2843_s1 + $0x130] sm:$0xff]   ;;  %v2640_v25 = vld [vmem:[%s2843_s1 + $0x138] sm:$0xff]  }
  0x3b   : > { %1774 = vmatpush3.bf16.msra.mxu1 %v2436_v51  ;;  %1753 = vmatprep.subr.bf16.mxu0 %v2442_v52  ;;  %v2137_v26 = vld [vmem:[%s2512_s29 + $0x10] ss:$28 sps:$4 sm:$0xff]   ;;  %v2140_v28 = vld [vmem:[%s2512_s29 + $0x38] ss:$28 sps:$4 sm:$0xff]   ;;  %v2143_v30 = vld [vmem:[%s2512_s29 + $0x40] ss:$28 sps:$4 sm:$0xff]  }
  0x3c   : > { %1775 = vmatprep.subr.bf16.mxu1 %v2448_v53  ;;  %v2149_v31 = vld [vmem:[%s2512_s29 + $0x50] ss:$28 sps:$4 sm:$0xff]  }
  0x3d   : > { %v2152_v1 = vld [vmem:[%s2512_s29 + $0x74] ss:$28 sps:$4 sm:$0xff]  }
  0x3e   : > { %1754 = vmatpush3.bf16.msra.mxu0 %v2454_v54  ;;  %v2150_v3 = vld [vmem:[%s2512_s29 + $0x70] ss:$28 sps:$4 sm:$0xff]  }
  0x3f   : > { %1776 = vmatpush3.bf16.msra.mxu1 %v2461_v55  ;;  %1755 = vmatprep.subr.bf16.mxu0 %v2467_v56 }
  0x40   : > { %1777 = vmatprep.subr.bf16.mxu1 %v2473_v57 }
  0x42   : > { %1756 = vmatpush3.bf16.msra.mxu0 %v2479_v58 }
  0x43   : > { %1778 = vmatpush3.bf16.msra.mxu1 %v2485_v59  ;;  %1757 = vmatprep.subr.bf16.mxu0 %v2491_v60 }
  0x44   : > { %1779 = vmatprep.subr.bf16.mxu1 %v2497_v61 }
  0x46   : > { %1758 = vmatpush3.bf16.msra.mxu0 %v2503_v62 }
  0x47   : > { %1780 = vmatpush3.bf16.msra.mxu1 %v2509_v63  ;;  %1787 = vmatprep.subr.bf16.mxu0 %v2523_v5 }
  0x48   : > { %2019 = vmatprep.subr.bf16.mxu1 %v2194_v4 }
  0x49   : > { %746 = vmatmul.mubr.bf16.vlgmr.msra.gmra.mrb[0].mxu0 %v2112_v0  ;;  %v2146_v0 = vld [vmem:[%s2512_s29 + $0x48] ss:$28 sps:$4 sm:$0xff]  }
  0x4a   : > { %787 = vmatmul.mubr.bf16.vlgmr.msra.gmra.mrb[0].mxu1 %v2115_v2  ;;  %1788 = vmatpush3.bf16.msra.mxu0 %v2528_v6  ;;  %v2155_v2 = vld [vmem:[%s2512_s29 + $0x7c] ss:$28 sps:$4 sm:$0xff]  }
  0x4b   : > { %2023 = vmatprep.mubr.msk.bf16.mxu1 %vm2195_vm0, %v2194_v4  ;;  %2020 = vmatpush3.bf16.msra.mxu1 %v2534_v7 }
  0x4c   : > { %1789 = vmatprep.subr.bf16.mxu0 %v2540_v8  ;;  %2021 = vmatprep.subr.bf16.mxu1 %v2194_v4 }
  0x4d   : > { %827 = vmatprep.mubr.bf16.mxu0 %v2139_v20  ;;  %v2159_v20 = vld [vmem:[%s2512_s29 + $0x84] ss:$28 sps:$4 sm:$0xff]  }
  0x4e   : > { %1790 = vmatpush3.bf16.msra.mxu0 %v2548_v9 }
  0x4f   : > { %2022 = vmatpush3.bf16.msra.mxu1 %v2555_v10  ;;  %1791 = vmatprep.subr.bf16.mxu0 %v2560_v11 }
  0x50   : > { %1812 = vmatprep.subr.bf16.mxu1 %v2323_v32 }
  0x52   : > { %2024 = vmatmul.mubr.msk.bf16.vlgmr.msra.gmra.mrb[4].mxu1 %vm709_vm1, %v2125_v12  ;;  %1792 = vmatpush3.bf16.msra.mxu0 %v2569_v13  ;;  %v2153_v12 = vld [vmem:[%s2512_s29 + $0x78] ss:$28 sps:$4 sm:$0xff]  }
  0x53   : > { %1813 = vmatpush3.bf16.msra.mxu1 %v2334_v34  ;;  %1793 = vmatprep.subr.bf16.mxu0 %v2575_v14 }
  0x54   : > { %1814 = vmatprep.subr.bf16.mxu1 %v2346_v36  ;;  %956 = vmatprep.mubr.bf16.mxu1 %v2142_v22  ;;  %v2156_v22 = vld [vmem:[%s2512_s29 + $0x88] ss:$28 sps:$4 sm:$0xff]  }
  0x56   : > { %1794 = vmatpush3.bf16.msra.mxu0 %v2582_v15 }
  0x57   : > { %1815 = vmatpush3.bf16.msra.mxu1 %v2358_v38  ;;  %1795 = vmatprep.subr.bf16.mxu0 %v2589_v16 }
  0x58   : > { %1816 = vmatprep.subr.bf16.mxu1 %v2370_v40 }
  0x5a   : > { %1796 = vmatpush3.bf16.msra.mxu0 %v2596_v17 }
  0x5b   : > { %1817 = vmatpush3.bf16.msra.mxu1 %v2382_v42  ;;  %1797 = vmatprep.subr.bf16.mxu0 %v2603_v18 }
  0x5c   : > { %1818 = vmatprep.subr.bf16.mxu1 %v2394_v44 }
  0x5e   : > { %1798 = vmatpush3.bf16.msra.mxu0 %v2610_v19 }
  0x5f   : > { %1819 = vmatpush3.bf16.msra.mxu1 %v2406_v46  ;;  %1799 = vmatprep.subr.bf16.mxu0 %v2618_v21 }
  0x60   : > { %1820 = vmatprep.subr.bf16.mxu1 %v2418_v48 }
  0x62   : > { %1800 = vmatpush3.bf16.msra.mxu0 %v2626_v23 }
  0x63   : > { %1821 = vmatpush3.bf16.msra.mxu1 %v2430_v50  ;;  %1801 = vmatprep.subr.bf16.mxu0 %v2633_v24 }
  0x64   : > { %1822 = vmatprep.subr.bf16.mxu1 %v2442_v52 }
  0x66   : > { %1802 = vmatpush3.bf16.msra.mxu0 %v2640_v25 }
  0x67   : > { %1823 = vmatpush3.bf16.msra.mxu1 %v2454_v54  ;;  %1834 = vmatprep.subr.bf16.mxu0 %v2328_v33 }
  0x68   : > { %1824 = vmatprep.subr.bf16.mxu1 %v2467_v56 }
  0x69   : > { %828 = vmatmul.mubr.bf16.vlgmr.msra.gmra.mrb[4].mxu0 %v2137_v26  ;;  %v2162_v26 = vld [vmem:[%s2512_s29 + $0xac] ss:$28 sps:$4 sm:$0xff]  }
  0x6a   : > { %1835 = vmatpush3.bf16.msra.mxu0 %v2340_v35  ;;  %997 = vmatprep.mubr.bf16.mxu0 %v2145_v27 }
  0x6b   : > { %1825 = vmatpush3.bf16.msra.mxu1 %v2479_v58  ;;  %1836 = vmatprep.subr.bf16.mxu0 %v2352_v37 }
  0x6c   : > { %1826 = vmatprep.subr.bf16.mxu1 %v2491_v60 }
  0x6e   : > { %1837 = vmatpush3.bf16.msra.mxu0 %v2364_v39 }
  0x6f   : > { %1827 = vmatpush3.bf16.msra.mxu1 %v2503_v62  ;;  %1838 = vmatprep.subr.bf16.mxu0 %v2376_v41 }
  0x70   : > { %1856 = vmatprep.subr.bf16.mxu1 %v2523_v5 }
  0x72   : > { %957 = vmatmul.mubr.bf16.vlgmr.msra.gmra.mrb[8].mxu1 %v2140_v28  ;;  %1839 = vmatpush3.bf16.msra.mxu0 %v2388_v43 }
  0x73   : > { %1857 = vmatpush3.bf16.msra.mxu1 %v2528_v6  ;;  %1840 = vmatprep.subr.bf16.mxu0 %v2400_v45 }
  0x74   : > { %1858 = vmatprep.subr.bf16.mxu1 %v2540_v8  ;;  %1038 = vmatprep.mubr.bf16.mxu1 %v2148_v29 }
  0x76   : > { %1841 = vmatpush3.bf16.msra.mxu0 %v2412_v47 }
  0x77   : > { %1859 = vmatpush3.bf16.msra.mxu1 %v2548_v9  ;;  %1842 = vmatprep.subr.bf16.mxu0 %v2424_v49 }
  0x78   : > { %1860 = vmatprep.subr.bf16.mxu1 %v2560_v11 }
  0x7a   : > { %1843 = vmatpush3.bf16.msra.mxu0 %v2436_v51 }
  0x7b   : > { %1861 = vmatpush3.bf16.msra.mxu1 %v2569_v13  ;;  %1844 = vmatprep.subr.bf16.mxu0 %v2448_v53 }
  0x7c   : > { %1862 = vmatprep.subr.bf16.mxu1 %v2575_v14 }
  0x7e   : > { %1845 = vmatpush3.bf16.msra.mxu0 %v2461_v55 }
  0x7f   : > { %1863 = vmatpush3.bf16.msra.mxu1 %v2582_v15  ;;  %1846 = vmatprep.subr.bf16.mxu0 %v2473_v57 }
  0x80   : > { %1864 = vmatprep.subr.bf16.mxu1 %v2589_v16 }
  0x82   : > { %1847 = vmatpush3.bf16.msra.mxu0 %v2485_v59 }
  0x83   : > { %1865 = vmatpush3.bf16.msra.mxu1 %v2596_v17  ;;  %1848 = vmatprep.subr.bf16.mxu0 %v2497_v61 }
  0x84   : > { %1866 = vmatprep.subr.bf16.mxu1 %v2603_v18 }
  0x86   : > { %1849 = vmatpush3.bf16.msra.mxu0 %v2509_v63 }
  0x87   : > { %1867 = vmatpush3.bf16.msra.mxu1 %v2610_v19  ;;  %2027 = vmatprep.subr.bf16.mxu0 %v2194_v4 }
  0x88   : > { %1868 = vmatprep.subr.bf16.mxu1 %v2618_v21 }
  0x89   : > { %998 = vmatmul.mubr.bf16.vlgmr.msra.gmra.mrb[8].mxu0 %v2143_v30 }
  0x8a   : > { %2028 = vmatpush3.bf16.msra.mxu0 %v2534_v7  ;;  %2031 = vmatprep.mubr.msk.bf16.mxu0 %vm2195_vm0, %v2194_v4 }
  0x8b   : > { %1869 = vmatpush3.bf16.msra.mxu1 %v2626_v23  ;;  %2029 = vmatprep.subr.bf16.mxu0 %v2194_v4 }
  0x8c   : > { %1870 = vmatprep.subr.bf16.mxu1 %v2633_v24 }
  0x8e   : > { %2030 = vmatpush3.bf16.msra.mxu0 %v2555_v10 }
  0x8f   : > { %1871 = vmatpush3.bf16.msra.mxu1 %v2640_v25  ;;  %1881 = vmatprep.subr.bf16.mxu0 %v2323_v32 }
  0x90   : > { %1903 = vmatprep.subr.bf16.mxu1 %v2328_v33 }
  0x91   : > { %2032 = vmatmul.mubr.msk.bf16.vlgmr.msra.gmra.mrb[12].mxu0 %vm709_vm1, %v2149_v31 }
  0x92   : > { %1039 = vmatmul.mubr.bf16.vlgmr.msra.gmra.mrb[12].mxu1 %v2146_v0  ;;  %1882 = vmatpush3.bf16.msra.mxu0 %v2334_v34 }
  0x93   : > { %1904 = vmatpush3.bf16.msra.mxu1 %v2340_v35  ;;  %1883 = vmatprep.subr.bf16.mxu0 %v2346_v36 }
  0x94   : > { %1905 = vmatprep.subr.bf16.mxu1 %v2352_v37  ;;  %1169 = vmatprep.mubr.bf16.mxu0 %v2152_v1 }
  0x95   : > { %1210 = vmatprep.mubr.bf16.mxu1 %v2155_v2 }
  0x96   : > { %1884 = vmatpush3.bf16.msra.mxu0 %v2358_v38 }
  0x97   : > { %1906 = vmatpush3.bf16.msra.mxu1 %v2364_v39  ;;  %1885 = vmatprep.subr.bf16.mxu0 %v2370_v40 }
  0x98   : > { %1907 = vmatprep.subr.bf16.mxu1 %v2376_v41 }
  0x9a   : > { %1886 = vmatpush3.bf16.msra.mxu0 %v2382_v42 }
  0x9b   : > { %1908 = vmatpush3.bf16.msra.mxu1 %v2388_v43  ;;  %1887 = vmatprep.subr.bf16.mxu0 %v2394_v44 }
  0x9c   : > { %1909 = vmatprep.subr.bf16.mxu1 %v2400_v45 }
  0x9e   : > { %1888 = vmatpush3.bf16.msra.mxu0 %v2406_v46 }
  0x9f   : > { %1910 = vmatpush3.bf16.msra.mxu1 %v2412_v47  ;;  %1889 = vmatprep.subr.bf16.mxu0 %v2418_v48 }
  0xa0   : > { %1911 = vmatprep.subr.bf16.mxu1 %v2424_v49 }
  0xa2   : > { %1890 = vmatpush3.bf16.msra.mxu0 %v2430_v50 }
  0xa3   : > { %1912 = vmatpush3.bf16.msra.mxu1 %v2436_v51  ;;  %1891 = vmatprep.subr.bf16.mxu0 %v2442_v52 }
  0xa4   : > { %1913 = vmatprep.subr.bf16.mxu1 %v2448_v53 }
  0xa6   : > { %1892 = vmatpush3.bf16.msra.mxu0 %v2454_v54 }
  0xa7   : > { %1914 = vmatpush3.bf16.msra.mxu1 %v2461_v55  ;;  %1893 = vmatprep.subr.bf16.mxu0 %v2467_v56 }
  0xa8   : > { %1915 = vmatprep.subr.bf16.mxu1 %v2473_v57 }
  0xaa   : > { %1894 = vmatpush3.bf16.msra.mxu0 %v2479_v58 }
  0xab   : > { %1916 = vmatpush3.bf16.msra.mxu1 %v2485_v59  ;;  %1895 = vmatprep.subr.bf16.mxu0 %v2491_v60 }
  0xac   : > { %1917 = vmatprep.subr.bf16.mxu1 %v2497_v61 }
  0xae   : > { %1896 = vmatpush3.bf16.msra.mxu0 %v2503_v62 }
  0xaf   : > { %1918 = vmatpush3.bf16.msra.mxu1 %v2509_v63  ;;  %1925 = vmatprep.subr.bf16.mxu0 %v2523_v5 }
  0xb0   : > { %2035 = vmatprep.subr.bf16.mxu1 %v2194_v4 }
  0xb1   : > { %1170 = vmatmul.mubr.bf16.vlgmr.msra.gmra.mrb[16].mxu0 %v2150_v3 }
  0xb2   : > { %1211 = vmatmul.mubr.bf16.vlgmr.msra.gmra.mrb[16].mxu1 %v2153_v12  ;;  %1926 = vmatpush3.bf16.msra.mxu0 %v2528_v6 }
  0xb3   : > { %2036 = vmatpush3.bf16.msra.mxu1 %v2534_v7  ;;  %1927 = vmatprep.subr.bf16.mxu0 %v2540_v8 }
  0xb4   : > { %2037 = vmatprep.subr.bf16.mxu1 %v2194_v4  ;;  %2039 = vmatprep.mubr.msk.bf16.mxu1 %vm2195_vm0, %v2194_v4 }
  0xb5   : > { %1251 = vmatprep.mubr.bf16.mxu0 %v2159_v20 }
  0xb6   : > { %1928 = vmatpush3.bf16.msra.mxu0 %v2548_v9 }
  0xb7   : > { %2038 = vmatpush3.bf16.msra.mxu1 %v2555_v10  ;;  %1929 = vmatprep.subr.bf16.mxu0 %v2560_v11 }
  0xb8   : > { %1950 = vmatprep.subr.bf16.mxu1 %v2323_v32  ;;  %v2157_v32 = vld [vmem:[%s2512_s29 + $0x80] ss:$28 sps:$4 sm:$0xff]  }
  0xba   : > { %2040 = vmatmul.mubr.msk.bf16.vlgmr.msra.gmra.mrb[20].mxu1 %vm709_vm1, %v2156_v22  ;;  %1930 = vmatpush3.bf16.msra.mxu0 %v2569_v13 }
  0xbb   : > { %1951 = vmatpush3.bf16.msra.mxu1 %v2334_v34  ;;  %1931 = vmatprep.subr.bf16.mxu0 %v2575_v14  ;;  %v2165_v34 = vld [vmem:[%s2512_s29 + $0xb4] ss:$28 sps:$4 sm:$0xff]  }
  0xbc   : > { %1952 = vmatprep.subr.bf16.mxu1 %v2346_v36  ;;  %1382 = vmatprep.mubr.bf16.mxu1 %v2162_v26  ;;  %v2160_v36 = vld [vmem:[%s2512_s29 + $0xa8] ss:$28 sps:$4 sm:$0xff]  }
  0xbe   : > { %1932 = vmatpush3.bf16.msra.mxu0 %v2582_v15 }
  0xbf   : > { %1953 = vmatpush3.bf16.msra.mxu1 %v2358_v38  ;;  %1933 = vmatprep.subr.bf16.mxu0 %v2589_v16  ;;  %v2166_v38 = vld [vmem:[%s2512_s29 + $0xb8] ss:$28 sps:$4 sm:$0xff]  }
  0xc0   : > { %1954 = vmatprep.subr.bf16.mxu1 %v2370_v40 }
  0xc2   : > { %1934 = vmatpush3.bf16.msra.mxu0 %v2596_v17 }
  0xc3   : > { %1955 = vmatpush3.bf16.msra.mxu1 %v2382_v42  ;;  %1935 = vmatprep.subr.bf16.mxu0 %v2603_v18 }
  0xc4   : > { %1956 = vmatprep.subr.bf16.mxu1 %v2394_v44 }
  0xc6   : > { %1936 = vmatpush3.bf16.msra.mxu0 %v2610_v19 }
  0xc7   : > { %1957 = vmatpush3.bf16.msra.mxu1 %v2406_v46  ;;  %1937 = vmatprep.subr.bf16.mxu0 %v2618_v21 }
  0xc8   : > { %1958 = vmatprep.subr.bf16.mxu1 %v2418_v48 }
  0xca   : > { %1938 = vmatpush3.bf16.msra.mxu0 %v2626_v23 }
  0xcb   : > { %1959 = vmatpush3.bf16.msra.mxu1 %v2430_v50  ;;  %1939 = vmatprep.subr.bf16.mxu0 %v2633_v24 }
  0xcc   : > { %1960 = vmatprep.subr.bf16.mxu1 %v2442_v52 }
  0xce   : > { %1940 = vmatpush3.bf16.msra.mxu0 %v2640_v25 }
  0xcf   : > { %1961 = vmatpush3.bf16.msra.mxu1 %v2454_v54  ;;  %1972 = vmatprep.subr.bf16.mxu0 %v2328_v33  ;;  %v2168_v33 = vld [vmem:[%s2512_s29 + $0xbc] ss:$28 sps:$4 sm:$0xff]  }
  0xd0   : > { %1962 = vmatprep.subr.bf16.mxu1 %v2467_v56 }
  0xd1   : > { %1252 = vmatmul.mubr.bf16.vlgmr.msra.gmra.mrb[20].mxu0 %v2157_v32 }
  0xd2   : > { %1973 = vmatpush3.bf16.msra.mxu0 %v2340_v35  ;;  %1423 = vmatprep.mubr.bf16.mxu0 %v2165_v34  ;;  %v2163_v35 = vld [vmem:[%s2512_s29 + $0xb0] ss:$28 sps:$4 sm:$0xff]  }
  0xd3   : > { %1963 = vmatpush3.bf16.msra.mxu1 %v2479_v58  ;;  %1974 = vmatprep.subr.bf16.mxu0 %v2352_v37  ;;  %v2169_v37 = vld [vmem:[%s2512_s29 + $0xc0] ss:$28 sps:$4 sm:$0xff]   ;;  %s1628_s29 = sshll.u32 %s1604_s15, 1 }
  0xd4   : > { %1964 = vmatprep.subr.bf16.mxu1 %v2491_v60  ;;  %p260_p8 = scmp.lt.s32.totalorder %s1628_s29, 3 }
  0xd6   : > { %1975 = vmatpush3.bf16.msra.mxu0 %v2364_v39  ;;  %s2850_s29 = smov (!%p260_p8, %s1628_s29), 3 }
  0xd7   : > { %1965 = vmatpush3.bf16.msra.mxu1 %v2503_v62  ;;  %1976 = vmatprep.subr.bf16.mxu0 %v2376_v41  ;;  %s1629_s14 = sshll.u32 %s2850_s29, 2 }
  0xd8   : > { %1994 = vmatprep.subr.bf16.mxu1 %v2523_v5  ;;  %s263_s26 = scalar_lea.vmem %s2845_s3, %s1629_s14 }
  0xda   : > { %1383 = vmatmul.mubr.bf16.vlgmr.msra.gmra.mrb[24].mxu1 %v2160_v36  ;;  %1977 = vmatpush3.bf16.msra.mxu0 %v2388_v43 }
  0xdb   : > { %1995 = vmatpush3.bf16.msra.mxu1 %v2528_v6  ;;  %1978 = vmatprep.subr.bf16.mxu0 %v2400_v45 }
  0xdc   : > { %1996 = vmatprep.subr.bf16.mxu1 %v2540_v8  ;;  %1464 = vmatprep.mubr.bf16.mxu1 %v2168_v33 }
  0xde   : > { %1979 = vmatpush3.bf16.msra.mxu0 %v2412_v47 }
  0xdf   : > { %1997 = vmatpush3.bf16.msra.mxu1 %v2548_v9  ;;  %1980 = vmatprep.subr.bf16.mxu0 %v2424_v49 }
  0xe0   : > { %1998 = vmatprep.subr.bf16.mxu1 %v2560_v11 }
  0xe2   : > { %1981 = vmatpush3.bf16.msra.mxu0 %v2436_v51 }
  0xe3   : > { %1999 = vmatpush3.bf16.msra.mxu1 %v2569_v13  ;;  %1982 = vmatprep.subr.bf16.mxu0 %v2448_v53 }
  0xe4   : > { %2000 = vmatprep.subr.bf16.mxu1 %v2575_v14 }
  0xe6   : > { %1983 = vmatpush3.bf16.msra.mxu0 %v2461_v55 }
  0xe7   : > { %2001 = vmatpush3.bf16.msra.mxu1 %v2582_v15  ;;  %1984 = vmatprep.subr.bf16.mxu0 %v2473_v57 }
  0xe8   : > { %2002 = vmatprep.subr.bf16.mxu1 %v2589_v16 }
  0xea   : > { %1985 = vmatpush3.bf16.msra.mxu0 %v2485_v59 }
  0xeb   : > { %2003 = vmatpush3.bf16.msra.mxu1 %v2596_v17  ;;  %1986 = vmatprep.subr.bf16.mxu0 %v2497_v61 }
  0xec   : > { %2004 = vmatprep.subr.bf16.mxu1 %v2603_v18 }
  0xee   : > { %1987 = vmatpush3.bf16.msra.mxu0 %v2509_v63 }
  0xef   : > { %2005 = vmatpush3.bf16.msra.mxu1 %v2610_v19  ;;  %2043 = vmatprep.subr.bf16.mxu0 %v2194_v4 }
  0xf0   : > { %2006 = vmatprep.subr.bf16.mxu1 %v2618_v21 }
  0xf1   : > { %1424 = vmatmul.mubr.bf16.vlgmr.msra.gmra.mrb[24].mxu0 %v2163_v35 }
  0xf2   : > { %2044 = vmatpush3.bf16.msra.mxu0 %v2534_v7  ;;  %2047 = vmatprep.mubr.msk.bf16.mxu0 %vm2195_vm0, %v2194_v4 }
  0xf3   : > { %2007 = vmatpush3.bf16.msra.mxu1 %v2626_v23  ;;  %2045 = vmatprep.subr.bf16.mxu0 %v2194_v4 }
  0xf4   : > { %2008 = vmatprep.subr.bf16.mxu1 %v2633_v24 }
  0xf6   : > { %2046 = vmatpush3.bf16.msra.mxu0 %v2555_v10 }
  0xf7   : > { %2009 = vmatpush3.bf16.msra.mxu1 %v2640_v25 }
  0xf9   : > { %2048 = vmatmul.mubr.msk.bf16.vlgmr.msra.gmra.mrb[28].mxu0 %vm709_vm1, %v2169_v37 }
  0xfa   : > { %1465 = vmatmul.mubr.bf16.vlgmr.msra.gmra.mrb[28].mxu1 %v2166_v38 }
 0x11c   : > { %v1759_v39 = vpop.f32.mrb[0].mxu0 }
 0x11d   : > { %v1781_v40 = vpop.f32.mrb[0].mxu1  ;;  %v1760_v41 = vpop.f32.mrb[1].mxu0 }
 0x11e   : > { %v1761_v42 = vadd.f32 %v1760_v41, %v1759_v39  ;;  %v1782_v43 = vpop.f32.mrb[1].mxu1  ;;  %v1762_v44 = vpop.f32.mrb[2].mxu0 }
 0x11f   : > { %v1783_v45 = vadd.f32 %v1782_v43, %v1781_v40  ;;  %v1784_v46 = vpop.f32.mrb[2].mxu1  ;;  %v1763_v47 = vpop.f32.mrb[3].mxu0 }
 0x120   : > { %v1764_v48 = vadd.f32 %v1763_v47, %v1762_v44  ;;  %v1785_v49 = vpop.f32.mrb[3].mxu1 }
 0x121   : > { %v789_v50 = vadd.f32 %v1783_v45, %v1761_v42  ;;  %v1786_v51 = vadd.f32 %v1785_v49, %v1784_v46 }
 0x123   : > { %v792_v52 = vadd.f32 %v1786_v51, %v1764_v48 }
 0x125   : > { %v870_v53 = vpop.f32.mrb[4].mxu1 }
 0x126   : > { %v2025_v54 = vpop.f32.mrb[5].mxu1 }
 0x127   : > { %v873_v55 = vpop.f32.mrb[6].mxu1 }
 0x128   : > { %v2026_v56 = vpop.f32.mrb[7].mxu1 }
 0x13c   : > { %v1803_v57 = vpop.f32.mrb[4].mxu0 }
 0x13d   : > { %v1804_v58 = vpop.f32.mrb[5].mxu0 }
 0x13e   : > { %v1805_v59 = vadd.f32 %v1804_v58, %v1803_v57  ;;  %v1806_v60 = vpop.f32.mrb[6].mxu0 }
 0x13f   : > { %v1807_v61 = vpop.f32.mrb[7].mxu0 }
 0x140   : > { %v830_v62 = vadd.f32 %v1805_v59, %v789_v50  ;;  %v1808_v63 = vadd.f32 %v1807_v61, %v1806_v60 }
 0x142   : > { %v833_v4 = vadd.f32 %v1808_v63, %v792_v52  ;;  %v871_v5 = vadd.f32 %v870_v53, %v830_v62 }
 0x144   : > { %v2821_v6 = vadd.f32 %v873_v55, %v833_v4 }
 0x145   : > { %v1828_v7 = vpop.f32.mrb[8].mxu1 }
 0x146   : > { %v1829_v8 = vpop.f32.mrb[9].mxu1 }
 0x147   : > { %v1830_v9 = vadd.f32 %v1829_v8, %v1828_v7  ;;  %v1831_v10 = vpop.f32.mrb[10].mxu1 }
 0x148   : > { %v1832_v11 = vpop.f32.mrb[11].mxu1 }
 0x149   : > { %v1833_v13 = vadd.f32 %v1832_v11, %v1831_v10 }
 0x15c   : > { %v1850_v14 = vpop.f32.mrb[8].mxu0 }
 0x15d   : > { %v1851_v15 = vpop.f32.mrb[9].mxu0 }
 0x15e   : > { %v1852_v16 = vadd.f32 %v1851_v15, %v1850_v14  ;;  %v1853_v17 = vpop.f32.mrb[10].mxu0 }
 0x15f   : > { %v1854_v18 = vpop.f32.mrb[11].mxu0 }
 0x160   : > { %v1000_v19 = vadd.f32 %v1852_v16, %v1830_v9  ;;  %v1855_v21 = vadd.f32 %v1854_v18, %v1853_v17 }
 0x162   : > { %v1003_v23 = vadd.f32 %v1855_v21, %v1833_v13 }
 0x164   : > { %v1081_v24 = vpop.f32.mrb[12].mxu0 }
 0x165   : > { %v1872_v25 = vpop.f32.mrb[12].mxu1  ;;  %v2033_v27 = vpop.f32.mrb[13].mxu0 }
 0x166   : > { %v1873_v28 = vpop.f32.mrb[13].mxu1  ;;  %v1084_v29 = vpop.f32.mrb[14].mxu0 }
 0x167   : > { %v1874_v30 = vadd.f32 %v1873_v28, %v1872_v25  ;;  %v1875_v31 = vpop.f32.mrb[14].mxu1  ;;  %v2034_v0 = vpop.f32.mrb[15].mxu0 }
 0x168   : > { %v1876_v1 = vpop.f32.mrb[15].mxu1 }
 0x169   : > { %v1041_v2 = vadd.f32 %v1874_v30, %v1000_v19  ;;  %v1877_v3 = vadd.f32 %v1876_v1, %v1875_v31 }
 0x16b   : > { %v1082_v12 = vadd.f32 %v1081_v24, %v1041_v2  ;;  %v1044_v20 = vadd.f32 %v1877_v3, %v1003_v23  ;;  %v1736_v2 = vld [vmem:[%s2844_s2] ss:$0 sm:$0xff] }
 0x16d   : > { %v1088_v22 = vmax.f32 %v871_v5, %v1082_v12  ;;  %v1085_v26 = vadd.f32 %v1084_v29, %v1044_v20 }
 0x16f   : > { %v1089_v32 = vmax.f32 %v2821_v6, %v1085_v26 }
 0x184   : > { %v1897_v34 = vpop.f32.mrb[16].mxu0 }
 0x185   : > { %v1919_v36 = vpop.f32.mrb[16].mxu1  ;;  %v1898_v33 = vpop.f32.mrb[17].mxu0 }
 0x186   : > { %v1899_v35 = vadd.f32 %v1898_v33, %v1897_v34  ;;  %v1920_v37 = vpop.f32.mrb[17].mxu1  ;;  %v1900_v38 = vpop.f32.mrb[18].mxu0 }
 0x187   : > { %v1921_v39 = vadd.f32 %v1920_v37, %v1919_v36  ;;  %v1922_v40 = vpop.f32.mrb[18].mxu1  ;;  %v1901_v41 = vpop.f32.mrb[19].mxu0 }
 0x188   : > { %v1902_v42 = vadd.f32 %v1901_v41, %v1900_v38  ;;  %v1923_v43 = vpop.f32.mrb[19].mxu1 }
 0x189   : > { %v1213_v44 = vadd.f32 %v1921_v39, %v1899_v35  ;;  %v1924_v45 = vadd.f32 %v1923_v43, %v1922_v40 }
 0x18b   : > { %v1216_v46 = vadd.f32 %v1924_v45, %v1902_v42 }
 0x18d   : > { %v1294_v47 = vpop.f32.mrb[20].mxu1 }
 0x18e   : > { %v2041_v48 = vpop.f32.mrb[21].mxu1 }
 0x18f   : > { %v1297_v49 = vpop.f32.mrb[22].mxu1 }
 0x190   : > { %v2042_v50 = vpop.f32.mrb[23].mxu1 }
 0x1a4   : > { %v1941_v51 = vpop.f32.mrb[20].mxu0 }
 0x1a5   : > { %v1942_v52 = vpop.f32.mrb[21].mxu0 }
 0x1a6   : > { %v1943_v53 = vadd.f32 %v1942_v52, %v1941_v51  ;;  %v1944_v54 = vpop.f32.mrb[22].mxu0 }
 0x1a7   : > { %v1945_v55 = vpop.f32.mrb[23].mxu0 }
 0x1a8   : > { %v1254_v56 = vadd.f32 %v1943_v53, %v1213_v44  ;;  %v1946_v57 = vadd.f32 %v1945_v55, %v1944_v54 }
 0x1aa   : > { %v1295_v58 = vadd.f32 %v1294_v47, %v1254_v56  ;;  %v1257_v59 = vadd.f32 %v1946_v57, %v1216_v46 }
 0x1ac   : > { %v1298_v60 = vadd.f32 %v1297_v49, %v1257_v59  ;;  %v1301_v61 = vmax.f32 %v1088_v22, %v1295_v58 }
 0x1ad   : > { %v1966_v62 = vpop.f32.mrb[24].mxu1 }
 0x1ae   : > { %v1967_v63 = vpop.f32.mrb[25].mxu1  ;;  %v1302_v4 = vmax.f32 %v1089_v32, %v1298_v60 }
 0x1af   : > { %v1968_v5 = vadd.f32 %v1967_v63, %v1966_v62  ;;  %v1969_v6 = vpop.f32.mrb[26].mxu1 }
 0x1b0   : > { %v1970_v7 = vpop.f32.mrb[27].mxu1 }
 0x1b1   : > { %v1971_v8 = vadd.f32 %v1970_v7, %v1969_v6 }
 0x1c4   : > { %v1988_v9 = vpop.f32.mrb[24].mxu0 }
 0x1c5   : > { %v1989_v10 = vpop.f32.mrb[25].mxu0 }
 0x1c6   : > { %v1990_v11 = vadd.f32 %v1989_v10, %v1988_v9  ;;  %v1991_v13 = vpop.f32.mrb[26].mxu0 }
 0x1c7   : > { %v1992_v14 = vpop.f32.mrb[27].mxu0 }
 0x1c8   : > { %v1426_v15 = vadd.f32 %v1990_v11, %v1968_v5  ;;  %v1993_v16 = vadd.f32 %v1992_v14, %v1991_v13 }
 0x1ca   : > { %v1429_v17 = vadd.f32 %v1993_v16, %v1971_v8 }
 0x1cc   : > { %v1507_v18 = vpop.f32.mrb[28].mxu0 }
 0x1cd   : > { %v2010_v19 = vpop.f32.mrb[28].mxu1  ;;  %v2049_v21 = vpop.f32.mrb[29].mxu0 }
 0x1ce   : > { %v2011_v23 = vpop.f32.mrb[29].mxu1  ;;  %v1510_v24 = vpop.f32.mrb[30].mxu0 }
 0x1cf   : > { %v2012_v25 = vadd.f32 %v2011_v23, %v2010_v19  ;;  %v2013_v27 = vpop.f32.mrb[30].mxu1  ;;  %v2050_v28 = vpop.f32.mrb[31].mxu0 }
 0x1d0   : > { %v2014_v29 = vpop.f32.mrb[31].mxu1 }
 0x1d1   : > { %v1467_v30 = vadd.f32 %v2012_v25, %v1426_v15  ;;  %v2015_v31 = vadd.f32 %v2014_v29, %v2013_v27 }
 0x1d3   : > { %v1508_v0 = vadd.f32 %v1507_v18, %v1467_v30  ;;  %v1470_v1 = vadd.f32 %v2015_v31, %v1429_v17 }
 0x1d5   : > { %v1514_v3 = vmax.f32 %v1301_v61, %v1508_v0  ;;  %v1511_v12 = vadd.f32 %v1510_v24, %v1470_v1 }
 0x1d7   : > { %v1523_v20 = vadd.f32 %v1736_v2, %v1514_v3  ;;  %v1515_v22 = vmax.f32 %v1302_v4, %v1511_v12 }
 0x1d9   : > { %v1525_v26 = vmax.f32 %v1523_v20, 0.0  ;;  %v1524_v32 = vadd.f32 %v1736_v2, %v1515_v22 }
 0x1db   : > { %v1741_v34 = vpack.c.bf16 %v1525_v26, %v1525_v26  ;;  %v1526_v36 = vmax.f32 %v1524_v32, 0.0 }
 0x1dd   : > { %1536 = vst.msk [vmem:[%s263_s26] sm:$0xf] %vm1535_vm2, %v1741_v34  ;;  %v1742_v33 = vpack.c.bf16 %v1526_v36, %v1526_v36 }
 0x1df   : > { %1537 = vst.msk [vmem:[%s263_s26 + $0x4] sm:$0xf] %vm1535_vm2, %v1742_v33 }
 0x1e0 PF: > { %p10_p9 = scmp.ge.s32.totalorder %s2233_s16, 4   ;;  %s2846_s12 = smov %s2188_s13 }
 0x1e1   : > { %s2847_s13 = smov %s2242_s19  ;;  %s2848_s14 = smov %s2233_s16 }
 0x1e2   :  { %12 = sbr.rel (!%p10_p9) target bundleno = 2 (0x2), region = 102 }

// kernel: lenet_fcn_forward.5
= control target key start
LH: loop header
LB: loop body
LE: loop exit
PB: predicated region body
PF: predicated region fallthrough
CT: control target
= control target key end

     0   :  { %s4077_s1 = inlined_call_operand.vmem [shape: bf16[1024,512], index: 1, kind: input, shape index: {}]   ;;  %s4078_s0 = inlined_call_operand.vmem [shape: bf16[16,1024], index: 0, kind: input, shape index: {}]   ;;  %s4079_s3 = inlined_call_operand.vmem [shape: bf16[512,128], index: 3, kind: input, shape index: {}]   ;;  %s4080_s2 = inlined_call_operand.vmem [shape: f32[1,512], index: 2, kind: input, shape index: {}]   ;;  %s4081_s4 = inlined_call_operand.vmem [shape: f32[1,128], index: 4, kind: input, shape index: {}]   ;;  %s4082_s5 = inlined_call_operand.vmem [shape: f32[16,128], index: 5, kind: output, shape index: {}]  }
   0x1   :  { %v2707_v0 = vld [vmem:[%s4077_s1 + $0x4] ss:$16 sps:$4 sm:$0xff]   ;;  %v2709_v1 = vld [vmem:[%s4077_s1 + $0xc] ss:$16 sps:$4 sm:$0xff]   ;;  %v2711_v2 = vld [vmem:[%s4077_s1] ss:$16 sps:$4 sm:$0xff]  }
   0x2   :  { %1627 = vmatprep.subr.bf16.mxu0 %v2707_v0  ;;  %v2712_v3 = vld [vmem:[%s4077_s1 + $0x8] ss:$16 sps:$4 sm:$0xff]   ;;  %1799 = vmatprep.subr.bf16.mxu1 %v2709_v1  ;;  %v2713_v4 = vld [vmem:[%s4077_s1 + $0x24] ss:$16 sps:$4 sm:$0xff]   ;;  %v2715_v5 = vld [vmem:[%s4077_s1 + $0x2c] ss:$16 sps:$4 sm:$0xff]  }
   0x3   :  { %1628 = vmatpush1.bf16.msra.mxu0 %v2711_v2  ;;  %1800 = vmatpush1.bf16.msra.mxu1 %v2712_v3  ;;  %v2717_v6 = vld [vmem:[%s4077_s1 + $0x20] ss:$16 sps:$4 sm:$0xff]   ;;  %v2718_v7 = vld [vmem:[%s4077_s1 + $0x28] ss:$16 sps:$4 sm:$0xff]   ;;  %v2719_v8 = vld [vmem:[%s4077_s1 + $0x44] ss:$16 sps:$4 sm:$0xff]  }
   0x4   :  { %1629 = vmatprep.subr.bf16.mxu0 %v2713_v4  ;;  %1801 = vmatprep.subr.bf16.mxu1 %v2715_v5  ;;  %v2721_v9 = vld [vmem:[%s4077_s1 + $0x4c] ss:$16 sps:$4 sm:$0xff]   ;;  %v2723_v10 = vld [vmem:[%s4077_s1 + $0x40] ss:$16 sps:$4 sm:$0xff]   ;;  %v2724_v11 = vld [vmem:[%s4077_s1 + $0x48] ss:$16 sps:$4 sm:$0xff]  }
   0x5   :  { %v2725_v12 = vld [vmem:[%s4077_s1 + $0x64] ss:$16 sps:$4 sm:$0xff]   ;;  %v2727_v13 = vld [vmem:[%s4077_s1 + $0x6c] ss:$16 sps:$4 sm:$0xff]   ;;  %v2729_v14 = vld [vmem:[%s4077_s1 + $0x60] ss:$16 sps:$4 sm:$0xff]  }
   0x6   :  { %v2730_v15 = vld [vmem:[%s4077_s1 + $0x68] ss:$16 sps:$4 sm:$0xff]   ;;  %v2731_v16 = vld [vmem:[%s4077_s1 + $0x84] ss:$16 sps:$4 sm:$0xff]   ;;  %v2733_v17 = vld [vmem:[%s4077_s1 + $0x8c] ss:$16 sps:$4 sm:$0xff]  }
   0x7   :  { %1630 = vmatpush1.bf16.msra.mxu0 %v2717_v6  ;;  %1802 = vmatpush1.bf16.msra.mxu1 %v2718_v7  ;;  %v2735_v18 = vld [vmem:[%s4077_s1 + $0x80] ss:$16 sps:$4 sm:$0xff]   ;;  %v2736_v19 = vld [vmem:[%s4077_s1 + $0x88] ss:$16 sps:$4 sm:$0xff]   ;;  %v2737_v20 = vld [vmem:[%s4077_s1 + $0xa4] ss:$16 sps:$4 sm:$0xff]  }
   0x8   :  { %1631 = vmatprep.subr.bf16.mxu0 %v2719_v8  ;;  %1803 = vmatprep.subr.bf16.mxu1 %v2721_v9  ;;  %v2739_v21 = vld [vmem:[%s4077_s1 + $0xac] ss:$16 sps:$4 sm:$0xff]   ;;  %v2741_v22 = vld [vmem:[%s4077_s1 + $0xa0] ss:$16 sps:$4 sm:$0xff]   ;;  %v2742_v23 = vld [vmem:[%s4077_s1 + $0xa8] ss:$16 sps:$4 sm:$0xff]  }
   0x9   :  { %v2743_v24 = vld [vmem:[%s4077_s1 + $0xc4] ss:$16 sps:$4 sm:$0xff]   ;;  %v2745_v25 = vld [vmem:[%s4077_s1 + $0xcc] ss:$16 sps:$4 sm:$0xff]   ;;  %v2747_v26 = vld [vmem:[%s4077_s1 + $0xc0] ss:$16 sps:$4 sm:$0xff]  }
   0xa   :  { %v2748_v27 = vld [vmem:[%s4077_s1 + $0xc8] ss:$16 sps:$4 sm:$0xff]   ;;  %v2749_v28 = vld [vmem:[%s4077_s1 + $0xe4] ss:$16 sps:$4 sm:$0xff]   ;;  %v2751_v29 = vld [vmem:[%s4077_s1 + $0xec] ss:$16 sps:$4 sm:$0xff]  }
   0xb   :  { %1632 = vmatpush1.bf16.msra.mxu0 %v2723_v10  ;;  %1804 = vmatpush1.bf16.msra.mxu1 %v2724_v11  ;;  %v2753_v30 = vld [vmem:[%s4077_s1 + $0xe0] ss:$16 sps:$4 sm:$0xff]   ;;  %v2754_v31 = vld [vmem:[%s4077_s1 + $0xe8] ss:$16 sps:$4 sm:$0xff]   ;;  %v2755_v32 = vld [vmem:[%s4077_s1 + $0x104] ss:$16 sps:$4 sm:$0xff]  }
   0xc   :  { %1633 = vmatprep.subr.bf16.mxu0 %v2725_v12  ;;  %1805 = vmatprep.subr.bf16.mxu1 %v2727_v13  ;;  %v2757_v33 = vld [vmem:[%s4077_s1 + $0x10c] ss:$16 sps:$4 sm:$0xff]   ;;  %v2759_v34 = vld [vmem:[%s4077_s1 + $0x100] ss:$16 sps:$4 sm:$0xff]   ;;  %v2760_v35 = vld [vmem:[%s4077_s1 + $0x108] ss:$16 sps:$4 sm:$0xff]  }
   0xd   :  { %v2761_v36 = vld [vmem:[%s4077_s1 + $0x124] ss:$16 sps:$4 sm:$0xff]   ;;  %v2763_v37 = vld [vmem:[%s4077_s1 + $0x12c] ss:$16 sps:$4 sm:$0xff]   ;;  %v2765_v38 = vld [vmem:[%s4077_s1 + $0x120] ss:$16 sps:$4 sm:$0xff]  }
   0xe   :  { %v2766_v39 = vld [vmem:[%s4077_s1 + $0x128] ss:$16 sps:$4 sm:$0xff]   ;;  %v2767_v40 = vld [vmem:[%s4077_s1 + $0x144] ss:$16 sps:$4 sm:$0xff]   ;;  %v2769_v41 = vld [vmem:[%s4077_s1 + $0x14c] ss:$16 sps:$4 sm:$0xff]  }
   0xf   :  { %1634 = vmatpush1.bf16.msra.mxu0 %v2729_v14  ;;  %1806 = vmatpush1.bf16.msra.mxu1 %v2730_v15  ;;  %v2771_v42 = vld [vmem:[%s4077_s1 + $0x140] ss:$16 sps:$4 sm:$0xff]   ;;  %v2772_v43 = vld [vmem:[%s4077_s1 + $0x148] ss:$16 sps:$4 sm:$0xff]   ;;  %v2773_v44 = vld [vmem:[%s4077_s1 + $0x164] ss:$16 sps:$4 sm:$0xff]  }
  0x10   :  { %1635 = vmatprep.subr.bf16.mxu0 %v2731_v16  ;;  %1807 = vmatprep.subr.bf16.mxu1 %v2733_v17  ;;  %v2775_v45 = vld [vmem:[%s4077_s1 + $0x16c] ss:$16 sps:$4 sm:$0xff]   ;;  %v21_v46 = vld [vmem:[%s4078_s0] sm:$0xff]  ;;  %v2778_v49 = vld [vmem:[%s4077_s1 + $0x168] ss:$16 sps:$4 sm:$0xff]  }
  0x11   :  { %v25_v47 = vld [vmem:[%s4078_s0 + $0x20] sm:$0xff]  ;;  %v2781_v52 = vld [vmem:[%s4077_s1 + $0x18c] ss:$16 sps:$4 sm:$0xff]   ;;  %v2784_v54 = vld [vmem:[%s4077_s1 + $0x188] ss:$16 sps:$4 sm:$0xff]  }
  0x12   :  { %v2777_v48 = vld [vmem:[%s4077_s1 + $0x160] ss:$16 sps:$4 sm:$0xff]   ;;  %v2335_v50 = vcombine.high %v21_v46, %v25_v47  ;;  %v2779_v51 = vld [vmem:[%s4077_s1 + $0x184] ss:$16 sps:$4 sm:$0xff]   ;;  %v2787_v56 = vld [vmem:[%s4077_s1 + $0x1ac] ss:$16 sps:$4 sm:$0xff]   ;;  %v2334_v5 = vcombine.low %v21_v46, %v25_v47 }
  0x13   :  { %1636 = vmatpush1.bf16.msra.mxu0 %v2735_v18  ;;  %1808 = vmatpush1.bf16.msra.mxu1 %v2736_v19  ;;  %v2783_v53 = vld [vmem:[%s4077_s1 + $0x180] ss:$16 sps:$4 sm:$0xff]   ;;  %v2785_v55 = vld [vmem:[%s4077_s1 + $0x1a4] ss:$16 sps:$4 sm:$0xff]   ;;  %v2790_v58 = vld [vmem:[%s4077_s1 + $0x1a8] ss:$16 sps:$4 sm:$0xff]  }
  0x14   :  { %1637 = vmatprep.subr.bf16.mxu0 %v2737_v20  ;;  %1809 = vmatprep.subr.bf16.mxu1 %v2739_v21  ;;  %v2789_v57 = vld [vmem:[%s4077_s1 + $0x1a0] ss:$16 sps:$4 sm:$0xff]   ;;  %v2791_v59 = vld [vmem:[%s4077_s1 + $0x1c4] ss:$16 sps:$4 sm:$0xff]   ;;  %v2793_v60 = vld [vmem:[%s4077_s1 + $0x1cc] ss:$16 sps:$4 sm:$0xff]  }
  0x15   :  { %1659 = vmatprep.mubr.bf16.mxu0 %v2335_v50  ;;  %1831 = vmatprep.mubr.bf16.mxu1 %v2335_v50  ;;  %v2795_v61 = vld [vmem:[%s4077_s1 + $0x1c0] ss:$16 sps:$4 sm:$0xff]   ;;  %v2796_v62 = vld [vmem:[%s4077_s1 + $0x1c8] ss:$16 sps:$4 sm:$0xff]   ;;  %v2797_v63 = vld [vmem:[%s4077_s1 + $0x1e4] ss:$16 sps:$4 sm:$0xff]  }
  0x16   :  { %v2799_v0 = vld [vmem:[%s4077_s1 + $0x1ec] ss:$16 sps:$4 sm:$0xff]   ;;  %v2801_v1 = vld [vmem:[%s4077_s1 + $0x1e0] ss:$16 sps:$4 sm:$0xff]   ;;  %v2802_v2 = vld [vmem:[%s4077_s1 + $0x1e8] ss:$16 sps:$4 sm:$0xff]  }
  0x17   :  { %1638 = vmatpush1.bf16.msra.mxu0 %v2741_v22  ;;  %1810 = vmatpush1.bf16.msra.mxu1 %v2742_v23  ;;  %v2805_v3 = vld [vmem:[%s4077_s1 + $0x204] ss:$16 sps:$4 sm:$0xff]   ;;  %v2808_v4 = vld [vmem:[%s4077_s1 + $0x20c] ss:$16 sps:$4 sm:$0xff]   ;;  %v2803_v6 = vld [vmem:[%s4077_s1 + $0x200] ss:$16 sps:$4 sm:$0xff]  }
  0x18   :  { %1639 = vmatprep.subr.bf16.mxu0 %v2743_v24  ;;  %1811 = vmatprep.subr.bf16.mxu1 %v2745_v25  ;;  %v2806_v7 = vld [vmem:[%s4077_s1 + $0x208] ss:$16 sps:$4 sm:$0xff]   ;;  %v2811_v8 = vld [vmem:[%s4077_s1 + $0x224] ss:$16 sps:$4 sm:$0xff]   ;;  %v2814_v9 = vld [vmem:[%s4077_s1 + $0x22c] ss:$16 sps:$4 sm:$0xff]  }
  0x19   :  { %v2809_v10 = vld [vmem:[%s4077_s1 + $0x220] ss:$16 sps:$4 sm:$0xff]   ;;  %v2812_v11 = vld [vmem:[%s4077_s1 + $0x228] ss:$16 sps:$4 sm:$0xff]   ;;  %v2817_v12 = vld [vmem:[%s4077_s1 + $0x244] ss:$16 sps:$4 sm:$0xff]  }
  0x1a   :  { %v2820_v13 = vld [vmem:[%s4077_s1 + $0x24c] ss:$16 sps:$4 sm:$0xff]   ;;  %v2815_v14 = vld [vmem:[%s4077_s1 + $0x240] ss:$16 sps:$4 sm:$0xff]   ;;  %v2818_v15 = vld [vmem:[%s4077_s1 + $0x248] ss:$16 sps:$4 sm:$0xff]  }
  0x1b   :  { %1640 = vmatpush1.bf16.msra.mxu0 %v2747_v26  ;;  %1812 = vmatpush1.bf16.msra.mxu1 %v2748_v27  ;;  %v2823_v16 = vld [vmem:[%s4077_s1 + $0x264] ss:$16 sps:$4 sm:$0xff]   ;;  %v2826_v17 = vld [vmem:[%s4077_s1 + $0x26c] ss:$16 sps:$4 sm:$0xff]   ;;  %v2821_v18 = vld [vmem:[%s4077_s1 + $0x260] ss:$16 sps:$4 sm:$0xff]  }
  0x1c   :  { %1641 = vmatprep.subr.bf16.mxu0 %v2749_v28  ;;  %1813 = vmatprep.subr.bf16.mxu1 %v2751_v29  ;;  %v2824_v19 = vld [vmem:[%s4077_s1 + $0x268] ss:$16 sps:$4 sm:$0xff]   ;;  %v2829_v20 = vld [vmem:[%s4077_s1 + $0x284] ss:$16 sps:$4 sm:$0xff]   ;;  %v2832_v21 = vld [vmem:[%s4077_s1 + $0x28c] ss:$16 sps:$4 sm:$0xff]  }
  0x1d   :  { %v2827_v22 = vld [vmem:[%s4077_s1 + $0x280] ss:$16 sps:$4 sm:$0xff]   ;;  %v2830_v23 = vld [vmem:[%s4077_s1 + $0x288] ss:$16 sps:$4 sm:$0xff]   ;;  %v2835_v24 = vld [vmem:[%s4077_s1 + $0x2a4] ss:$16 sps:$4 sm:$0xff]  }
  0x1e   :  { %v2838_v25 = vld [vmem:[%s4077_s1 + $0x2ac] ss:$16 sps:$4 sm:$0xff]   ;;  %v2833_v26 = vld [vmem:[%s4077_s1 + $0x2a0] ss:$16 sps:$4 sm:$0xff]   ;;  %v2836_v27 = vld [vmem:[%s4077_s1 + $0x2a8] ss:$16 sps:$4 sm:$0xff]  }
  0x1f   :  { %1642 = vmatpush1.bf16.msra.mxu0 %v2753_v30  ;;  %1814 = vmatpush1.bf16.msra.mxu1 %v2754_v31  ;;  %v2841_v28 = vld [vmem:[%s4077_s1 + $0x2c4] ss:$16 sps:$4 sm:$0xff]   ;;  %v2844_v29 = vld [vmem:[%s4077_s1 + $0x2cc] ss:$16 sps:$4 sm:$0xff]   ;;  %v2860_v46 = vld [vmem:[%s4077_s1 + $0x328] ss:$16 sps:$4 sm:$0xff]  }
  0x20   :  { %1643 = vmatprep.subr.bf16.mxu0 %v2755_v32  ;;  %1815 = vmatprep.subr.bf16.mxu1 %v2757_v33  ;;  %v3432_v30 = vld [vmem:[%s4078_s0 + $0x8] sm:$0xff]  ;;  %v2839_v32 = vld [vmem:[%s4077_s1 + $0x2c0] ss:$16 sps:$4 sm:$0xff]   ;;  %v2865_v47 = vld [vmem:[%s4077_s1 + $0x344] ss:$16 sps:$4 sm:$0xff]  }
  0x21   :  { %v3437_v31 = vld [vmem:[%s4078_s0 + $0x28] sm:$0xff] }
  0x22   :  { %v2842_v33 = vld [vmem:[%s4077_s1 + $0x2c8] ss:$16 sps:$4 sm:$0xff]  }
  0x23   :  { %1644 = vmatpush1.bf16.msra.mxu0 %v2759_v34  ;;  %1816 = vmatpush1.bf16.msra.mxu1 %v2760_v35  ;;  %v2337_v34 = vcombine.high %v3432_v30, %v3437_v31  ;;  %v2847_v35 = vld [vmem:[%s4077_s1 + $0x2e4] ss:$16 sps:$4 sm:$0xff]   ;;  %v2866_v50 = vld [vmem:[%s4077_s1 + $0x348] ss:$16 sps:$4 sm:$0xff]  }
  0x24   :  { %1645 = vmatprep.subr.bf16.mxu0 %v2761_v36  ;;  %1817 = vmatprep.subr.bf16.mxu1 %v2763_v37  ;;  %v2850_v36 = vld [vmem:[%s4077_s1 + $0x2ec] ss:$16 sps:$4 sm:$0xff]   ;;  %v2845_v37 = vld [vmem:[%s4077_s1 + $0x2e0] ss:$16 sps:$4 sm:$0xff]  }
  0x27   :  { %1646 = vmatpush1.bf16.msra.mxu0 %v2765_v38  ;;  %1818 = vmatpush1.bf16.msra.mxu1 %v2766_v39  ;;  %v2848_v38 = vld [vmem:[%s4077_s1 + $0x2e8] ss:$16 sps:$4 sm:$0xff]   ;;  %v2853_v39 = vld [vmem:[%s4077_s1 + $0x304] ss:$16 sps:$4 sm:$0xff]  }
  0x28   :  { %1647 = vmatprep.subr.bf16.mxu0 %v2767_v40  ;;  %1819 = vmatprep.subr.bf16.mxu1 %v2769_v41  ;;  %v2856_v40 = vld [vmem:[%s4077_s1 + $0x30c] ss:$16 sps:$4 sm:$0xff]   ;;  %v2851_v41 = vld [vmem:[%s4077_s1 + $0x300] ss:$16 sps:$4 sm:$0xff]  }
  0x2b   :  { %1648 = vmatpush1.bf16.msra.mxu0 %v2771_v42  ;;  %1820 = vmatpush1.bf16.msra.mxu1 %v2772_v43  ;;  %v2854_v42 = vld [vmem:[%s4077_s1 + $0x308] ss:$16 sps:$4 sm:$0xff]   ;;  %v2859_v43 = vld [vmem:[%s4077_s1 + $0x324] ss:$16 sps:$4 sm:$0xff]  }
  0x2c   :  { %1649 = vmatprep.subr.bf16.mxu0 %v2773_v44  ;;  %1821 = vmatprep.subr.bf16.mxu1 %v2775_v45  ;;  %v2862_v44 = vld [vmem:[%s4077_s1 + $0x32c] ss:$16 sps:$4 sm:$0xff]   ;;  %v2857_v45 = vld [vmem:[%s4077_s1 + $0x320] ss:$16 sps:$4 sm:$0xff]  }
  0x2f   :  { %1650 = vmatpush1.bf16.msra.mxu0 %v2777_v48  ;;  %1822 = vmatpush1.bf16.msra.mxu1 %v2778_v49  ;;  %v2868_v48 = vld [vmem:[%s4077_s1 + $0x34c] ss:$16 sps:$4 sm:$0xff]   ;;  %v2863_v49 = vld [vmem:[%s4077_s1 + $0x340] ss:$16 sps:$4 sm:$0xff]  }
  0x30   :  { %1651 = vmatprep.subr.bf16.mxu0 %v2779_v51  ;;  %1823 = vmatprep.subr.bf16.mxu1 %v2781_v52  ;;  %v2871_v51 = vld [vmem:[%s4077_s1 + $0x364] ss:$16 sps:$4 sm:$0xff]   ;;  %v2874_v52 = vld [vmem:[%s4077_s1 + $0x36c] ss:$16 sps:$4 sm:$0xff]  }
  0x33   :  { %1652 = vmatpush1.bf16.msra.mxu0 %v2783_v53  ;;  %1824 = vmatpush1.bf16.msra.mxu1 %v2784_v54  ;;  %v2869_v53 = vld [vmem:[%s4077_s1 + $0x360] ss:$16 sps:$4 sm:$0xff]   ;;  %v2872_v54 = vld [vmem:[%s4077_s1 + $0x368] ss:$16 sps:$4 sm:$0xff]  }
  0x34   :  { %1653 = vmatprep.subr.bf16.mxu0 %v2785_v55  ;;  %1825 = vmatprep.subr.bf16.mxu1 %v2787_v56  ;;  %v2877_v55 = vld [vmem:[%s4077_s1 + $0x384] ss:$16 sps:$4 sm:$0xff]   ;;  %v2880_v56 = vld [vmem:[%s4077_s1 + $0x38c] ss:$16 sps:$4 sm:$0xff]  }
  0x37   :  { %1654 = vmatpush1.bf16.msra.mxu0 %v2789_v57  ;;  %1826 = vmatpush1.bf16.msra.mxu1 %v2790_v58  ;;  %v2875_v57 = vld [vmem:[%s4077_s1 + $0x380] ss:$16 sps:$4 sm:$0xff]   ;;  %v2878_v58 = vld [vmem:[%s4077_s1 + $0x388] ss:$16 sps:$4 sm:$0xff]  }
  0x38   :  { %1655 = vmatprep.subr.bf16.mxu0 %v2791_v59  ;;  %1827 = vmatprep.subr.bf16.mxu1 %v2793_v60  ;;  %v2883_v59 = vld [vmem:[%s4077_s1 + $0x3a4] ss:$16 sps:$4 sm:$0xff]   ;;  %v2886_v60 = vld [vmem:[%s4077_s1 + $0x3ac] ss:$16 sps:$4 sm:$0xff]  }
  0x3b   :  { %1656 = vmatpush1.bf16.msra.mxu0 %v2795_v61  ;;  %1828 = vmatpush1.bf16.msra.mxu1 %v2796_v62  ;;  %v2881_v61 = vld [vmem:[%s4077_s1 + $0x3a0] ss:$16 sps:$4 sm:$0xff]   ;;  %v2884_v62 = vld [vmem:[%s4077_s1 + $0x3a8] ss:$16 sps:$4 sm:$0xff]  }
  0x3c   :  { %1657 = vmatprep.subr.bf16.mxu0 %v2797_v63  ;;  %1829 = vmatprep.subr.bf16.mxu1 %v2799_v0  ;;  %v2889_v63 = vld [vmem:[%s4077_s1 + $0x3c4] ss:$16 sps:$4 sm:$0xff]   ;;  %v2892_v0 = vld [vmem:[%s4077_s1 + $0x3cc] ss:$16 sps:$4 sm:$0xff]  }
  0x3f   :  { %1658 = vmatpush1.bf16.msra.mxu0 %v2801_v1  ;;  %1830 = vmatpush1.bf16.msra.mxu1 %v2802_v2  ;;  %v2887_v1 = vld [vmem:[%s4077_s1 + $0x3c0] ss:$16 sps:$4 sm:$0xff]   ;;  %v2890_v2 = vld [vmem:[%s4077_s1 + $0x3c8] ss:$16 sps:$4 sm:$0xff]  }
  0x40   :  { %1670 = vmatprep.subr.bf16.mxu0 %v2805_v3  ;;  %1842 = vmatprep.subr.bf16.mxu1 %v2808_v4  ;;  %v2895_v3 = vld [vmem:[%s4077_s1 + $0x3e4] ss:$16 sps:$4 sm:$0xff]   ;;  %v2898_v4 = vld [vmem:[%s4077_s1 + $0x3ec] ss:$16 sps:$4 sm:$0xff]  }
  0x42   :  { %1660 = vmatmul.mubr.bf16.vlgmr.msra.gmra.mrb[0].mxu0 %v2334_v5  ;;  %1832 = vmatmul.mubr.bf16.vlgmr.msra.gmra.mrb[0].mxu1 %v2334_v5  ;;  %v2893_v5 = vld [vmem:[%s4077_s1 + $0x3e0] ss:$16 sps:$4 sm:$0xff]  }
  0x43   :  { %1671 = vmatpush1.bf16.msra.mxu0 %v2803_v6  ;;  %1843 = vmatpush1.bf16.msra.mxu1 %v2806_v7  ;;  %v2896_v6 = vld [vmem:[%s4077_s1 + $0x3e8] ss:$16 sps:$4 sm:$0xff]   ;;  %v2901_v7 = vld [vmem:[%s4077_s1 + $0x404] ss:$16 sps:$4 sm:$0xff]  }
  0x44   :  { %1672 = vmatprep.subr.bf16.mxu0 %v2811_v8  ;;  %1844 = vmatprep.subr.bf16.mxu1 %v2814_v9  ;;  %v2904_v8 = vld [vmem:[%s4077_s1 + $0x40c] ss:$16 sps:$4 sm:$0xff]   ;;  %v2336_v9 = vcombine.low %v3432_v30, %v3437_v31  ;;  %v2926_v30 = vld [vmem:[%s4077_s1 + $0x488] ss:$16 sps:$4 sm:$0xff]   ;;  %v2931_v31 = vld [vmem:[%s4077_s1 + $0x4a4] ss:$16 sps:$4 sm:$0xff]  }
  0x45   :  { %1702 = vmatprep.mubr.bf16.mxu0 %v2337_v34  ;;  %1874 = vmatprep.mubr.bf16.mxu1 %v2337_v34  ;;  %v2932_v34 = vld [vmem:[%s4077_s1 + $0x4a8] ss:$16 sps:$4 sm:$0xff]  }
  0x47   :  { %1673 = vmatpush1.bf16.msra.mxu0 %v2809_v10  ;;  %1845 = vmatpush1.bf16.msra.mxu1 %v2812_v11  ;;  %v2899_v10 = vld [vmem:[%s4077_s1 + $0x400] ss:$16 sps:$4 sm:$0xff]   ;;  %v2902_v11 = vld [vmem:[%s4077_s1 + $0x408] ss:$16 sps:$4 sm:$0xff]  }
  0x48   :  { %1674 = vmatprep.subr.bf16.mxu0 %v2817_v12  ;;  %1846 = vmatprep.subr.bf16.mxu1 %v2820_v13  ;;  %v2907_v12 = vld [vmem:[%s4077_s1 + $0x424] ss:$16 sps:$4 sm:$0xff]   ;;  %v2910_v13 = vld [vmem:[%s4077_s1 + $0x42c] ss:$16 sps:$4 sm:$0xff]  }
  0x4b   :  { %1675 = vmatpush1.bf16.msra.mxu0 %v2815_v14  ;;  %1847 = vmatpush1.bf16.msra.mxu1 %v2818_v15  ;;  %v3578_v14 = vld [vmem:[%s4078_s0 + $0x10] sm:$0xff] }
  0x4c   :  { %1676 = vmatprep.subr.bf16.mxu0 %v2823_v16  ;;  %1848 = vmatprep.subr.bf16.mxu1 %v2826_v17  ;;  %v3583_v15 = vld [vmem:[%s4078_s0 + $0x30] sm:$0xff] }
  0x4d   :  { %v2339_v16 = vcombine.high %v3578_v14, %v3583_v15  ;;  %v2905_v17 = vld [vmem:[%s4077_s1 + $0x420] ss:$16 sps:$4 sm:$0xff]  }
  0x4f   :  { %1677 = vmatpush1.bf16.msra.mxu0 %v2821_v18  ;;  %1849 = vmatpush1.bf16.msra.mxu1 %v2824_v19  ;;  %v2908_v18 = vld [vmem:[%s4077_s1 + $0x428] ss:$16 sps:$4 sm:$0xff]   ;;  %v2913_v19 = vld [vmem:[%s4077_s1 + $0x444] ss:$16 sps:$4 sm:$0xff]  }
  0x50   :  { %1678 = vmatprep.subr.bf16.mxu0 %v2829_v20  ;;  %1850 = vmatprep.subr.bf16.mxu1 %v2832_v21  ;;  %v2916_v20 = vld [vmem:[%s4077_s1 + $0x44c] ss:$16 sps:$4 sm:$0xff]   ;;  %v2911_v21 = vld [vmem:[%s4077_s1 + $0x440] ss:$16 sps:$4 sm:$0xff]  }
  0x53   :  { %1679 = vmatpush1.bf16.msra.mxu0 %v2827_v22  ;;  %1851 = vmatpush1.bf16.msra.mxu1 %v2830_v23  ;;  %v2914_v22 = vld [vmem:[%s4077_s1 + $0x448] ss:$16 sps:$4 sm:$0xff]   ;;  %v2919_v23 = vld [vmem:[%s4077_s1 + $0x464] ss:$16 sps:$4 sm:$0xff]  }
  0x54   :  { %1680 = vmatprep.subr.bf16.mxu0 %v2835_v24  ;;  %1852 = vmatprep.subr.bf16.mxu1 %v2838_v25  ;;  %v2922_v24 = vld [vmem:[%s4077_s1 + $0x46c] ss:$16 sps:$4 sm:$0xff]   ;;  %v2917_v25 = vld [vmem:[%s4077_s1 + $0x460] ss:$16 sps:$4 sm:$0xff]  }
  0x57   :  { %1681 = vmatpush1.bf16.msra.mxu0 %v2833_v26  ;;  %1853 = vmatpush1.bf16.msra.mxu1 %v2836_v27  ;;  %v2920_v26 = vld [vmem:[%s4077_s1 + $0x468] ss:$16 sps:$4 sm:$0xff]   ;;  %v2925_v27 = vld [vmem:[%s4077_s1 + $0x484] ss:$16 sps:$4 sm:$0xff]  }
  0x58   :  { %1682 = vmatprep.subr.bf16.mxu0 %v2841_v28  ;;  %1854 = vmatprep.subr.bf16.mxu1 %v2844_v29  ;;  %v2928_v28 = vld [vmem:[%s4077_s1 + $0x48c] ss:$16 sps:$4 sm:$0xff]   ;;  %v2923_v29 = vld [vmem:[%s4077_s1 + $0x480] ss:$16 sps:$4 sm:$0xff]  }
  0x5b   :  { %1683 = vmatpush1.bf16.msra.mxu0 %v2839_v32  ;;  %1855 = vmatpush1.bf16.msra.mxu1 %v2842_v33  ;;  %v2934_v32 = vld [vmem:[%s4077_s1 + $0x4ac] ss:$16 sps:$4 sm:$0xff]   ;;  %v2929_v33 = vld [vmem:[%s4077_s1 + $0x4a0] ss:$16 sps:$4 sm:$0xff]  }
  0x5c   :  { %1684 = vmatprep.subr.bf16.mxu0 %v2847_v35  ;;  %1856 = vmatprep.subr.bf16.mxu1 %v2850_v36  ;;  %v2937_v35 = vld [vmem:[%s4077_s1 + $0x4c4] ss:$16 sps:$4 sm:$0xff]   ;;  %v2940_v36 = vld [vmem:[%s4077_s1 + $0x4cc] ss:$16 sps:$4 sm:$0xff]  }
  0x5f   :  { %1685 = vmatpush1.bf16.msra.mxu0 %v2845_v37  ;;  %1857 = vmatpush1.bf16.msra.mxu1 %v2848_v38  ;;  %v2935_v37 = vld [vmem:[%s4077_s1 + $0x4c0] ss:$16 sps:$4 sm:$0xff]   ;;  %v2938_v38 = vld [vmem:[%s4077_s1 + $0x4c8] ss:$16 sps:$4 sm:$0xff]  }
  0x60   :  { %1686 = vmatprep.subr.bf16.mxu0 %v2853_v39  ;;  %1858 = vmatprep.subr.bf16.mxu1 %v2856_v40  ;;  %v2943_v39 = vld [vmem:[%s4077_s1 + $0x4e4] ss:$16 sps:$4 sm:$0xff]   ;;  %v2946_v40 = vld [vmem:[%s4077_s1 + $0x4ec] ss:$16 sps:$4 sm:$0xff]  }
  0x63   :  { %1687 = vmatpush1.bf16.msra.mxu0 %v2851_v41  ;;  %1859 = vmatpush1.bf16.msra.mxu1 %v2854_v42  ;;  %v2941_v41 = vld [vmem:[%s4077_s1 + $0x4e0] ss:$16 sps:$4 sm:$0xff]   ;;  %v2944_v42 = vld [vmem:[%s4077_s1 + $0x4e8] ss:$16 sps:$4 sm:$0xff]  }
  0x64   :  { %1688 = vmatprep.subr.bf16.mxu0 %v2859_v43  ;;  %1860 = vmatprep.subr.bf16.mxu1 %v2862_v44  ;;  %v2949_v43 = vld [vmem:[%s4077_s1 + $0x504] ss:$16 sps:$4 sm:$0xff]   ;;  %v2952_v44 = vld [vmem:[%s4077_s1 + $0x50c] ss:$16 sps:$4 sm:$0xff]  }
  0x67   :  { %1689 = vmatpush1.bf16.msra.mxu0 %v2857_v45  ;;  %1861 = vmatpush1.bf16.msra.mxu1 %v2860_v46  ;;  %v2947_v45 = vld [vmem:[%s4077_s1 + $0x500] ss:$16 sps:$4 sm:$0xff]   ;;  %v2950_v46 = vld [vmem:[%s4077_s1 + $0x508] ss:$16 sps:$4 sm:$0xff]  }
  0x68   :  { %1690 = vmatprep.subr.bf16.mxu0 %v2865_v47  ;;  %1862 = vmatprep.subr.bf16.mxu1 %v2868_v48  ;;  %v2955_v47 = vld [vmem:[%s4077_s1 + $0x524] ss:$16 sps:$4 sm:$0xff]   ;;  %v2958_v48 = vld [vmem:[%s4077_s1 + $0x52c] ss:$16 sps:$4 sm:$0xff]  }
  0x6b   :  { %1691 = vmatpush1.bf16.msra.mxu0 %v2863_v49  ;;  %1863 = vmatpush1.bf16.msra.mxu1 %v2866_v50  ;;  %v2953_v49 = vld [vmem:[%s4077_s1 + $0x520] ss:$16 sps:$4 sm:$0xff]   ;;  %v2956_v50 = vld [vmem:[%s4077_s1 + $0x528] ss:$16 sps:$4 sm:$0xff]  }
  0x6c   :  { %1692 = vmatprep.subr.bf16.mxu0 %v2871_v51  ;;  %1864 = vmatprep.subr.bf16.mxu1 %v2874_v52  ;;  %v2961_v51 = vld [vmem:[%s4077_s1 + $0x544] ss:$16 sps:$4 sm:$0xff]   ;;  %v2964_v52 = vld [vmem:[%s4077_s1 + $0x54c] ss:$16 sps:$4 sm:$0xff]  }
  0x6f   :  { %1693 = vmatpush1.bf16.msra.mxu0 %v2869_v53  ;;  %1865 = vmatpush1.bf16.msra.mxu1 %v2872_v54  ;;  %v2959_v53 = vld [vmem:[%s4077_s1 + $0x540] ss:$16 sps:$4 sm:$0xff]   ;;  %v2962_v54 = vld [vmem:[%s4077_s1 + $0x548] ss:$16 sps:$4 sm:$0xff]  }
  0x70   :  { %1694 = vmatprep.subr.bf16.mxu0 %v2877_v55  ;;  %1866 = vmatprep.subr.bf16.mxu1 %v2880_v56  ;;  %v2967_v55 = vld [vmem:[%s4077_s1 + $0x564] ss:$16 sps:$4 sm:$0xff]   ;;  %v2970_v56 = vld [vmem:[%s4077_s1 + $0x56c] ss:$16 sps:$4 sm:$0xff]  }
  0x73   :  { %1695 = vmatpush1.bf16.msra.mxu0 %v2875_v57  ;;  %1867 = vmatpush1.bf16.msra.mxu1 %v2878_v58  ;;  %v2965_v57 = vld [vmem:[%s4077_s1 + $0x560] ss:$16 sps:$4 sm:$0xff]   ;;  %v2968_v58 = vld [vmem:[%s4077_s1 + $0x568] ss:$16 sps:$4 sm:$0xff]  }
  0x74   :  { %1696 = vmatprep.subr.bf16.mxu0 %v2883_v59  ;;  %1868 = vmatprep.subr.bf16.mxu1 %v2886_v60  ;;  %v2973_v59 = vld [vmem:[%s4077_s1 + $0x584] ss:$16 sps:$4 sm:$0xff]   ;;  %v2976_v60 = vld [vmem:[%s4077_s1 + $0x58c] ss:$16 sps:$4 sm:$0xff]  }
  0x77   :  { %1697 = vmatpush1.bf16.msra.mxu0 %v2881_v61  ;;  %1869 = vmatpush1.bf16.msra.mxu1 %v2884_v62  ;;  %v2971_v61 = vld [vmem:[%s4077_s1 + $0x580] ss:$16 sps:$4 sm:$0xff]   ;;  %v2974_v62 = vld [vmem:[%s4077_s1 + $0x588] ss:$16 sps:$4 sm:$0xff]  }
  0x78   :  { %1698 = vmatprep.subr.bf16.mxu0 %v2889_v63  ;;  %1870 = vmatprep.subr.bf16.mxu1 %v2892_v0  ;;  %v2979_v63 = vld [vmem:[%s4077_s1 + $0x5a4] ss:$16 sps:$4 sm:$0xff]   ;;  %v2982_v0 = vld [vmem:[%s4077_s1 + $0x5ac] ss:$16 sps:$4 sm:$0xff]  }
  0x7b   :  { %1699 = vmatpush1.bf16.msra.mxu0 %v2887_v1  ;;  %1871 = vmatpush1.bf16.msra.mxu1 %v2890_v2  ;;  %v2977_v1 = vld [vmem:[%s4077_s1 + $0x5a0] ss:$16 sps:$4 sm:$0xff]   ;;  %v2980_v2 = vld [vmem:[%s4077_s1 + $0x5a8] ss:$16 sps:$4 sm:$0xff]  }
  0x7c   :  { %1700 = vmatprep.subr.bf16.mxu0 %v2895_v3  ;;  %1872 = vmatprep.subr.bf16.mxu1 %v2898_v4  ;;  %v2985_v3 = vld [vmem:[%s4077_s1 + $0x5c4] ss:$16 sps:$4 sm:$0xff]   ;;  %v2988_v4 = vld [vmem:[%s4077_s1 + $0x5cc] ss:$16 sps:$4 sm:$0xff]  }
  0x7f   :  { %1701 = vmatpush1.bf16.msra.mxu0 %v2893_v5  ;;  %1873 = vmatpush1.bf16.msra.mxu1 %v2896_v6  ;;  %v2983_v5 = vld [vmem:[%s4077_s1 + $0x5c0] ss:$16 sps:$4 sm:$0xff]   ;;  %v2986_v6 = vld [vmem:[%s4077_s1 + $0x5c8] ss:$16 sps:$4 sm:$0xff]  }
  0x80   :  { %1713 = vmatprep.subr.bf16.mxu0 %v2901_v7  ;;  %1885 = vmatprep.subr.bf16.mxu1 %v2904_v8  ;;  %v2991_v7 = vld [vmem:[%s4077_s1 + $0x5e4] ss:$16 sps:$4 sm:$0xff]   ;;  %v2994_v8 = vld [vmem:[%s4077_s1 + $0x5ec] ss:$16 sps:$4 sm:$0xff]  }
  0x82   :  { %1703 = vmatmul.mubr.bf16.vlgmr.msra.gmra.mrb[0].mxu0 %v2336_v9  ;;  %1875 = vmatmul.mubr.bf16.vlgmr.msra.gmra.mrb[0].mxu1 %v2336_v9  ;;  %v2989_v9 = vld [vmem:[%s4077_s1 + $0x5e0] ss:$16 sps:$4 sm:$0xff]  }
  0x83   :  { %1714 = vmatpush1.bf16.msra.mxu0 %v2899_v10  ;;  %1886 = vmatpush1.bf16.msra.mxu1 %v2902_v11  ;;  %v2992_v10 = vld [vmem:[%s4077_s1 + $0x5e8] ss:$16 sps:$4 sm:$0xff]   ;;  %v2997_v11 = vld [vmem:[%s4077_s1 + $0x604] ss:$16 sps:$4 sm:$0xff]  }
  0x84   :  { %1715 = vmatprep.subr.bf16.mxu0 %v2907_v12  ;;  %1887 = vmatprep.subr.bf16.mxu1 %v2910_v13  ;;  %v3000_v12 = vld [vmem:[%s4077_s1 + $0x60c] ss:$16 sps:$4 sm:$0xff]   ;;  %v2995_v13 = vld [vmem:[%s4077_s1 + $0x600] ss:$16 sps:$4 sm:$0xff]  }
  0x85   :  { %1745 = vmatprep.mubr.bf16.mxu0 %v2339_v16  ;;  %1917 = vmatprep.mubr.bf16.mxu1 %v2339_v16  ;;  %v2998_v16 = vld [vmem:[%s4077_s1 + $0x608] ss:$16 sps:$4 sm:$0xff]  }
  0x87   :  { %1716 = vmatpush1.bf16.msra.mxu0 %v2905_v17  ;;  %1888 = vmatpush1.bf16.msra.mxu1 %v2908_v18  ;;  %v3776_v17 = vld [vmem:[%s4078_s0 + $0x18] sm:$0xff]  ;;  %v2338_v18 = vcombine.low %v3578_v14, %v3583_v15  ;;  %v3001_v14 = vld [vmem:[%s4077_s1 + $0x620] ss:$16 sps:$4 sm:$0xff]  }
  0x88   :  { %1717 = vmatprep.subr.bf16.mxu0 %v2913_v19  ;;  %1889 = vmatprep.subr.bf16.mxu1 %v2916_v20  ;;  %v3783_v19 = vld [vmem:[%s4078_s0 + $0x38] sm:$0xff]  ;;  %v3003_v20 = vld [vmem:[%s4077_s1 + $0x624] ss:$16 sps:$4 sm:$0xff]  }
  0x89   :  { %v3004_v15 = vld [vmem:[%s4077_s1 + $0x628] ss:$16 sps:$4 sm:$0xff]  }
  0x8b   :  { %1718 = vmatpush1.bf16.msra.mxu0 %v2911_v21  ;;  %1890 = vmatpush1.bf16.msra.mxu1 %v2914_v22  ;;  %v3006_v21 = vld [vmem:[%s4077_s1 + $0x62c] ss:$16 sps:$4 sm:$0xff]   ;;  %v2341_v22 = vcombine.high %v3776_v17, %v3783_v19 }
  0x8c   :  { %1719 = vmatprep.subr.bf16.mxu0 %v2919_v23  ;;  %1891 = vmatprep.subr.bf16.mxu1 %v2922_v24  ;;  %v3009_v23 = vld [vmem:[%s4077_s1 + $0x644] ss:$16 sps:$4 sm:$0xff]   ;;  %v3012_v24 = vld [vmem:[%s4077_s1 + $0x64c] ss:$16 sps:$4 sm:$0xff]  }
  0x8f   :  { %1720 = vmatpush1.bf16.msra.mxu0 %v2917_v25  ;;  %1892 = vmatpush1.bf16.msra.mxu1 %v2920_v26  ;;  %v3007_v25 = vld [vmem:[%s4077_s1 + $0x640] ss:$16 sps:$4 sm:$0xff]   ;;  %v3010_v26 = vld [vmem:[%s4077_s1 + $0x648] ss:$16 sps:$4 sm:$0xff]  }
  0x90   :  { %1721 = vmatprep.subr.bf16.mxu0 %v2925_v27  ;;  %1893 = vmatprep.subr.bf16.mxu1 %v2928_v28  ;;  %v3015_v27 = vld [vmem:[%s4077_s1 + $0x664] ss:$16 sps:$4 sm:$0xff]   ;;  %v3018_v28 = vld [vmem:[%s4077_s1 + $0x66c] ss:$16 sps:$4 sm:$0xff]  }
  0x93   :  { %1722 = vmatpush1.bf16.msra.mxu0 %v2923_v29  ;;  %1894 = vmatpush1.bf16.msra.mxu1 %v2926_v30  ;;  %v3013_v29 = vld [vmem:[%s4077_s1 + $0x660] ss:$16 sps:$4 sm:$0xff]   ;;  %v3016_v30 = vld [vmem:[%s4077_s1 + $0x668] ss:$16 sps:$4 sm:$0xff]  }
  0x94   :  { %1723 = vmatprep.subr.bf16.mxu0 %v2931_v31  ;;  %1895 = vmatprep.subr.bf16.mxu1 %v2934_v32  ;;  %v3021_v31 = vld [vmem:[%s4077_s1 + $0x684] ss:$16 sps:$4 sm:$0xff]   ;;  %v3024_v32 = vld [vmem:[%s4077_s1 + $0x68c] ss:$16 sps:$4 sm:$0xff]  }
  0x97   :  { %1724 = vmatpush1.bf16.msra.mxu0 %v2929_v33  ;;  %1896 = vmatpush1.bf16.msra.mxu1 %v2932_v34  ;;  %v3019_v33 = vld [vmem:[%s4077_s1 + $0x680] ss:$16 sps:$4 sm:$0xff]   ;;  %v3022_v34 = vld [vmem:[%s4077_s1 + $0x688] ss:$16 sps:$4 sm:$0xff]  }
  0x98   :  { %1725 = vmatprep.subr.bf16.mxu0 %v2937_v35  ;;  %1897 = vmatprep.subr.bf16.mxu1 %v2940_v36  ;;  %v3027_v35 = vld [vmem:[%s4077_s1 + $0x6a4] ss:$16 sps:$4 sm:$0xff]   ;;  %v3030_v36 = vld [vmem:[%s4077_s1 + $0x6ac] ss:$16 sps:$4 sm:$0xff]  }
  0x9b   :  { %1726 = vmatpush1.bf16.msra.mxu0 %v2935_v37  ;;  %1898 = vmatpush1.bf16.msra.mxu1 %v2938_v38  ;;  %v3025_v37 = vld [vmem:[%s4077_s1 + $0x6a0] ss:$16 sps:$4 sm:$0xff]   ;;  %v3028_v38 = vld [vmem:[%s4077_s1 + $0x6a8] ss:$16 sps:$4 sm:$0xff]  }
  0x9c   :  { %1727 = vmatprep.subr.bf16.mxu0 %v2943_v39  ;;  %1899 = vmatprep.subr.bf16.mxu1 %v2946_v40  ;;  %v3033_v39 = vld [vmem:[%s4077_s1 + $0x6c4] ss:$16 sps:$4 sm:$0xff]   ;;  %v3036_v40 = vld [vmem:[%s4077_s1 + $0x6cc] ss:$16 sps:$4 sm:$0xff]  }
  0x9f   :  { %1728 = vmatpush1.bf16.msra.mxu0 %v2941_v41  ;;  %1900 = vmatpush1.bf16.msra.mxu1 %v2944_v42  ;;  %v3031_v41 = vld [vmem:[%s4077_s1 + $0x6c0] ss:$16 sps:$4 sm:$0xff]   ;;  %v3034_v42 = vld [vmem:[%s4077_s1 + $0x6c8] ss:$16 sps:$4 sm:$0xff]  }
  0xa0   :  { %1729 = vmatprep.subr.bf16.mxu0 %v2949_v43  ;;  %1901 = vmatprep.subr.bf16.mxu1 %v2952_v44  ;;  %v3039_v43 = vld [vmem:[%s4077_s1 + $0x6e4] ss:$16 sps:$4 sm:$0xff]   ;;  %v3042_v44 = vld [vmem:[%s4077_s1 + $0x6ec] ss:$16 sps:$4 sm:$0xff]  }
  0xa3   :  { %1730 = vmatpush1.bf16.msra.mxu0 %v2947_v45  ;;  %1902 = vmatpush1.bf16.msra.mxu1 %v2950_v46  ;;  %v3037_v45 = vld [vmem:[%s4077_s1 + $0x6e0] ss:$16 sps:$4 sm:$0xff]   ;;  %v3040_v46 = vld [vmem:[%s4077_s1 + $0x6e8] ss:$16 sps:$4 sm:$0xff]  }
  0xa4   :  { %1731 = vmatprep.subr.bf16.mxu0 %v2955_v47  ;;  %1903 = vmatprep.subr.bf16.mxu1 %v2958_v48  ;;  %v3045_v47 = vld [vmem:[%s4077_s1 + $0x704] ss:$16 sps:$4 sm:$0xff]   ;;  %v3048_v48 = vld [vmem:[%s4077_s1 + $0x70c] ss:$16 sps:$4 sm:$0xff]  }
  0xa7   :  { %1732 = vmatpush1.bf16.msra.mxu0 %v2953_v49  ;;  %1904 = vmatpush1.bf16.msra.mxu1 %v2956_v50  ;;  %v3043_v49 = vld [vmem:[%s4077_s1 + $0x700] ss:$16 sps:$4 sm:$0xff]   ;;  %v3046_v50 = vld [vmem:[%s4077_s1 + $0x708] ss:$16 sps:$4 sm:$0xff]  }
  0xa8   :  { %1733 = vmatprep.subr.bf16.mxu0 %v2961_v51  ;;  %1905 = vmatprep.subr.bf16.mxu1 %v2964_v52  ;;  %v3051_v51 = vld [vmem:[%s4077_s1 + $0x724] ss:$16 sps:$4 sm:$0xff]   ;;  %v3054_v52 = vld [vmem:[%s4077_s1 + $0x72c] ss:$16 sps:$4 sm:$0xff]  }
  0xab   :  { %1734 = vmatpush1.bf16.msra.mxu0 %v2959_v53  ;;  %1906 = vmatpush1.bf16.msra.mxu1 %v2962_v54  ;;  %v3049_v53 = vld [vmem:[%s4077_s1 + $0x720] ss:$16 sps:$4 sm:$0xff]   ;;  %v3052_v54 = vld [vmem:[%s4077_s1 + $0x728] ss:$16 sps:$4 sm:$0xff]  }
  0xac   :  { %1735 = vmatprep.subr.bf16.mxu0 %v2967_v55  ;;  %1907 = vmatprep.subr.bf16.mxu1 %v2970_v56  ;;  %v3057_v55 = vld [vmem:[%s4077_s1 + $0x744] ss:$16 sps:$4 sm:$0xff]   ;;  %v3060_v56 = vld [vmem:[%s4077_s1 + $0x74c] ss:$16 sps:$4 sm:$0xff]  }
  0xaf   :  { %1736 = vmatpush1.bf16.msra.mxu0 %v2965_v57  ;;  %1908 = vmatpush1.bf16.msra.mxu1 %v2968_v58  ;;  %v3055_v57 = vld [vmem:[%s4077_s1 + $0x740] ss:$16 sps:$4 sm:$0xff]   ;;  %v3058_v58 = vld [vmem:[%s4077_s1 + $0x748] ss:$16 sps:$4 sm:$0xff]  }
  0xb0   :  { %1737 = vmatprep.subr.bf16.mxu0 %v2973_v59  ;;  %1909 = vmatprep.subr.bf16.mxu1 %v2976_v60  ;;  %v3063_v59 = vld [vmem:[%s4077_s1 + $0x764] ss:$16 sps:$4 sm:$0xff]   ;;  %v3066_v60 = vld [vmem:[%s4077_s1 + $0x76c] ss:$16 sps:$4 sm:$0xff]  }
  0xb3   :  { %1738 = vmatpush1.bf16.msra.mxu0 %v2971_v61  ;;  %1910 = vmatpush1.bf16.msra.mxu1 %v2974_v62  ;;  %v3061_v61 = vld [vmem:[%s4077_s1 + $0x760] ss:$16 sps:$4 sm:$0xff]   ;;  %v3064_v62 = vld [vmem:[%s4077_s1 + $0x768] ss:$16 sps:$4 sm:$0xff]  }
  0xb4   :  { %1739 = vmatprep.subr.bf16.mxu0 %v2979_v63  ;;  %1911 = vmatprep.subr.bf16.mxu1 %v2982_v0  ;;  %v3069_v63 = vld [vmem:[%s4077_s1 + $0x784] ss:$16 sps:$4 sm:$0xff]   ;;  %v3072_v0 = vld [vmem:[%s4077_s1 + $0x78c] ss:$16 sps:$4 sm:$0xff]  }
  0xb7   :  { %1740 = vmatpush1.bf16.msra.mxu0 %v2977_v1  ;;  %1912 = vmatpush1.bf16.msra.mxu1 %v2980_v2  ;;  %v3067_v1 = vld [vmem:[%s4077_s1 + $0x780] ss:$16 sps:$4 sm:$0xff]   ;;  %v3070_v2 = vld [vmem:[%s4077_s1 + $0x788] ss:$16 sps:$4 sm:$0xff]  }
  0xb8   :  { %1741 = vmatprep.subr.bf16.mxu0 %v2985_v3  ;;  %1913 = vmatprep.subr.bf16.mxu1 %v2988_v4  ;;  %v3075_v3 = vld [vmem:[%s4077_s1 + $0x7a4] ss:$16 sps:$4 sm:$0xff]   ;;  %v3078_v4 = vld [vmem:[%s4077_s1 + $0x7ac] ss:$16 sps:$4 sm:$0xff]  }
  0xbb   :  { %1742 = vmatpush1.bf16.msra.mxu0 %v2983_v5  ;;  %1914 = vmatpush1.bf16.msra.mxu1 %v2986_v6  ;;  %v3073_v5 = vld [vmem:[%s4077_s1 + $0x7a0] ss:$16 sps:$4 sm:$0xff]   ;;  %v3076_v6 = vld [vmem:[%s4077_s1 + $0x7a8] ss:$16 sps:$4 sm:$0xff]  }
  0xbc   :  { %1743 = vmatprep.subr.bf16.mxu0 %v2991_v7  ;;  %1915 = vmatprep.subr.bf16.mxu1 %v2994_v8  ;;  %v3081_v7 = vld [vmem:[%s4077_s1 + $0x7c4] ss:$16 sps:$4 sm:$0xff]   ;;  %v3084_v8 = vld [vmem:[%s4077_s1 + $0x7cc] ss:$16 sps:$4 sm:$0xff]  }
  0xbf   :  { %1744 = vmatpush1.bf16.msra.mxu0 %v2989_v9  ;;  %1916 = vmatpush1.bf16.msra.mxu1 %v2992_v10  ;;  %v3079_v9 = vld [vmem:[%s4077_s1 + $0x7c0] ss:$16 sps:$4 sm:$0xff]   ;;  %v3082_v10 = vld [vmem:[%s4077_s1 + $0x7c8] ss:$16 sps:$4 sm:$0xff]  }
  0xc0   :  { %1756 = vmatprep.subr.bf16.mxu0 %v2997_v11  ;;  %1928 = vmatprep.subr.bf16.mxu1 %v3000_v12  ;;  %v3087_v11 = vld [vmem:[%s4077_s1 + $0x7e4] ss:$16 sps:$4 sm:$0xff]   ;;  %v3090_v12 = vld [vmem:[%s4077_s1 + $0x7ec] ss:$16 sps:$4 sm:$0xff]  }
  0xc2   :  { %1746 = vmatmul.mubr.bf16.vlgmr.msra.gmra.mrb[0].mxu0 %v2338_v18  ;;  %1918 = vmatmul.mubr.bf16.vlgmr.msra.gmra.mrb[0].mxu1 %v2338_v18  ;;  %v3091_v18 = vld [vmem:[%s4079_s3 + $0x40] sm:$0xff]  }
  0xc3   :  { %1757 = vmatpush1.bf16.msra.mxu0 %v2995_v13  ;;  %1929 = vmatpush1.bf16.msra.mxu1 %v2998_v16  ;;  %v3085_v13 = vld [vmem:[%s4077_s1 + $0x7e0] ss:$16 sps:$4 sm:$0xff]   ;;  %v3088_v16 = vld [vmem:[%s4077_s1 + $0x7e8] ss:$16 sps:$4 sm:$0xff]  }
  0xc4   :  { %1758 = vmatprep.subr.bf16.mxu0 %v3003_v20  ;;  %1930 = vmatprep.subr.bf16.mxu1 %v3006_v21  ;;  %v3092_v20 = vld [vmem:[%s4079_s3 + $0xc0] sm:$0xff]   ;;  %v2340_v21 = vcombine.low %v3776_v17, %v3783_v19  ;;  %v3096_v17 = vld [vmem:[%s4079_s3 + $0xc8] sm:$0xff]  }
  0xc5   :  { %1788 = vmatprep.mubr.bf16.mxu0 %v2341_v22  ;;  %1960 = vmatprep.mubr.bf16.mxu1 %v2341_v22  ;;  %v3095_v22 = vld [vmem:[%s4079_s3 + $0x48] sm:$0xff]  }
  0xc6   :  { %v3097_v19 = vld [vmem:[%s4079_s3 + $0x8] sm:$0xff]  }
  0xc7   :  { %1759 = vmatpush1.bf16.msra.mxu0 %v3001_v14  ;;  %1931 = vmatpush1.bf16.msra.mxu1 %v3004_v15  ;;  %v3093_v14 = vld [vmem:[%s4079_s3] sm:$0xff]  }
  0xc8   :  { %1760 = vmatprep.subr.bf16.mxu0 %v3009_v23  ;;  %1932 = vmatprep.subr.bf16.mxu1 %v3012_v24  ;;  %v3094_v15 = vld [vmem:[%s4079_s3 + $0x80] sm:$0xff]   ;;  %v3098_v23 = vld [vmem:[%s4079_s3 + $0x88] sm:$0xff]   ;;  %v3099_v24 = vld [vmem:[%s4079_s3 + $0x50] sm:$0xff]  }
  0xcb   :  { %1761 = vmatpush1.bf16.msra.mxu0 %v3007_v25  ;;  %1933 = vmatpush1.bf16.msra.mxu1 %v3010_v26  ;;  %v3100_v25 = vld [vmem:[%s4079_s3 + $0xd0] sm:$0xff]  }
  0xcc   :  { %1762 = vmatprep.subr.bf16.mxu0 %v3015_v27  ;;  %1934 = vmatprep.subr.bf16.mxu1 %v3018_v28  ;;  %v3101_v26 = vld [vmem:[%s4079_s3 + $0x10] sm:$0xff]   ;;  %v3103_v28 = vld [vmem:[%s4079_s3 + $0x58] sm:$0xff]  }
  0xcd   :  { %v3102_v27 = vld [vmem:[%s4079_s3 + $0x90] sm:$0xff]  }
  0xcf   :  { %1763 = vmatpush1.bf16.msra.mxu0 %v3013_v29  ;;  %1935 = vmatpush1.bf16.msra.mxu1 %v3016_v30  ;;  %v3104_v29 = vld [vmem:[%s4079_s3 + $0xd8] sm:$0xff]  }
  0xd0   :  { %1764 = vmatprep.subr.bf16.mxu0 %v3021_v31  ;;  %1936 = vmatprep.subr.bf16.mxu1 %v3024_v32  ;;  %v3105_v30 = vld [vmem:[%s4079_s3 + $0x18] sm:$0xff]   ;;  %v3107_v32 = vld [vmem:[%s4079_s3 + $0x60] sm:$0xff]  }
  0xd1   :  { %v3106_v31 = vld [vmem:[%s4079_s3 + $0x98] sm:$0xff]  }
  0xd3   :  { %1765 = vmatpush1.bf16.msra.mxu0 %v3019_v33  ;;  %1937 = vmatpush1.bf16.msra.mxu1 %v3022_v34  ;;  %v3108_v33 = vld [vmem:[%s4079_s3 + $0xe0] sm:$0xff]  }
  0xd4   :  { %1766 = vmatprep.subr.bf16.mxu0 %v3027_v35  ;;  %1938 = vmatprep.subr.bf16.mxu1 %v3030_v36  ;;  %v3109_v34 = vld [vmem:[%s4079_s3 + $0x20] sm:$0xff]   ;;  %v3111_v36 = vld [vmem:[%s4079_s3 + $0x68] sm:$0xff]  }
  0xd5   :  { %v3110_v35 = vld [vmem:[%s4079_s3 + $0xa0] sm:$0xff]  }
  0xd7   :  { %1767 = vmatpush1.bf16.msra.mxu0 %v3025_v37  ;;  %1939 = vmatpush1.bf16.msra.mxu1 %v3028_v38  ;;  %v3112_v37 = vld [vmem:[%s4079_s3 + $0xe8] sm:$0xff]  }
  0xd8   :  { %1768 = vmatprep.subr.bf16.mxu0 %v3033_v39  ;;  %1940 = vmatprep.subr.bf16.mxu1 %v3036_v40  ;;  %v3113_v38 = vld [vmem:[%s4079_s3 + $0x28] sm:$0xff]   ;;  %v3115_v40 = vld [vmem:[%s4079_s3 + $0x70] sm:$0xff]  }
  0xd9   :  { %v3114_v39 = vld [vmem:[%s4079_s3 + $0xa8] sm:$0xff]  }
  0xdb   :  { %1769 = vmatpush1.bf16.msra.mxu0 %v3031_v41  ;;  %1941 = vmatpush1.bf16.msra.mxu1 %v3034_v42  ;;  %v3116_v41 = vld [vmem:[%s4079_s3 + $0xf0] sm:$0xff]  }
  0xdc   :  { %1770 = vmatprep.subr.bf16.mxu0 %v3039_v43  ;;  %1942 = vmatprep.subr.bf16.mxu1 %v3042_v44  ;;  %v3117_v42 = vld [vmem:[%s4079_s3 + $0x30] sm:$0xff]   ;;  %v3119_v44 = vld [vmem:[%s4079_s3 + $0x78] sm:$0xff]  }
  0xdd   :  { %v3118_v43 = vld [vmem:[%s4079_s3 + $0xb0] sm:$0xff]  }
  0xdf   :  { %1771 = vmatpush1.bf16.msra.mxu0 %v3037_v45  ;;  %1943 = vmatpush1.bf16.msra.mxu1 %v3040_v46  ;;  %v3120_v45 = vld [vmem:[%s4079_s3 + $0xf8] sm:$0xff]  }
  0xe0   :  { %1772 = vmatprep.subr.bf16.mxu0 %v3045_v47  ;;  %1944 = vmatprep.subr.bf16.mxu1 %v3048_v48  ;;  %v3121_v46 = vld [vmem:[%s4079_s3 + $0x38] sm:$0xff]   ;;  %v287_v48 = vlaneseq }
  0xe1   :  { %v3122_v47 = vld [vmem:[%s4079_s3 + $0xb8] sm:$0xff]  }
  0xe3   :  { %1773 = vmatpush1.bf16.msra.mxu0 %v3043_v49  ;;  %1945 = vmatpush1.bf16.msra.mxu1 %v3046_v50  ;;  %v288_v49 = vshrl.u32 %v287_v48, 7 }
  0xe4   :  { %1774 = vmatprep.subr.bf16.mxu0 %v3051_v51  ;;  %1946 = vmatprep.subr.bf16.mxu1 %v3054_v52  ;;  %v285_v52 = vld [vmem:[%s4080_s2] sm:$0xf] }
  0xe5   :  { %v289_v50 = vsub.s32 0, %v288_v49  ;;  %v297_v51 = vsub.s32 2, %v288_v49 }
  0xe7   :  { %1775 = vmatpush1.bf16.msra.mxu0 %v3049_v53  ;;  %1947 = vmatpush1.bf16.msra.mxu1 %v3052_v54  ;;  %v293_v53 = vsub.s32 1, %v288_v49  ;;  %v301_v54 = vsub.s32 3, %v288_v49 }
  0xe8   :  { %1776 = vmatprep.subr.bf16.mxu0 %v3057_v55  ;;  %1948 = vmatprep.subr.bf16.mxu1 %v3060_v56  ;;  %v290_v55 = vrot.slane %v285_v52, %v289_v50  ;;  %v298_v56 = vrot.slane %v285_v52, %v297_v51 }
  0xeb   :  { %1777 = vmatpush1.bf16.msra.mxu0 %v3055_v57  ;;  %1949 = vmatpush1.bf16.msra.mxu1 %v3058_v58  ;;  %v294_v57 = vrot.slane %v285_v52, %v293_v53  ;;  %v302_v58 = vrot.slane %v285_v52, %v301_v54 }
  0xec   :  { %1778 = vmatprep.subr.bf16.mxu0 %v3063_v59  ;;  %1950 = vmatprep.subr.bf16.mxu1 %v3066_v60 }
  0xef   :  { %1779 = vmatpush1.bf16.msra.mxu0 %v3061_v61  ;;  %1951 = vmatpush1.bf16.msra.mxu1 %v3064_v62 }
  0xf0   :  { %1780 = vmatprep.subr.bf16.mxu0 %v3069_v63  ;;  %1952 = vmatprep.subr.bf16.mxu1 %v3072_v0 }
  0xf3   :  { %1781 = vmatpush1.bf16.msra.mxu0 %v3067_v1  ;;  %1953 = vmatpush1.bf16.msra.mxu1 %v3070_v2 }
  0xf4   :  { %1782 = vmatprep.subr.bf16.mxu0 %v3075_v3  ;;  %1954 = vmatprep.subr.bf16.mxu1 %v3078_v4 }
  0xf7   :  { %1783 = vmatpush1.bf16.msra.mxu0 %v3073_v5  ;;  %1955 = vmatpush1.bf16.msra.mxu1 %v3076_v6 }
  0xf8   :  { %1784 = vmatprep.subr.bf16.mxu0 %v3081_v7  ;;  %1956 = vmatprep.subr.bf16.mxu1 %v3084_v8 }
  0xfb   :  { %1785 = vmatpush1.bf16.msra.mxu0 %v3079_v9  ;;  %1957 = vmatpush1.bf16.msra.mxu1 %v3082_v10 }
  0xfc   :  { %1786 = vmatprep.subr.bf16.mxu0 %v3087_v11  ;;  %1958 = vmatprep.subr.bf16.mxu1 %v3090_v12 }
  0xff   :  { %1787 = vmatpush1.bf16.msra.mxu0 %v3085_v13  ;;  %1959 = vmatpush1.bf16.msra.mxu1 %v3088_v16 }
 0x100   :  { %2631 = vmatprep.subr.bf16.mxu0 %v3091_v18  ;;  %2653 = vmatprep.subr.bf16.mxu1 %v3092_v20 }
 0x102   :  { %1789 = vmatmul.mubr.bf16.vlgmr.msra.gmra.mrb[0].mxu0 %v2340_v21  ;;  %1961 = vmatmul.mubr.bf16.vlgmr.msra.gmra.mrb[0].mxu1 %v2340_v21 }
 0x103   :  { %2632 = vmatpush3.bf16.msra.mxu0 %v3093_v14  ;;  %2654 = vmatpush3.bf16.msra.mxu1 %v3094_v15 }
 0x104   :  { %2633 = vmatprep.subr.bf16.mxu0 %v3095_v22  ;;  %2655 = vmatprep.subr.bf16.mxu1 %v3096_v17 }
 0x107   :  { %2634 = vmatpush3.bf16.msra.mxu0 %v3097_v19  ;;  %2656 = vmatpush3.bf16.msra.mxu1 %v3098_v23 }
 0x108   :  { %2635 = vmatprep.subr.bf16.mxu0 %v3099_v24  ;;  %2657 = vmatprep.subr.bf16.mxu1 %v3100_v25  ;;  %v2598_v25 = vld [vmem:[%s4081_s4] ss:$0 sm:$0xff] }
 0x10b   :  { %2636 = vmatpush3.bf16.msra.mxu0 %v3101_v26  ;;  %2658 = vmatpush3.bf16.msra.mxu1 %v3102_v27 }
 0x10c   :  { %2637 = vmatprep.subr.bf16.mxu0 %v3103_v28  ;;  %2659 = vmatprep.subr.bf16.mxu1 %v3104_v29 }
 0x10f   :  { %2638 = vmatpush3.bf16.msra.mxu0 %v3105_v30  ;;  %2660 = vmatpush3.bf16.msra.mxu1 %v3106_v31 }
 0x110   :  { %2639 = vmatprep.subr.bf16.mxu0 %v3107_v32  ;;  %2661 = vmatprep.subr.bf16.mxu1 %v3108_v33 }
 0x113   :  { %2640 = vmatpush3.bf16.msra.mxu0 %v3109_v34  ;;  %2662 = vmatpush3.bf16.msra.mxu1 %v3110_v35 }
 0x114   :  { %2641 = vmatprep.subr.bf16.mxu0 %v3111_v36  ;;  %2663 = vmatprep.subr.bf16.mxu1 %v3112_v37 }
 0x117   :  { %2642 = vmatpush3.bf16.msra.mxu0 %v3113_v38  ;;  %2664 = vmatpush3.bf16.msra.mxu1 %v3114_v39 }
 0x118   :  { %2643 = vmatprep.subr.bf16.mxu0 %v3115_v40  ;;  %2665 = vmatprep.subr.bf16.mxu1 %v3116_v41 }
 0x11b   :  { %2644 = vmatpush3.bf16.msra.mxu0 %v3117_v42  ;;  %2666 = vmatpush3.bf16.msra.mxu1 %v3118_v43 }
 0x11c   :  { %2645 = vmatprep.subr.bf16.mxu0 %v3119_v44  ;;  %2667 = vmatprep.subr.bf16.mxu1 %v3120_v45 }
 0x11f   :  { %2646 = vmatpush3.bf16.msra.mxu0 %v3121_v46  ;;  %2668 = vmatpush3.bf16.msra.mxu1 %v3122_v47 }
 0x1d5   :  { %v1790_v59 = vpop.f32.mrb[0].mxu0  ;;  %v1962_v60 = vpop.f32.mrb[0].mxu1 }
 0x1d6   :  { %v2675_v61 = vadd.f32 %v1790_v59, %v290_v55  ;;  %v2679_v62 = vadd.f32 %v1962_v60, %v298_v56  ;;  %v1792_v63 = vpop.f32.mrb[1].mxu0  ;;  %v1964_v0 = vpop.f32.mrb[1].mxu1 }
 0x1d7   :  { %v2676_v1 = vadd.f32 %v1792_v63, %v294_v57  ;;  %v2680_v2 = vadd.f32 %v1964_v0, %v302_v58  ;;  %v1794_v3 = vpop.f32.mrb[2].mxu0  ;;  %v1966_v4 = vpop.f32.mrb[2].mxu1 }
 0x1d8   :  { %v2677_v5 = vadd.f32 %v1794_v3, %v290_v55  ;;  %v2681_v6 = vadd.f32 %v1966_v4, %v298_v56  ;;  %v1796_v7 = vpop.f32.mrb[3].mxu0  ;;  %v1968_v8 = vpop.f32.mrb[3].mxu1  ;;  %v1971_v11 = vmax.f32 %v2675_v61, 0.0  ;;  %v1973_v12 = vmax.f32 %v2679_v62, 0.0 }
 0x1d9   :  { %v2678_v9 = vadd.f32 %v1796_v7, %v294_v57  ;;  %v2682_v10 = vadd.f32 %v1968_v8, %v302_v58  ;;  %v1972_v18 = vmax.f32 %v2676_v1, 0.0  ;;  %v1974_v20 = vmax.f32 %v2680_v2, 0.0 }
 0x1da   :  { %v1975_v13 = vmax.f32 %v2677_v5, 0.0  ;;  %v1977_v16 = vmax.f32 %v2681_v6, 0.0 }
 0x1db   :  { %v1976_v21 = vmax.f32 %v2678_v9, 0.0  ;;  %v1978_v14 = vmax.f32 %v2682_v10, 0.0 }
 0x1dc   :  { %v1979_v15 = vpack.c.bf16 %v1975_v13, %v1971_v11  ;;  %v1981_v22 = vpack.c.bf16 %v1977_v16, %v1973_v12 }
 0x1dd   :  { %v1980_v17 = vpack.c.bf16 %v1976_v21, %v1972_v18  ;;  %v1982_v19 = vpack.c.bf16 %v1978_v14, %v1974_v20 }
 0x1df   :  { %2278 = vmatprep.mubr.bf16.mxu0 %v1980_v17  ;;  %2319 = vmatprep.mubr.bf16.mxu1 %v1982_v19 }
 0x1e0   :  { %2279 = vmatmul.mubr.bf16.vlgmr.msra.gmra.mrb[4].mxu0 %v1979_v15  ;;  %2320 = vmatmul.mubr.bf16.vlgmr.msra.gmra.mrb[4].mxu1 %v1981_v22 }
 0x2b3   :  { %v2647_v23 = vpop.f32.mrb[4].mxu0  ;;  %v2669_v24 = vpop.f32.mrb[4].mxu1 }
 0x2b4   :  { %v2648_v26 = vpop.f32.mrb[5].mxu0  ;;  %v2670_v27 = vpop.f32.mrb[5].mxu1 }
 0x2b5   :  { %v2649_v28 = vadd.f32 %v2648_v26, %v2647_v23  ;;  %v2671_v29 = vadd.f32 %v2670_v27, %v2669_v24  ;;  %v2650_v30 = vpop.f32.mrb[6].mxu0  ;;  %v2672_v31 = vpop.f32.mrb[6].mxu1 }
 0x2b6   :  { %v2651_v32 = vpop.f32.mrb[7].mxu0  ;;  %v2673_v33 = vpop.f32.mrb[7].mxu1 }
 0x2b7   :  { %v2281_v34 = vadd.f32 %v2649_v28, %v2598_v25  ;;  %v2652_v35 = vadd.f32 %v2651_v32, %v2650_v30  ;;  %v2674_v36 = vadd.f32 %v2673_v33, %v2672_v31 }
 0x2b9   :  { %v2322_v37 = vadd.f32 %v2671_v29, %v2281_v34  ;;  %v2284_v38 = vadd.f32 %v2652_v35, %v2598_v25 }
 0x2bb   :  { %2328 = vst [vmem:[%s4082_s5] sm:$0xff] %v2322_v37  ;;  %v2325_v39 = vadd.f32 %v2674_v36, %v2284_v38 }
 0x2bd   :  { %2329 = vst [vmem:[%s4082_s5 + $0x8] sm:$0xff] %v2325_v39 }

</bundles_post_ra>
